<compile_context>
chip_gen: v6e
topology: v6e:2x2x1
jax: 0.10.0
libtpu: 0.0.40
codegen_flags: <defaults>
</compile_context>

<pallas_src>
import functools

import jax
import jax.numpy as jnp
from jax import lax
from jax.experimental import pallas as pl
from jax.experimental.pallas import tpu as pltpu

# ---- "Options" equivalent (deterministic, in-script) -----------------------
BOUND = 1.0          # opt.bound  -> aabb = [-1,-1,-1, 1,1,1]
MIN_NEAR = 0.05      # opt.min_near
BG_COLOR = 1.0       # bg_color = 1 branch of run_cuda
NUM_SAMPLES = 32     # samples per ray (stand-in for march_rays step count)
SAMPLE_CHUNK = 8     # samples batched per layer-2 matmul
HIDDEN = 128         # hidden width, padded to a full 128-lane vreg
C_OUT = 3            # self.C
SIGMA_CLAMP = 15.0   # trunc_exp-style clamp on the density logit

TILE_RAYS = 512      # rays per grid step; rays ride the lane axis (mult of 128)


def _nerf_render_kernel(o_ref, d_ref, w1T_ref, b1_ref, w2T_ref, b2_ref,
                        out_ref, h_buf, *, num_samples, chunk):
    TR = o_ref.shape[1]
    T = num_samples
    H = b1_ref.shape[0]
    n_chunks = T // chunk
    inv_T = 1.0 / T

    o = o_ref[...]                                   # (3, TR) xyz on sublanes
    d = d_ref[...]                                   # (3, TR) rays on lanes

    # normalized marching direction -> metric near/far/delta/depth
    d2 = d[0:1, :] * d[0:1, :] + d[1:2, :] * d[1:2, :] + d[2:3, :] * d[2:3, :]
    dn = d * lax.rsqrt(d2 + 1e-12)                   # (3, TR)

    # ---- 1) near_far_from_aabb (slab test), lane-parallel, exact divide ----
    d_safe = jnp.where(jnp.abs(dn) < 1e-6,
                       jnp.where(dn >= 0, 1e-6, -1e-6), dn)
    inv_d = 1.0 / d_safe                             # exact: once per tile
    t1 = (-BOUND - o) * inv_d                        # (3, TR)
    t2 = (BOUND - o) * inv_d
    tmin = jnp.minimum(t1, t2)
    tmax = jnp.maximum(t1, t2)
    near = jnp.maximum(jnp.maximum(tmin[0:1, :], tmin[1:2, :]), tmin[2:3, :])
    near = jnp.maximum(near, MIN_NEAR)               # (1, TR)
    far = jnp.minimum(jnp.minimum(tmax[0:1, :], tmax[1:2, :]), tmax[2:3, :])
    mask = (near < far).astype(jnp.float32)          # (1, TR)
    span = far - near                                # (1, TR)
    delta = span * inv_T                             # metric step
    dm = delta * mask                                # kill rays missing the box

    # ---- 2) fused per-ray setup: one (2H,8)@(8,TR) bf16 matmul -------------
    #   rows 0..H-1  -> A_pre = WxT @ o + WdT @ dn
    #   rows H..2H-1 -> B     = WxT @ dn
    x8 = jnp.concatenate([o, dn, jnp.zeros((2, TR), jnp.float32)], axis=0)
    AB = jnp.dot(w1T_ref[...], x8.astype(jnp.bfloat16),
                 preferred_element_type=jnp.float32)         # (2H, TR) f32
    A = AB[0:H, :] + b1_ref[...]                             # (H, TR)
    B = AB[H:2 * H, :]                                       # (H, TR)

    # fold near/span into the hoisted affine terms (two one-time broadcasts);
    # inner loop becomes a single scalar FMA:  h(f) = relu(A' + f * B')
    A_p = (A + near * B).astype(jnp.bfloat16)                # (H, TR) bf16
    B_p = (span * B).astype(jnp.bfloat16)                    # (H, TR) bf16

    w2T = w2T_ref[...]                                       # (8, H)  bf16
    b2 = b2_ref[...]                                         # (8, 1)  f32

    # ---- 3) march + network + front-to-back compositing (chunked) ----------
    def chunk_body(c, carry):
        trans, wsum, depth_m, img = carry
        base_f = (c * chunk).astype(jnp.float32)

        # build bf16 h for `chunk` samples into VMEM scratch (lane-dense)
        for s in range(chunk):                       # static, small
            frac = (base_f + (s + 0.5)) * inv_T      # scalar
            h_s = jnp.maximum(A_p + frac.astype(jnp.bfloat16) * B_p, 0.0)
            h_buf[:, s * TR:(s + 1) * TR] = h_s

        # one layer-2 matmul for the whole chunk: (8,H) @ (H, chunk*TR)
        out_c = jnp.dot(w2T, h_buf[...],
                        preferred_element_type=jnp.float32) + b2

        # sequential compositing over the chunk's samples
        for s in range(chunk):                       # static, small
            sl = out_c[:, s * TR:(s + 1) * TR]       # (8, TR): sigma|rgb|pad
            sigma = jnp.exp(jnp.minimum(sl[0:1, :], SIGMA_CLAMP))
            rgb = jax.nn.sigmoid(sl[1:4, :])         # (3, TR)
            frac = (base_f + (s + 0.5)) * inv_T
            z = near + span * frac                   # (1, TR) metric depth
            alpha = 1.0 - jnp.exp(-sigma * dm)       # (1, TR)
            w = alpha * trans
            wsum = wsum + w
            depth_m = depth_m + w * z
            img = img + w * rgb
            trans = trans * (1.0 - alpha)
        return trans, wsum, depth_m, img

    init = (jnp.ones((1, TR), jnp.float32),          # transmittance
            jnp.zeros((1, TR), jnp.float32),         # weights_sum
            jnp.zeros((1, TR), jnp.float32),         # metric depth
            jnp.zeros((3, TR), jnp.float32))         # rgb accumulator
    trans, wsum, depth_m, img = lax.fori_loop(0, n_chunks, chunk_body, init)

    # ---- 4) background blend, depth normalization, packed output -----------
    img = img + (1.0 - wsum) * BG_COLOR
    denom = jnp.where(span > 1e-6, span, 1.0)
    depth_n = (jnp.maximum(depth_m - near, 0.0)
               * pl.reciprocal(denom, approx=True))

    # single lane-dense (8, TR) store: [r, g, b, depth, metric_depth,
    #                                   weights_sum, mask, pad]
    out_ref[...] = jnp.concatenate(
        [img, depth_n, depth_m, wsum, mask, jnp.zeros((1, TR), jnp.float32)],
        axis=0)


def nerf_render(rays_o, rays_d, params, num_samples=NUM_SAMPLES,
                chunk=SAMPLE_CHUNK, tile_rays=TILE_RAYS):
    """rays_o, rays_d: (B, N, 3) float32. Returns dict like NeRFRenderer.run_cuda."""
    assert num_samples % chunk == 0
    B, N, _ = rays_o.shape
    R = B * N
    R_pad = ((R + tile_rays - 1) // tile_rays) * tile_rays

    # rays transposed so rays ride the lane axis inside the kernel
    roT = rays_o.reshape(R, 3).astype(jnp.float32).T          # (3, R)
    rdT = rays_d.reshape(R, 3).astype(jnp.float32).T          # (3, R)
    pad = R_pad - R
    if pad:
        # padded rays start far outside the AABB -> slab test gives mask == 0
        roT = jnp.pad(roT, ((0, 0), (0, pad)), constant_values=10.0)
        rdT = jnp.pad(rdT, ((0, 0), (0, pad)), constant_values=1.0)

    wx, wd, b1, w2, b2 = params
    H = wx.shape[1]

    # fused layer-1 weight (2H, 8) in bf16:  [A_pre; B] = W1T @ [o; dn; 0, 0]
    w1T = jnp.zeros((2 * H, 8), jnp.float32)
    w1T = w1T.at[0:H, 0:3].set(wx.T)          # A_pre: WxT @ o
    w1T = w1T.at[0:H, 3:6].set(wd.T)          #       + WdT @ dn
    w1T = w1T.at[H:2 * H, 3:6].set(wx.T)      # B:     WxT @ dn
    w1T = w1T.astype(jnp.bfloat16)

    b1c = b1.reshape(H, 1).astype(jnp.float32)
    # layer-2 weight padded to 8 output rows (sigma, rgb, 4x pad), bf16
    w2T8 = jnp.zeros((8, H), jnp.float32).at[0:4, :].set(w2.T).astype(jnp.bfloat16)
    b2c = jnp.zeros((8, 1), jnp.float32).at[0:4, 0].set(b2.astype(jnp.float32))

    kernel = functools.partial(_nerf_render_kernel,
                               num_samples=num_samples, chunk=chunk)
    grid = (R_pad // tile_rays,)
    ray_spec = pl.BlockSpec((3, tile_rays), lambda i: (0, i))
    const = lambda shape: pl.BlockSpec(shape, lambda i: (0, 0))

    out = pl.pallas_call(
        kernel,
        out_shape=jax.ShapeDtypeStruct((8, R_pad), jnp.float32),
        grid=grid,
        in_specs=[
            ray_spec,                 # rays_o  (3, R)
            ray_spec,                 # rays_d  (3, R)
            const((2 * H, 8)),        # fused W1T (bf16)
            const((H, 1)),            # b1
            const((8, H)),            # W2T (sigma + rgb, padded, bf16)
            const((8, 1)),            # b2 (padded)
        ],
        out_specs=pl.BlockSpec((8, tile_rays), lambda i: (0, i)),
        scratch_shapes=[
            pltpu.VMEM((H, chunk * tile_rays), jnp.bfloat16),  # h chunk buffer
        ],
        compiler_params=pltpu.CompilerParams(
            dimension_semantics=("parallel",),
            vmem_limit_bytes=32 * 1024 * 1024),   # fits v7x (64 MiB part) too
    )(roT, rdT, w1T, b1c, w2T8, b2c)

    out = out[:, :R]
    image = out[0:3, :].T.reshape(B, N, C_OUT)
    depth = out[3, :].reshape(B, N)
    metric_depth = out[4, :].reshape(B, N)
    weights_sum = out[5, :].reshape(B, N)
    mask = out[6, :].reshape(B, N) > 0.5

    return {
        "image": image,
        "depth": depth,
        "metric_depth": metric_depth,
        "weights_sum": weights_sum,
        "mask": mask,
    }


def init_params(key, hidden=HIDDEN):
    # TODO(synk): stands in for the abstract subclass density/color network.
    k1, k2, k3 = jax.random.split(key, 3)
    wx = 0.5 * jax.random.normal(k1, (3, hidden), jnp.float32)
    wd = 0.5 * jax.random.normal(k2, (3, hidden), jnp.float32)
    b1 = jnp.zeros((hidden,), jnp.float32)
    w2 = 0.1 * jax.random.normal(k3, (hidden, 4), jnp.float32)
    b2 = jnp.zeros((4,), jnp.float32)
    return (wx, wd, b1, w2, b2)


if __name__ == "__main__":
    key = jax.random.PRNGKey(0)
    k_o, k_d, k_p = jax.random.split(key, 3)

    B, N = 2, 1024  # 2048 rays -> 4 grid steps of 512 (>=2 TCs busy on v7x)
    # camera origins slightly outside the unit box, directions roughly inward
    rays_o = 1.5 * jax.random.normal(k_o, (B, N, 3), jnp.float32)
    rays_d = -rays_o + 0.3 * jax.random.normal(k_d, (B, N, 3), jnp.float32)
    rays_d = rays_d / jnp.linalg.norm(rays_d, axis=-1, keepdims=True)

    params = init_params(k_p)

    results = nerf_render(rays_o, rays_d, params)
    jax.block_until_ready(results)

    assert results["image"].shape == (B, N, 3)
    assert results["depth"].shape == (B, N)
    assert results["weights_sum"].shape == (B, N)
    assert results["mask"].shape == (B, N)
    assert bool(jnp.all(jnp.isfinite(results["image"])))
    assert bool(jnp.all(jnp.isfinite(results["depth"])))
    assert bool(jnp.all(jnp.isfinite(results["metric_depth"])))
    assert bool(jnp.all(jnp.isfinite(results["weights_sum"])))
    print("KERNEL_OK")
</pallas_src>

<mosaic_0001>
module attributes {stable_mosaic.version = 11 : i64} {
  func.func @_nerf_render_kernel(%arg0: i32, %arg1: memref<3x512xf32, #tpu.memory_space<vmem>>, %arg2: memref<3x512xf32, #tpu.memory_space<vmem>>, %arg3: memref<256x8xbf16, #tpu.memory_space<vmem>>, %arg4: memref<128x1xf32, #tpu.memory_space<vmem>>, %arg5: memref<8x128xbf16, #tpu.memory_space<vmem>>, %arg6: memref<8x1xf32, #tpu.memory_space<vmem>>, %arg7: memref<8x512xf32, #tpu.memory_space<vmem>>, %arg8: memref<128x4096xbf16, #tpu.memory_space<vmem>>) attributes {dimension_semantics = [#tpu.dimension_semantics<parallel>], iteration_bounds = array<i64: 4>, scalar_prefetch = 0 : i64, scratch_operands = 1 : i64, tpu.core_type = #tpu.core_type<tc>, window_params = [{transform_indices = @transform_0, window_bounds = array<i64: 3, 512>}, {transform_indices = @transform_1, window_bounds = array<i64: 3, 512>}, {pipeline_mode = #tpu.pipeline_mode<synchronous>, transform_indices = @transform_2, window_bounds = array<i64: 256, 8>}, {pipeline_mode = #tpu.pipeline_mode<synchronous>, transform_indices = @transform_3, window_bounds = array<i64: 128, 1>}, {pipeline_mode = #tpu.pipeline_mode<synchronous>, transform_indices = @transform_4, window_bounds = array<i64: 8, 128>}, {pipeline_mode = #tpu.pipeline_mode<synchronous>, transform_indices = @transform_5, window_bounds = array<i64: 8, 1>}, {transform_indices = @transform_6, window_bounds = array<i64: 8, 512>}]} {
    %c0 = arith.constant 0 : index
    %c0_0 = arith.constant 0 : index
    %0 = vector.load %arg1[%c0, %c0_0] : memref<3x512xf32, #tpu.memory_space<vmem>>, vector<3x512xf32>
    %c0_1 = arith.constant 0 : index
    %c0_2 = arith.constant 0 : index
    %1 = vector.load %arg2[%c0_1, %c0_2] : memref<3x512xf32, #tpu.memory_space<vmem>>, vector<3x512xf32>
    %2 = vector.extract_strided_slice %1 {offsets = [0, 0], sizes = [1, 512], strides = [1, 1]} : vector<3x512xf32> to vector<1x512xf32>
    %3 = vector.extract_strided_slice %1 {offsets = [0, 0], sizes = [1, 512], strides = [1, 1]} : vector<3x512xf32> to vector<1x512xf32>
    %4 = arith.mulf %2, %3 : vector<1x512xf32>
    %5 = vector.extract_strided_slice %1 {offsets = [1, 0], sizes = [1, 512], strides = [1, 1]} : vector<3x512xf32> to vector<1x512xf32>
    %6 = vector.extract_strided_slice %1 {offsets = [1, 0], sizes = [1, 512], strides = [1, 1]} : vector<3x512xf32> to vector<1x512xf32>
    %7 = arith.mulf %5, %6 : vector<1x512xf32>
    %8 = arith.addf %4, %7 : vector<1x512xf32>
    %9 = vector.extract_strided_slice %1 {offsets = [2, 0], sizes = [1, 512], strides = [1, 1]} : vector<3x512xf32> to vector<1x512xf32>
    %10 = vector.extract_strided_slice %1 {offsets = [2, 0], sizes = [1, 512], strides = [1, 1]} : vector<3x512xf32> to vector<1x512xf32>
    %11 = arith.mulf %9, %10 : vector<1x512xf32>
    %12 = arith.addf %8, %11 : vector<1x512xf32>
    %cst = arith.constant 9.99999996E-13 : f32
    %13 = vector.broadcast %cst : f32 to vector<1x512xf32>
    %14 = arith.addf %12, %13 : vector<1x512xf32>
    %15 = math.rsqrt %14 : vector<1x512xf32>
    %16 = vector.broadcast %15 : vector<1x512xf32> to vector<3x512xf32>
    %17 = arith.mulf %1, %16 : vector<3x512xf32>
    %18 = math.absf %17 : vector<3x512xf32>
    %cst_3 = arith.constant 9.99999997E-7 : f32
    %19 = vector.broadcast %cst_3 : f32 to vector<3x512xf32>
    %20 = arith.cmpf olt, %18, %19 : vector<3x512xf32>
    %cst_4 = arith.constant 0.000000e+00 : f32
    %21 = vector.broadcast %cst_4 : f32 to vector<3x512xf32>
    %22 = arith.cmpf oge, %17, %21 : vector<3x512xf32>
    %cst_5 = arith.constant 9.99999997E-7 : f32
    %cst_6 = arith.constant -9.99999997E-7 : f32
    %23 = vector.broadcast %cst_5 : f32 to vector<3x512xf32>
    %24 = vector.broadcast %cst_6 : f32 to vector<3x512xf32>
    %25 = arith.select %22, %23, %24 : vector<3x512xi1>, vector<3x512xf32>
    %26 = arith.select %20, %25, %17 : vector<3x512xi1>, vector<3x512xf32>
    %cst_7 = arith.constant 1.000000e+00 : f32
    %27 = vector.broadcast %cst_7 : f32 to vector<3x512xf32>
    %28 = arith.divf %27, %26 : vector<3x512xf32>
    %cst_8 = arith.constant -1.000000e+00 : f32
    %29 = vector.broadcast %cst_8 : f32 to vector<3x512xf32>
    %30 = arith.subf %29, %0 : vector<3x512xf32>
    %31 = arith.mulf %30, %28 : vector<3x512xf32>
    %cst_9 = arith.constant 1.000000e+00 : f32
    %32 = vector.broadcast %cst_9 : f32 to vector<3x512xf32>
    %33 = arith.subf %32, %0 : vector<3x512xf32>
    %34 = arith.mulf %33, %28 : vector<3x512xf32>
    %35 = arith.minimumf %31, %34 : vector<3x512xf32>
    %36 = arith.maximumf %31, %34 : vector<3x512xf32>
    %37 = vector.extract_strided_slice %35 {offsets = [0, 0], sizes = [1, 512], strides = [1, 1]} : vector<3x512xf32> to vector<1x512xf32>
    %38 = vector.extract_strided_slice %35 {offsets = [1, 0], sizes = [1, 512], strides = [1, 1]} : vector<3x512xf32> to vector<1x512xf32>
    %39 = arith.maximumf %37, %38 : vector<1x512xf32>
    %40 = vector.extract_strided_slice %35 {offsets = [2, 0], sizes = [1, 512], strides = [1, 1]} : vector<3x512xf32> to vector<1x512xf32>
    %41 = arith.maximumf %39, %40 : vector<1x512xf32>
    %cst_10 = arith.constant 5.000000e-02 : f32
    %42 = vector.broadcast %cst_10 : f32 to vector<1x512xf32>
    %43 = arith.maximumf %41, %42 : vector<1x512xf32>
    %44 = vector.extract_strided_slice %36 {offsets = [0, 0], sizes = [1, 512], strides = [1, 1]} : vector<3x512xf32> to vector<1x512xf32>
    %45 = vector.extract_strided_slice %36 {offsets = [1, 0], sizes = [1, 512], strides = [1, 1]} : vector<3x512xf32> to vector<1x512xf32>
    %46 = arith.minimumf %44, %45 : vector<1x512xf32>
    %47 = vector.extract_strided_slice %36 {offsets = [2, 0], sizes = [1, 512], strides = [1, 1]} : vector<3x512xf32> to vector<1x512xf32>
    %48 = arith.minimumf %46, %47 : vector<1x512xf32>
    %49 = arith.cmpf olt, %43, %48 : vector<1x512xf32>
    %50 = arith.extui %49 : vector<1x512xi1> to vector<1x512xi32>
    %51 = arith.sitofp %50 : vector<1x512xi32> to vector<1x512xf32>
    %52 = arith.subf %48, %43 : vector<1x512xf32>
    %cst_11 = arith.constant 3.125000e-02 : f32
    %53 = vector.broadcast %cst_11 : f32 to vector<1x512xf32>
    %54 = arith.mulf %52, %53 : vector<1x512xf32>
    %55 = arith.mulf %54, %51 : vector<1x512xf32>
    %cst_12 = arith.constant 0.000000e+00 : f32
    %56 = vector.broadcast %cst_12 : f32 to vector<2x512xf32>
    %57 = tpu.concatenate %0, %17, %56 in 0 : vector<3x512xf32>, vector<3x512xf32>, vector<2x512xf32> -> vector<8x512xf32>
    %c0_13 = arith.constant 0 : index
    %c0_14 = arith.constant 0 : index
    %58 = vector.load %arg3[%c0_13, %c0_14] : memref<256x8xbf16, #tpu.memory_space<vmem>>, vector<256x8xbf16>
    %59 = arith.truncf %57 : vector<8x512xf32> to vector<8x512xbf16>
    %cst_15 = arith.constant dense<0.000000e+00> : vector<256x512xf32>
    %60 = tpu.matmul %58, %59, %cst_15 {dimension_numbers = #tpu.dot_dimension_numbers<[1], [0], [0], [1], [0, 0, 1, 1], [], []>} : vector<256x8xbf16>, vector<8x512xbf16>, vector<256x512xf32> -> vector<256x512xf32>
    %61 = vector.extract_strided_slice %60 {offsets = [0, 0], sizes = [128, 512], strides = [1, 1]} : vector<256x512xf32> to vector<128x512xf32>
    %c0_16 = arith.constant 0 : index
    %c0_17 = arith.constant 0 : index
    %62 = vector.load %arg4[%c0_16, %c0_17] : memref<128x1xf32, #tpu.memory_space<vmem>>, vector<128x1xf32>
    %63 = vector.broadcast %62 : vector<128x1xf32> to vector<128x512xf32>
    %64 = arith.addf %61, %63 : vector<128x512xf32>
    %65 = vector.extract_strided_slice %60 {offsets = [128, 0], sizes = [128, 512], strides = [1, 1]} : vector<256x512xf32> to vector<128x512xf32>
    %66 = vector.broadcast %43 : vector<1x512xf32> to vector<128x512xf32>
    %67 = arith.mulf %66, %65 : vector<128x512xf32>
    %68 = arith.addf %64, %67 : vector<128x512xf32>
    %69 = arith.truncf %68 : vector<128x512xf32> to vector<128x512xbf16>
    %70 = vector.broadcast %52 : vector<1x512xf32> to vector<128x512xf32>
    %71 = arith.mulf %70, %65 : vector<128x512xf32>
    %72 = arith.truncf %71 : vector<128x512xf32> to vector<128x512xbf16>
    %c0_18 = arith.constant 0 : index
    %c0_19 = arith.constant 0 : index
    %73 = vector.load %arg5[%c0_18, %c0_19] : memref<8x128xbf16, #tpu.memory_space<vmem>>, vector<8x128xbf16>
    %c0_20 = arith.constant 0 : index
    %c0_21 = arith.constant 0 : index
    %74 = vector.load %arg6[%c0_20, %c0_21] : memref<8x1xf32, #tpu.memory_space<vmem>>, vector<8x1xf32>
    %cst_22 = arith.constant 1.000000e+00 : f32
    %75 = vector.broadcast %cst_22 : f32 to vector<1x512xf32>
    %cst_23 = arith.constant 0.000000e+00 : f32
    %76 = vector.broadcast %cst_23 : f32 to vector<1x512xf32>
    %cst_24 = arith.constant 0.000000e+00 : f32
    %77 = vector.broadcast %cst_24 : f32 to vector<1x512xf32>
    %cst_25 = arith.constant 0.000000e+00 : f32
    %78 = vector.broadcast %cst_25 : f32 to vector<3x512xf32>
    %c0_i32 = arith.constant 0 : i32
    %c4_i32 = arith.constant 4 : i32
    %79 = arith.addi %c0_i32, %c4_i32 : i32
    %c1_i32 = arith.constant 1 : i32
    %80:4 = scf.for %arg9 = %c0_i32 to %79 step %c1_i32 iter_args(%arg10 = %75, %arg11 = %76, %arg12 = %77, %arg13 = %78) -> (vector<1x512xf32>, vector<1x512xf32>, vector<1x512xf32>, vector<3x512xf32>)  : i32 {
      %c8_i32 = arith.constant 8 : i32
      %99 = arith.muli %arg9, %c8_i32 : i32
      %100 = arith.sitofp %99 : i32 to f32
      %cst_35 = arith.constant 5.000000e-01 : f32
      %101 = arith.addf %100, %cst_35 : f32
      %cst_36 = arith.constant 3.125000e-02 : f32
      %102 = arith.mulf %101, %cst_36 : f32
      %103 = arith.truncf %102 : f32 to bf16
      %104 = vector.broadcast %103 : bf16 to vector<128x512xbf16>
      %105 = arith.mulf %104, %72 : vector<128x512xbf16>
      %106 = arith.addf %69, %105 : vector<128x512xbf16>
      %cst_37 = arith.constant 0.000000e+00 : bf16
      %107 = vector.broadcast %cst_37 : bf16 to vector<128x512xbf16>
      %108 = arith.maximumf %106, %107 : vector<128x512xbf16>
      %c0_38 = arith.constant 0 : index
      %c0_39 = arith.constant 0 : index
      %109 = vector.load %arg8[%c0_38, %c0_39] : memref<128x4096xbf16, #tpu.memory_space<vmem>>, vector<128x512xbf16>
      tpu.vector_store %arg8[%c0_38, %c0_39], %108 {strides = array<i32>} : memref<128x4096xbf16, #tpu.memory_space<vmem>>, vector<128x512xbf16>,
      %cst_40 = arith.constant 1.500000e+00 : f32
      %110 = arith.addf %100, %cst_40 : f32
      %cst_41 = arith.constant 3.125000e-02 : f32
      %111 = arith.mulf %110, %cst_41 : f32
      %112 = arith.truncf %111 : f32 to bf16
      %113 = vector.broadcast %112 : bf16 to vector<128x512xbf16>
      %114 = arith.mulf %113, %72 : vector<128x512xbf16>
      %115 = arith.addf %69, %114 : vector<128x512xbf16>
      %cst_42 = arith.constant 0.000000e+00 : bf16
      %116 = vector.broadcast %cst_42 : bf16 to vector<128x512xbf16>
      %117 = arith.maximumf %115, %116 : vector<128x512xbf16>
      %c0_43 = arith.constant 0 : index
      %c512 = arith.constant 512 : index
      %118 = vector.load %arg8[%c0_43, %c512] : memref<128x4096xbf16, #tpu.memory_space<vmem>>, vector<128x512xbf16>
      tpu.vector_store %arg8[%c0_43, %c512], %117 {strides = array<i32>} : memref<128x4096xbf16, #tpu.memory_space<vmem>>, vector<128x512xbf16>,
      %cst_44 = arith.constant 2.500000e+00 : f32
      %119 = arith.addf %100, %cst_44 : f32
      %cst_45 = arith.constant 3.125000e-02 : f32
      %120 = arith.mulf %119, %cst_45 : f32
      %121 = arith.truncf %120 : f32 to bf16
      %122 = vector.broadcast %121 : bf16 to vector<128x512xbf16>
      %123 = arith.mulf %122, %72 : vector<128x512xbf16>
      %124 = arith.addf %69, %123 : vector<128x512xbf16>
      %cst_46 = arith.constant 0.000000e+00 : bf16
      %125 = vector.broadcast %cst_46 : bf16 to vector<128x512xbf16>
      %126 = arith.maximumf %124, %125 : vector<128x512xbf16>
      %c0_47 = arith.constant 0 : index
      %c1024 = arith.constant 1024 : index
      %127 = vector.load %arg8[%c0_47, %c1024] : memref<128x4096xbf16, #tpu.memory_space<vmem>>, vector<128x512xbf16>
      tpu.vector_store %arg8[%c0_47, %c1024], %126 {strides = array<i32>} : memref<128x4096xbf16, #tpu.memory_space<vmem>>, vector<128x512xbf16>,
      %cst_48 = arith.constant 3.500000e+00 : f32
      %128 = arith.addf %100, %cst_48 : f32
      %cst_49 = arith.constant 3.125000e-02 : f32
      %129 = arith.mulf %128, %cst_49 : f32
      %130 = arith.truncf %129 : f32 to bf16
      %131 = vector.broadcast %130 : bf16 to vector<128x512xbf16>
      %132 = arith.mulf %131, %72 : vector<128x512xbf16>
      %133 = arith.addf %69, %132 : vector<128x512xbf16>
      %cst_50 = arith.constant 0.000000e+00 : bf16
      %134 = vector.broadcast %cst_50 : bf16 to vector<128x512xbf16>
      %135 = arith.maximumf %133, %134 : vector<128x512xbf16>
      %c0_51 = arith.constant 0 : index
      %c1536 = arith.constant 1536 : index
      %136 = vector.load %arg8[%c0_51, %c1536] : memref<128x4096xbf16, #tpu.memory_space<vmem>>, vector<128x512xbf16>
      tpu.vector_store %arg8[%c0_51, %c1536], %135 {strides = array<i32>} : memref<128x4096xbf16, #tpu.memory_space<vmem>>, vector<128x512xbf16>,
      %cst_52 = arith.constant 4.500000e+00 : f32
      %137 = arith.addf %100, %cst_52 : f32
      %cst_53 = arith.constant 3.125000e-02 : f32
      %138 = arith.mulf %137, %cst_53 : f32
      %139 = arith.truncf %138 : f32 to bf16
      %140 = vector.broadcast %139 : bf16 to vector<128x512xbf16>
      %141 = arith.mulf %140, %72 : vector<128x512xbf16>
      %142 = arith.addf %69, %141 : vector<128x512xbf16>
      %cst_54 = arith.constant 0.000000e+00 : bf16
      %143 = vector.broadcast %cst_54 : bf16 to vector<128x512xbf16>
      %144 = arith.maximumf %142, %143 : vector<128x512xbf16>
      %c0_55 = arith.constant 0 : index
      %c2048 = arith.constant 2048 : index
      %145 = vector.load %arg8[%c0_55, %c2048] : memref<128x4096xbf16, #tpu.memory_space<vmem>>, vector<128x512xbf16>
      tpu.vector_store %arg8[%c0_55, %c2048], %144 {strides = array<i32>} : memref<128x4096xbf16, #tpu.memory_space<vmem>>, vector<128x512xbf16>,
      %cst_56 = arith.constant 5.500000e+00 : f32
      %146 = arith.addf %100, %cst_56 : f32
      %cst_57 = arith.constant 3.125000e-02 : f32
      %147 = arith.mulf %146, %cst_57 : f32
      %148 = arith.truncf %147 : f32 to bf16
      %149 = vector.broadcast %148 : bf16 to vector<128x512xbf16>
      %150 = arith.mulf %149, %72 : vector<128x512xbf16>
      %151 = arith.addf %69, %150 : vector<128x512xbf16>
      %cst_58 = arith.constant 0.000000e+00 : bf16
      %152 = vector.broadcast %cst_58 : bf16 to vector<128x512xbf16>
      %153 = arith.maximumf %151, %152 : vector<128x512xbf16>
      %c0_59 = arith.constant 0 : index
      %c2560 = arith.constant 2560 : index
      %154 = vector.load %arg8[%c0_59, %c2560] : memref<128x4096xbf16, #tpu.memory_space<vmem>>, vector<128x512xbf16>
      tpu.vector_store %arg8[%c0_59, %c2560], %153 {strides = array<i32>} : memref<128x4096xbf16, #tpu.memory_space<vmem>>, vector<128x512xbf16>,
      %cst_60 = arith.constant 6.500000e+00 : f32
      %155 = arith.addf %100, %cst_60 : f32
      %cst_61 = arith.constant 3.125000e-02 : f32
      %156 = arith.mulf %155, %cst_61 : f32
      %157 = arith.truncf %156 : f32 to bf16
      %158 = vector.broadcast %157 : bf16 to vector<128x512xbf16>
      %159 = arith.mulf %158, %72 : vector<128x512xbf16>
      %160 = arith.addf %69, %159 : vector<128x512xbf16>
      %cst_62 = arith.constant 0.000000e+00 : bf16
      %161 = vector.broadcast %cst_62 : bf16 to vector<128x512xbf16>
      %162 = arith.maximumf %160, %161 : vector<128x512xbf16>
      %c0_63 = arith.constant 0 : index
      %c3072 = arith.constant 3072 : index
      %163 = vector.load %arg8[%c0_63, %c3072] : memref<128x4096xbf16, #tpu.memory_space<vmem>>, vector<128x512xbf16>
      tpu.vector_store %arg8[%c0_63, %c3072], %162 {strides = array<i32>} : memref<128x4096xbf16, #tpu.memory_space<vmem>>, vector<128x512xbf16>,
      %cst_64 = arith.constant 7.500000e+00 : f32
      %164 = arith.addf %100, %cst_64 : f32
      %cst_65 = arith.constant 3.125000e-02 : f32
      %165 = arith.mulf %164, %cst_65 : f32
      %166 = arith.truncf %165 : f32 to bf16
      %167 = vector.broadcast %166 : bf16 to vector<128x512xbf16>
      %168 = arith.mulf %167, %72 : vector<128x512xbf16>
      %169 = arith.addf %69, %168 : vector<128x512xbf16>
      %cst_66 = arith.constant 0.000000e+00 : bf16
      %170 = vector.broadcast %cst_66 : bf16 to vector<128x512xbf16>
      %171 = arith.maximumf %169, %170 : vector<128x512xbf16>
      %c0_67 = arith.constant 0 : index
      %c3584 = arith.constant 3584 : index
      %172 = vector.load %arg8[%c0_67, %c3584] : memref<128x4096xbf16, #tpu.memory_space<vmem>>, vector<128x512xbf16>
      tpu.vector_store %arg8[%c0_67, %c3584], %171 {strides = array<i32>} : memref<128x4096xbf16, #tpu.memory_space<vmem>>, vector<128x512xbf16>,
      %c0_68 = arith.constant 0 : index
      %c0_69 = arith.constant 0 : index
      %173 = vector.load %arg8[%c0_68, %c0_69] : memref<128x4096xbf16, #tpu.memory_space<vmem>>, vector<128x4096xbf16>
      %cst_70 = arith.constant dense<0.000000e+00> : vector<8x4096xf32>
      %174 = tpu.matmul %73, %173, %cst_70 {dimension_numbers = #tpu.dot_dimension_numbers<[1], [0], [0], [1], [0, 0, 1, 1], [], []>} : vector<8x128xbf16>, vector<128x4096xbf16>, vector<8x4096xf32> -> vector<8x4096xf32>
      %175 = vector.broadcast %74 : vector<8x1xf32> to vector<8x4096xf32>
      %176 = arith.addf %174, %175 : vector<8x4096xf32>
      %177 = vector.extract_strided_slice %176 {offsets = [0, 0], sizes = [8, 512], strides = [1, 1]} : vector<8x4096xf32> to vector<8x512xf32>
      %178 = vector.extract_strided_slice %177 {offsets = [0, 0], sizes = [1, 512], strides = [1, 1]} : vector<8x512xf32> to vector<1x512xf32>
      %cst_71 = arith.constant 1.500000e+01 : f32
      %179 = vector.broadcast %cst_71 : f32 to vector<1x512xf32>
      %180 = arith.minimumf %178, %179 : vector<1x512xf32>
      %181 = math.exp %180 : vector<1x512xf32>
      %182 = vector.extract_strided_slice %177 {offsets = [1, 0], sizes = [3, 512], strides = [1, 1]} : vector<8x512xf32> to vector<3x512xf32>
      %183 = arith.negf %182 : vector<3x512xf32>
      %184 = math.exp %183 : vector<3x512xf32>
      %cst_72 = arith.constant 1.000000e+00 : f32
      %185 = vector.broadcast %cst_72 : f32 to vector<3x512xf32>
      %186 = arith.addf %185, %184 : vector<3x512xf32>
      %187 = arith.divf %185, %186 : vector<3x512xf32>
      %cst_73 = arith.constant 5.000000e-01 : f32
      %188 = arith.addf %100, %cst_73 : f32
      %cst_74 = arith.constant 3.125000e-02 : f32
      %189 = arith.mulf %188, %cst_74 : f32
      %190 = vector.broadcast %189 : f32 to vector<1x512xf32>
      %191 = arith.mulf %52, %190 : vector<1x512xf32>
      %192 = arith.addf %43, %191 : vector<1x512xf32>
      %cst_75 = arith.constant 0.000000e+00 : f32
      %193 = vector.broadcast %cst_75 : f32 to vector<1x512xf32>
      %194 = arith.subf %193, %181 : vector<1x512xf32>
      %195 = arith.mulf %194, %55 : vector<1x512xf32>
      %196 = math.exp %195 : vector<1x512xf32>
      %cst_76 = arith.constant 1.000000e+00 : f32
      %197 = vector.broadcast %cst_76 : f32 to vector<1x512xf32>
      %198 = arith.subf %197, %196 : vector<1x512xf32>
      %199 = arith.mulf %198, %arg10 : vector<1x512xf32>
      %200 = arith.addf %arg11, %199 : vector<1x512xf32>
      %201 = arith.mulf %199, %192 : vector<1x512xf32>
      %202 = arith.addf %arg12, %201 : vector<1x512xf32>
      %203 = vector.broadcast %199 : vector<1x512xf32> to vector<3x512xf32>
      %204 = arith.mulf %203, %187 : vector<3x512xf32>
      %205 = arith.addf %arg13, %204 : vector<3x512xf32>
      %cst_77 = arith.constant 1.000000e+00 : f32
      %206 = vector.broadcast %cst_77 : f32 to vector<1x512xf32>
      %207 = arith.subf %206, %198 : vector<1x512xf32>
      %208 = arith.mulf %arg10, %207 : vector<1x512xf32>
      %209 = vector.extract_strided_slice %176 {offsets = [0, 512], sizes = [8, 512], strides = [1, 1]} : vector<8x4096xf32> to vector<8x512xf32>
      %210 = vector.extract_strided_slice %209 {offsets = [0, 0], sizes = [1, 512], strides = [1, 1]} : vector<8x512xf32> to vector<1x512xf32>
      %cst_78 = arith.constant 1.500000e+01 : f32
      %211 = vector.broadcast %cst_78 : f32 to vector<1x512xf32>
      %212 = arith.minimumf %210, %211 : vector<1x512xf32>
      %213 = math.exp %212 : vector<1x512xf32>
      %214 = vector.extract_strided_slice %209 {offsets = [1, 0], sizes = [3, 512], strides = [1, 1]} : vector<8x512xf32> to vector<3x512xf32>
      %215 = arith.negf %214 : vector<3x512xf32>
      %216 = math.exp %215 : vector<3x512xf32>
      %cst_79 = arith.constant 1.000000e+00 : f32
      %217 = vector.broadcast %cst_79 : f32 to vector<3x512xf32>
      %218 = arith.addf %217, %216 : vector<3x512xf32>
      %219 = arith.divf %217, %218 : vector<3x512xf32>
      %cst_80 = arith.constant 1.500000e+00 : f32
      %220 = arith.addf %100, %cst_80 : f32
      %cst_81 = arith.constant 3.125000e-02 : f32
      %221 = arith.mulf %220, %cst_81 : f32
      %222 = vector.broadcast %221 : f32 to vector<1x512xf32>
      %223 = arith.mulf %52, %222 : vector<1x512xf32>
      %224 = arith.addf %43, %223 : vector<1x512xf32>
      %cst_82 = arith.constant 0.000000e+00 : f32
      %225 = vector.broadcast %cst_82 : f32 to vector<1x512xf32>
      %226 = arith.subf %225, %213 : vector<1x512xf32>
      %227 = arith.mulf %226, %55 : vector<1x512xf32>
      %228 = math.exp %227 : vector<1x512xf32>
      %cst_83 = arith.constant 1.000000e+00 : f32
      %229 = vector.broadcast %cst_83 : f32 to vector<1x512xf32>
      %230 = arith.subf %229, %228 : vector<1x512xf32>
      %231 = arith.mulf %230, %208 : vector<1x512xf32>
      %232 = arith.addf %200, %231 : vector<1x512xf32>
      %233 = arith.mulf %231, %224 : vector<1x512xf32>
      %234 = arith.addf %202, %233 : vector<1x512xf32>
      %235 = vector.broadcast %231 : vector<1x512xf32> to vector<3x512xf32>
      %236 = arith.mulf %235, %219 : vector<3x512xf32>
      %237 = arith.addf %205, %236 : vector<3x512xf32>
      %cst_84 = arith.constant 1.000000e+00 : f32
      %238 = vector.broadcast %cst_84 : f32 to vector<1x512xf32>
      %239 = arith.subf %238, %230 : vector<1x512xf32>
      %240 = arith.mulf %208, %239 : vector<1x512xf32>
      %241 = vector.extract_strided_slice %176 {offsets = [0, 1024], sizes = [8, 512], strides = [1, 1]} : vector<8x4096xf32> to vector<8x512xf32>
      %242 = vector.extract_strided_slice %241 {offsets = [0, 0], sizes = [1, 512], strides = [1, 1]} : vector<8x512xf32> to vector<1x512xf32>
      %cst_85 = arith.constant 1.500000e+01 : f32
      %243 = vector.broadcast %cst_85 : f32 to vector<1x512xf32>
      %244 = arith.minimumf %242, %243 : vector<1x512xf32>
      %245 = math.exp %244 : vector<1x512xf32>
      %246 = vector.extract_strided_slice %241 {offsets = [1, 0], sizes = [3, 512], strides = [1, 1]} : vector<8x512xf32> to vector<3x512xf32>
      %247 = arith.negf %246 : vector<3x512xf32>
      %248 = math.exp %247 : vector<3x512xf32>
      %cst_86 = arith.constant 1.000000e+00 : f32
      %249 = vector.broadcast %cst_86 : f32 to vector<3x512xf32>
      %250 = arith.addf %249, %248 : vector<3x512xf32>
      %251 = arith.divf %249, %250 : vector<3x512xf32>
      %cst_87 = arith.constant 2.500000e+00 : f32
      %252 = arith.addf %100, %cst_87 : f32
      %cst_88 = arith.constant 3.125000e-02 : f32
      %253 = arith.mulf %252, %cst_88 : f32
      %254 = vector.broadcast %253 : f32 to vector<1x512xf32>
      %255 = arith.mulf %52, %254 : vector<1x512xf32>
      %256 = arith.addf %43, %255 : vector<1x512xf32>
      %cst_89 = arith.constant 0.000000e+00 : f32
      %257 = vector.broadcast %cst_89 : f32 to vector<1x512xf32>
      %258 = arith.subf %257, %245 : vector<1x512xf32>
      %259 = arith.mulf %258, %55 : vector<1x512xf32>
      %260 = math.exp %259 : vector<1x512xf32>
      %cst_90 = arith.constant 1.000000e+00 : f32
      %261 = vector.broadcast %cst_90 : f32 to vector<1x512xf32>
      %262 = arith.subf %261, %260 : vector<1x512xf32>
      %263 = arith.mulf %262, %240 : vector<1x512xf32>
      %264 = arith.addf %232, %263 : vector<1x512xf32>
      %265 = arith.mulf %263, %256 : vector<1x512xf32>
      %266 = arith.addf %234, %265 : vector<1x512xf32>
      %267 = vector.broadcast %263 : vector<1x512xf32> to vector<3x512xf32>
      %268 = arith.mulf %267, %251 : vector<3x512xf32>
      %269 = arith.addf %237, %268 : vector<3x512xf32>
      %cst_91 = arith.constant 1.000000e+00 : f32
      %270 = vector.broadcast %cst_91 : f32 to vector<1x512xf32>
      %271 = arith.subf %270, %262 : vector<1x512xf32>
      %272 = arith.mulf %240, %271 : vector<1x512xf32>
      %273 = vector.extract_strided_slice %176 {offsets = [0, 1536], sizes = [8, 512], strides = [1, 1]} : vector<8x4096xf32> to vector<8x512xf32>
      %274 = vector.extract_strided_slice %273 {offsets = [0, 0], sizes = [1, 512], strides = [1, 1]} : vector<8x512xf32> to vector<1x512xf32>
      %cst_92 = arith.constant 1.500000e+01 : f32
      %275 = vector.broadcast %cst_92 : f32 to vector<1x512xf32>
      %276 = arith.minimumf %274, %275 : vector<1x512xf32>
      %277 = math.exp %276 : vector<1x512xf32>
      %278 = vector.extract_strided_slice %273 {offsets = [1, 0], sizes = [3, 512], strides = [1, 1]} : vector<8x512xf32> to vector<3x512xf32>
      %279 = arith.negf %278 : vector<3x512xf32>
      %280 = math.exp %279 : vector<3x512xf32>
      %cst_93 = arith.constant 1.000000e+00 : f32
      %281 = vector.broadcast %cst_93 : f32 to vector<3x512xf32>
      %282 = arith.addf %281, %280 : vector<3x512xf32>
      %283 = arith.divf %281, %282 : vector<3x512xf32>
      %cst_94 = arith.constant 3.500000e+00 : f32
      %284 = arith.addf %100, %cst_94 : f32
      %cst_95 = arith.constant 3.125000e-02 : f32
      %285 = arith.mulf %284, %cst_95 : f32
      %286 = vector.broadcast %285 : f32 to vector<1x512xf32>
      %287 = arith.mulf %52, %286 : vector<1x512xf32>
      %288 = arith.addf %43, %287 : vector<1x512xf32>
      %cst_96 = arith.constant 0.000000e+00 : f32
      %289 = vector.broadcast %cst_96 : f32 to vector<1x512xf32>
      %290 = arith.subf %289, %277 : vector<1x512xf32>
      %291 = arith.mulf %290, %55 : vector<1x512xf32>
      %292 = math.exp %291 : vector<1x512xf32>
      %cst_97 = arith.constant 1.000000e+00 : f32
      %293 = vector.broadcast %cst_97 : f32 to vector<1x512xf32>
      %294 = arith.subf %293, %292 : vector<1x512xf32>
      %295 = arith.mulf %294, %272 : vector<1x512xf32>
      %296 = arith.addf %264, %295 : vector<1x512xf32>
      %297 = arith.mulf %295, %288 : vector<1x512xf32>
      %298 = arith.addf %266, %297 : vector<1x512xf32>
      %299 = vector.broadcast %295 : vector<1x512xf32> to vector<3x512xf32>
      %300 = arith.mulf %299, %283 : vector<3x512xf32>
      %301 = arith.addf %269, %300 : vector<3x512xf32>
      %cst_98 = arith.constant 1.000000e+00 : f32
      %302 = vector.broadcast %cst_98 : f32 to vector<1x512xf32>
      %303 = arith.subf %302, %294 : vector<1x512xf32>
      %304 = arith.mulf %272, %303 : vector<1x512xf32>
      %305 = vector.extract_strided_slice %176 {offsets = [0, 2048], sizes = [8, 512], strides = [1, 1]} : vector<8x4096xf32> to vector<8x512xf32>
      %306 = vector.extract_strided_slice %305 {offsets = [0, 0], sizes = [1, 512], strides = [1, 1]} : vector<8x512xf32> to vector<1x512xf32>
      %cst_99 = arith.constant 1.500000e+01 : f32
      %307 = vector.broadcast %cst_99 : f32 to vector<1x512xf32>
      %308 = arith.minimumf %306, %307 : vector<1x512xf32>
      %309 = math.exp %308 : vector<1x512xf32>
      %310 = vector.extract_strided_slice %305 {offsets = [1, 0], sizes = [3, 512], strides = [1, 1]} : vector<8x512xf32> to vector<3x512xf32>
      %311 = arith.negf %310 : vector<3x512xf32>
      %312 = math.exp %311 : vector<3x512xf32>
      %cst_100 = arith.constant 1.000000e+00 : f32
      %313 = vector.broadcast %cst_100 : f32 to vector<3x512xf32>
      %314 = arith.addf %313, %312 : vector<3x512xf32>
      %315 = arith.divf %313, %314 : vector<3x512xf32>
      %cst_101 = arith.constant 4.500000e+00 : f32
      %316 = arith.addf %100, %cst_101 : f32
      %cst_102 = arith.constant 3.125000e-02 : f32
      %317 = arith.mulf %316, %cst_102 : f32
      %318 = vector.broadcast %317 : f32 to vector<1x512xf32>
      %319 = arith.mulf %52, %318 : vector<1x512xf32>
      %320 = arith.addf %43, %319 : vector<1x512xf32>
      %cst_103 = arith.constant 0.000000e+00 : f32
      %321 = vector.broadcast %cst_103 : f32 to vector<1x512xf32>
      %322 = arith.subf %321, %309 : vector<1x512xf32>
      %323 = arith.mulf %322, %55 : vector<1x512xf32>
      %324 = math.exp %323 : vector<1x512xf32>
      %cst_104 = arith.constant 1.000000e+00 : f32
      %325 = vector.broadcast %cst_104 : f32 to vector<1x512xf32>
      %326 = arith.subf %325, %324 : vector<1x512xf32>
      %327 = arith.mulf %326, %304 : vector<1x512xf32>
      %328 = arith.addf %296, %327 : vector<1x512xf32>
      %329 = arith.mulf %327, %320 : vector<1x512xf32>
      %330 = arith.addf %298, %329 : vector<1x512xf32>
      %331 = vector.broadcast %327 : vector<1x512xf32> to vector<3x512xf32>
      %332 = arith.mulf %331, %315 : vector<3x512xf32>
      %333 = arith.addf %301, %332 : vector<3x512xf32>
      %cst_105 = arith.constant 1.000000e+00 : f32
      %334 = vector.broadcast %cst_105 : f32 to vector<1x512xf32>
      %335 = arith.subf %334, %326 : vector<1x512xf32>
      %336 = arith.mulf %304, %335 : vector<1x512xf32>
      %337 = vector.extract_strided_slice %176 {offsets = [0, 2560], sizes = [8, 512], strides = [1, 1]} : vector<8x4096xf32> to vector<8x512xf32>
      %338 = vector.extract_strided_slice %337 {offsets = [0, 0], sizes = [1, 512], strides = [1, 1]} : vector<8x512xf32> to vector<1x512xf32>
      %cst_106 = arith.constant 1.500000e+01 : f32
      %339 = vector.broadcast %cst_106 : f32 to vector<1x512xf32>
      %340 = arith.minimumf %338, %339 : vector<1x512xf32>
      %341 = math.exp %340 : vector<1x512xf32>
      %342 = vector.extract_strided_slice %337 {offsets = [1, 0], sizes = [3, 512], strides = [1, 1]} : vector<8x512xf32> to vector<3x512xf32>
      %343 = arith.negf %342 : vector<3x512xf32>
      %344 = math.exp %343 : vector<3x512xf32>
      %cst_107 = arith.constant 1.000000e+00 : f32
      %345 = vector.broadcast %cst_107 : f32 to vector<3x512xf32>
      %346 = arith.addf %345, %344 : vector<3x512xf32>
      %347 = arith.divf %345, %346 : vector<3x512xf32>
      %cst_108 = arith.constant 5.500000e+00 : f32
      %348 = arith.addf %100, %cst_108 : f32
      %cst_109 = arith.constant 3.125000e-02 : f32
      %349 = arith.mulf %348, %cst_109 : f32
      %350 = vector.broadcast %349 : f32 to vector<1x512xf32>
      %351 = arith.mulf %52, %350 : vector<1x512xf32>
      %352 = arith.addf %43, %351 : vector<1x512xf32>
      %cst_110 = arith.constant 0.000000e+00 : f32
      %353 = vector.broadcast %cst_110 : f32 to vector<1x512xf32>
      %354 = arith.subf %353, %341 : vector<1x512xf32>
      %355 = arith.mulf %354, %55 : vector<1x512xf32>
      %356 = math.exp %355 : vector<1x512xf32>
      %cst_111 = arith.constant 1.000000e+00 : f32
      %357 = vector.broadcast %cst_111 : f32 to vector<1x512xf32>
      %358 = arith.subf %357, %356 : vector<1x512xf32>
      %359 = arith.mulf %358, %336 : vector<1x512xf32>
      %360 = arith.addf %328, %359 : vector<1x512xf32>
      %361 = arith.mulf %359, %352 : vector<1x512xf32>
      %362 = arith.addf %330, %361 : vector<1x512xf32>
      %363 = vector.broadcast %359 : vector<1x512xf32> to vector<3x512xf32>
      %364 = arith.mulf %363, %347 : vector<3x512xf32>
      %365 = arith.addf %333, %364 : vector<3x512xf32>
      %cst_112 = arith.constant 1.000000e+00 : f32
      %366 = vector.broadcast %cst_112 : f32 to vector<1x512xf32>
      %367 = arith.subf %366, %358 : vector<1x512xf32>
      %368 = arith.mulf %336, %367 : vector<1x512xf32>
      %369 = vector.extract_strided_slice %176 {offsets = [0, 3072], sizes = [8, 512], strides = [1, 1]} : vector<8x4096xf32> to vector<8x512xf32>
      %370 = vector.extract_strided_slice %369 {offsets = [0, 0], sizes = [1, 512], strides = [1, 1]} : vector<8x512xf32> to vector<1x512xf32>
      %cst_113 = arith.constant 1.500000e+01 : f32
      %371 = vector.broadcast %cst_113 : f32 to vector<1x512xf32>
      %372 = arith.minimumf %370, %371 : vector<1x512xf32>
      %373 = math.exp %372 : vector<1x512xf32>
      %374 = vector.extract_strided_slice %369 {offsets = [1, 0], sizes = [3, 512], strides = [1, 1]} : vector<8x512xf32> to vector<3x512xf32>
      %375 = arith.negf %374 : vector<3x512xf32>
      %376 = math.exp %375 : vector<3x512xf32>
      %cst_114 = arith.constant 1.000000e+00 : f32
      %377 = vector.broadcast %cst_114 : f32 to vector<3x512xf32>
      %378 = arith.addf %377, %376 : vector<3x512xf32>
      %379 = arith.divf %377, %378 : vector<3x512xf32>
      %cst_115 = arith.constant 6.500000e+00 : f32
      %380 = arith.addf %100, %cst_115 : f32
      %cst_116 = arith.constant 3.125000e-02 : f32
      %381 = arith.mulf %380, %cst_116 : f32
      %382 = vector.broadcast %381 : f32 to vector<1x512xf32>
      %383 = arith.mulf %52, %382 : vector<1x512xf32>
      %384 = arith.addf %43, %383 : vector<1x512xf32>
      %cst_117 = arith.constant 0.000000e+00 : f32
      %385 = vector.broadcast %cst_117 : f32 to vector<1x512xf32>
      %386 = arith.subf %385, %373 : vector<1x512xf32>
      %387 = arith.mulf %386, %55 : vector<1x512xf32>
      %388 = math.exp %387 : vector<1x512xf32>
      %cst_118 = arith.constant 1.000000e+00 : f32
      %389 = vector.broadcast %cst_118 : f32 to vector<1x512xf32>
      %390 = arith.subf %389, %388 : vector<1x512xf32>
      %391 = arith.mulf %390, %368 : vector<1x512xf32>
      %392 = arith.addf %360, %391 : vector<1x512xf32>
      %393 = arith.mulf %391, %384 : vector<1x512xf32>
      %394 = arith.addf %362, %393 : vector<1x512xf32>
      %395 = vector.broadcast %391 : vector<1x512xf32> to vector<3x512xf32>
      %396 = arith.mulf %395, %379 : vector<3x512xf32>
      %397 = arith.addf %365, %396 : vector<3x512xf32>
      %cst_119 = arith.constant 1.000000e+00 : f32
      %398 = vector.broadcast %cst_119 : f32 to vector<1x512xf32>
      %399 = arith.subf %398, %390 : vector<1x512xf32>
      %400 = arith.mulf %368, %399 : vector<1x512xf32>
      %401 = vector.extract_strided_slice %176 {offsets = [0, 3584], sizes = [8, 512], strides = [1, 1]} : vector<8x4096xf32> to vector<8x512xf32>
      %402 = vector.extract_strided_slice %401 {offsets = [0, 0], sizes = [1, 512], strides = [1, 1]} : vector<8x512xf32> to vector<1x512xf32>
      %cst_120 = arith.constant 1.500000e+01 : f32
      %403 = vector.broadcast %cst_120 : f32 to vector<1x512xf32>
      %404 = arith.minimumf %402, %403 : vector<1x512xf32>
      %405 = math.exp %404 : vector<1x512xf32>
      %406 = vector.extract_strided_slice %401 {offsets = [1, 0], sizes = [3, 512], strides = [1, 1]} : vector<8x512xf32> to vector<3x512xf32>
      %407 = arith.negf %406 : vector<3x512xf32>
      %408 = math.exp %407 : vector<3x512xf32>
      %cst_121 = arith.constant 1.000000e+00 : f32
      %409 = vector.broadcast %cst_121 : f32 to vector<3x512xf32>
      %410 = arith.addf %409, %408 : vector<3x512xf32>
      %411 = arith.divf %409, %410 : vector<3x512xf32>
      %cst_122 = arith.constant 7.500000e+00 : f32
      %412 = arith.addf %100, %cst_122 : f32
      %cst_123 = arith.constant 3.125000e-02 : f32
      %413 = arith.mulf %412, %cst_123 : f32
      %414 = vector.broadcast %413 : f32 to vector<1x512xf32>
      %415 = arith.mulf %52, %414 : vector<1x512xf32>
      %416 = arith.addf %43, %415 : vector<1x512xf32>
      %cst_124 = arith.constant 0.000000e+00 : f32
      %417 = vector.broadcast %cst_124 : f32 to vector<1x512xf32>
      %418 = arith.subf %417, %405 : vector<1x512xf32>
      %419 = arith.mulf %418, %55 : vector<1x512xf32>
      %420 = math.exp %419 : vector<1x512xf32>
      %cst_125 = arith.constant 1.000000e+00 : f32
      %421 = vector.broadcast %cst_125 : f32 to vector<1x512xf32>
      %422 = arith.subf %421, %420 : vector<1x512xf32>
      %423 = arith.mulf %422, %400 : vector<1x512xf32>
      %424 = arith.addf %392, %423 : vector<1x512xf32>
      %425 = arith.mulf %423, %416 : vector<1x512xf32>
      %426 = arith.addf %394, %425 : vector<1x512xf32>
      %427 = vector.broadcast %423 : vector<1x512xf32> to vector<3x512xf32>
      %428 = arith.mulf %427, %411 : vector<3x512xf32>
      %429 = arith.addf %397, %428 : vector<3x512xf32>
      %cst_126 = arith.constant 1.000000e+00 : f32
      %430 = vector.broadcast %cst_126 : f32 to vector<1x512xf32>
      %431 = arith.subf %430, %422 : vector<1x512xf32>
      %432 = arith.mulf %400, %431 : vector<1x512xf32>
      scf.yield %432, %424, %426, %429 : vector<1x512xf32>, vector<1x512xf32>, vector<1x512xf32>, vector<3x512xf32>
    }
    %c4_i32_26 = arith.constant 4 : i32
    %cst_27 = arith.constant 1.000000e+00 : f32
    %81 = vector.broadcast %cst_27 : f32 to vector<1x512xf32>
    %82 = arith.subf %81, %80#1 : vector<1x512xf32>
    %cst_28 = arith.constant 1.000000e+00 : f32
    %83 = vector.broadcast %cst_28 : f32 to vector<1x512xf32>
    %84 = arith.mulf %82, %83 : vector<1x512xf32>
    %85 = vector.broadcast %84 : vector<1x512xf32> to vector<3x512xf32>
    %86 = arith.addf %80#3, %85 : vector<3x512xf32>
    %cst_29 = arith.constant 9.99999997E-7 : f32
    %87 = vector.broadcast %cst_29 : f32 to vector<1x512xf32>
    %88 = arith.cmpf ogt, %52, %87 : vector<1x512xf32>
    %cst_30 = arith.constant 1.000000e+00 : f32
    %89 = vector.broadcast %cst_30 : f32 to vector<1x512xf32>
    %90 = arith.select %88, %52, %89 : vector<1x512xi1>, vector<1x512xf32>
    %91 = arith.subf %80#2, %43 : vector<1x512xf32>
    %cst_31 = arith.constant 0.000000e+00 : f32
    %92 = vector.broadcast %cst_31 : f32 to vector<1x512xf32>
    %93 = arith.maximumf %91, %92 : vector<1x512xf32>
    %94 = tpu.reciprocal %90 {approx = true} : vector<1x512xf32> -> vector<1x512xf32>
    %95 = arith.mulf %93, %94 : vector<1x512xf32>
    %cst_32 = arith.constant 0.000000e+00 : f32
    %96 = vector.broadcast %cst_32 : f32 to vector<1x512xf32>
    %97 = tpu.concatenate %86, %95, %80#2, %80#1, %51, %96 in 0 : vector<3x512xf32>, vector<1x512xf32>, vector<1x512xf32>, vector<1x512xf32>, vector<1x512xf32>, vector<1x512xf32> -> vector<8x512xf32>
    %c0_33 = arith.constant 0 : index
    %c0_34 = arith.constant 0 : index
    %98 = vector.load %arg7[%c0_33, %c0_34] : memref<8x512xf32, #tpu.memory_space<vmem>>, vector<8x512xf32>
    tpu.vector_store %arg7[%c0_33, %c0_34], %97 {strides = array<i32>} : memref<8x512xf32, #tpu.memory_space<vmem>>, vector<8x512xf32>,
    return
  }
  func.func @transform_0(%arg0: i32) -> (i32, i32) {
    %c0_i32 = arith.constant 0 : i32
    %c0_i32_0 = arith.constant 0 : i32
    return %c0_i32, %arg0 : i32, i32
  }
  func.func @transform_1(%arg0: i32) -> (i32, i32) {
    %c0_i32 = arith.constant 0 : i32
    %c0_i32_0 = arith.constant 0 : i32
    return %c0_i32, %arg0 : i32, i32
  }
  func.func @transform_2(%arg0: i32) -> (i32, i32) {
    %c0_i32 = arith.constant 0 : i32
    %c0_i32_0 = arith.constant 0 : i32
    %c0_i32_1 = arith.constant 0 : i32
    return %c0_i32, %c0_i32_0 : i32, i32
  }
  func.func @transform_3(%arg0: i32) -> (i32, i32) {
    %c0_i32 = arith.constant 0 : i32
    %c0_i32_0 = arith.constant 0 : i32
    %c0_i32_1 = arith.constant 0 : i32
    return %c0_i32, %c0_i32_0 : i32, i32
  }
  func.func @transform_4(%arg0: i32) -> (i32, i32) {
    %c0_i32 = arith.constant 0 : i32
    %c0_i32_0 = arith.constant 0 : i32
    %c0_i32_1 = arith.constant 0 : i32
    return %c0_i32, %c0_i32_0 : i32, i32
  }
  func.func @transform_5(%arg0: i32) -> (i32, i32) {
    %c0_i32 = arith.constant 0 : i32
    %c0_i32_0 = arith.constant 0 : i32
    %c0_i32_1 = arith.constant 0 : i32
    return %c0_i32, %c0_i32_0 : i32, i32
  }
  func.func @transform_6(%arg0: i32) -> (i32, i32) {
    %c0_i32 = arith.constant 0 : i32
    %c0_i32_0 = arith.constant 0 : i32
    return %c0_i32, %arg0 : i32, i32
  }
}

</mosaic_0001>

<bundles_post_ra>
// kernel: tpu_custom_call.1
= control target key start
LH: loop header
LB: loop body
LE: loop exit
PB: predicated region body
PF: predicated region fallthrough
CT: control target
= control target key end

     0   :  { %s11949_s0 = inlined_call_operand.vmem [shape: f32[3,2048], index: 0, kind: input, shape index: {}]   ;;  %s11950_s1 = inlined_call_operand.vmem [shape: f32[3,2048], index: 1, kind: input, shape index: {}]   ;;  %s11951_s2 = inlined_call_operand.vmem [shape: bf16[256,8], index: 2, kind: input, shape index: {}]   ;;  %s11952_s3 = inlined_call_operand.vmem [shape: f32[128,1], index: 3, kind: input, shape index: {}]   ;;  %s11953_s4 = inlined_call_operand.vmem [shape: bf16[8,128], index: 4, kind: input, shape index: {}]   ;;  %s11954_s5 = inlined_call_operand.vmem [shape: f32[8,1], index: 5, kind: input, shape index: {}]   ;;  %s11955_s6 = inlined_call_operand.hbm [shape: f32[8,2048], index: 6, kind: output, shape index: {}]  }
   0x1   :  { %12138 = sst [smem:[#allocation100_spill]] %s11949_s0 }
   0x2   :  { %12139 = sst [smem:[#allocation101_spill]] %s11950_s1 }
   0x3   :  { %11 = vsyncpa [#allocation4], 0 }
   0x4   :  { %13 = vsyncpa [#allocation4 + $0x1], 0  ;;  %s8866_s21 = smov 0   ;;  %s8868_s22 = smov 0  }
   0x5   :  { %s8870_s23 = smov 0   ;;  %s8872_s24 = smov 0  }
   0x6 LB: > { %s8887_s25 = sadd.s32 4294967295, %s8756_s24   ;;  %s7536_s26 = sadd.s32 4294967294, %s8756_s24   ;;  %s8756_s24 = sphi %s8872_s24, %s12657_s24   ;;  %s8752_s23 = sphi %s8870_s23, %s12656_s23   ;;  %s8748_s22 = sphi %s8868_s22, %s12655_s22   ;;  %s8744_s21 = sphi %s8866_s21, %s12654_s21  }
   0x7   : > { %s8891_s27 = sadd.s32 1, %s8756_s24   ;;  %s162_s28 = sadd.s32 1, %s8752_s23 }
   0x8   : > { %s159_s29 = ssub.s32 %s8756_s24, %s8891_s27  ;;  %p172_p0 = scmp.ne.s32.totalorder %s8752_s23, %s8748_s22 }
   0x9   : > { %p160_p1 = scmp.eq.s32.totalorder %s159_s29, 0  ;;  %p173_p2 = scmp.eq.s32.totalorder %s8887_s25, 3 }
   0xa   : > { %p178_p3 = scmp.ne.s32.totalorder %s8748_s22, %s8744_s21  ;;  %p179_p4 = scmp.eq.s32.totalorder %s7536_s26, 3 }
   0xb   : > { %s8902_s30 = scalar_select %p160_p1, %s8752_s23, %s162_s28  }
   0xc   : > { %p8904_p5 = por %p173_p2, %p172_p0  ;;  %p8908_p6 = por %p179_p4, %p178_p3 }
   0xd   : > { %p7539_p7 = scmp.ge.s32.totalorder %s8756_s24, 1  ;;  %p227_p8 = scmp.lt.s32.totalorder %s8756_s24, 5 }
   0xf   : > { %p228_p9 = pnand %p7539_p7, %p227_p8 }
  0x11   : > { %231 = sbr.rel (%p228_p9) target bundleno = 979 (0x3d3), region = 44 }
  0x16   : > { %s12012_s9 = sand.u32 1, %s8748_s22   ;;  %s7541_s10 = sshll.u32 %s8887_s25, 2  ;;  %v8826_v0 = vmov 0   ;;  %v1020_v11 = vld [vmem:[%s11952_s3] sm:$0xff]  ;;  %v1021_v14 = vld [vmem:[%s11952_s3 + $0x8] sm:$0xff]  ;;  %v1022_v15 = vld [vmem:[%s11952_s3 + $0x10] sm:$0xff]  ;;  %v306_v20 = vlaneseq }
  0x17   : > { %s8918_s11 = sshll.u32 %s12012_s9, 5  ;;  %p263_p10 = scmp.lt.s32.totalorder %s7541_s10, 15  ;;  %666 = vmatprep.mubr.bf16.mxu0 %v8826_v0  ;;  %859 = vmatprep.mubr.bf16.mxu1 %v8826_v0  ;;  %v1023_v18 = vld [vmem:[%s11952_s3 + $0x18] sm:$0xff]  ;;  %v1024_v19 = vld [vmem:[%s11952_s3 + $0x20] sm:$0xff]  ;;  %v1025_v21 = vld [vmem:[%s11952_s3 + $0x28] sm:$0xff]  ;;  %vm446_vm0 = vcmask 1042432  }
  0x18   : > { %8339 = vset.pattern.permute.xlu0 %v8826_v0  ;;  %8340 = vset.pattern.permute.xlu1 %v8826_v0  ;;  %s12142_s1 = sld [smem:[#allocation101_spill]]  ;;  %v1026_v22 = vld [vmem:[%s11952_s3 + $0x30] sm:$0xff]  ;;  %v307_v23 = vshrl.u32 %v306_v20, 7  ;;  %v1027_v24 = vld [vmem:[%s11952_s3 + $0x38] sm:$0xff]  ;;  %v1028_v25 = vld [vmem:[%s11952_s3 + $0x40] sm:$0xff]  ;;  %vm451_vm1 = vcmask 1045504  }
  0x19   : > { %s12659_s10 = smov (!%p263_p10, %s7541_s10), 15  ;;  %1038 = vperm.xlu0 %8339, %v1020_v11   ;;  %1048 = vperm.xlu1 %8340, %v1022_v15   ;;  %v1029_v29 = vld [vmem:[%s11952_s3 + $0x48] sm:$0xff]  ;;  %v1030_v30 = vld [vmem:[%s11952_s3 + $0x50] sm:$0xff]  ;;  %s12145_s0 = sld [smem:[#allocation100_spill]]  ;;  %vm621_vm2 = vcmask 1043456   ;;  %v1031_v48 = vld [vmem:[%s11952_s3 + $0x58] sm:$0xff] }
  0x1a   : > { %s7542_s12 = sshll.u32 %s12659_s10, 2  ;;  %v8959_v26 = vsub.s32 0, %v307_v23  ;;  %v8961_v27 = vsub.s32 4, %v307_v23  ;;  %v1032_v49 = vld [vmem:[%s11952_s3 + $0x60] sm:$0xff]  ;;  %v8827_v53 = vmov -1e-06  }
  0x1b   : > { %v1033_v11 = vld [vmem:[%s11952_s3 + $0x68] sm:$0xff]  ;;  %vm572_vm7 = vcmask 64512   ;;  %s9842_s13 = scalar_lea.vmem [#allocation3], %s8918_s11  ;;  %s9876_s11 = smov 0  }
  0x1c   : > { %12143 = vst [vmem:[#allocation6_spill] sm:$0xff] %v8959_v26  ;;  %12144 = vst [vmem:[#allocation7_spill] sm:$0xff] %v8961_v27 }
  0x1d   : > { %1043 = vperm.xlu0 %8339, %v1021_v14   ;;  %1053 = vperm.xlu1 %8340, %v1023_v18   ;;  %v8343_v14 = vld [vmem:[%s11951_s2] sm:$0xff]  }
  0x1e   : > { %s272_s15 = scalar_lea.vmem %s12142_s1, %s7542_s12 }
  0x1f   : > { %v278_v1 = vld [vmem:[%s272_s15] sm:$0x77]  ;;  %v279_v2 = vld [vmem:[%s272_s15 + $0x8] sm:$0x77]  ;;  %s266_s18 = scalar_lea.vmem %s12145_s0, %s7542_s12 }
  0x20   : > { %v280_v3 = vmul.f32 %v278_v1, %v278_v1  ;;  %v281_v4 = vmul.f32 %v279_v2, %v279_v2  ;;  %v8982_v40 = vld [vmem:[%s266_s18] sm:$0x77]  ;;  %v8984_v42 = vld [vmem:[%s266_s18 + $0x8] sm:$0x77] }
  0x21   : > { %1058 = vperm.xlu0 %8339, %v1024_v19   ;;  %1063 = vperm.xlu1 %8340, %v1025_v21   ;;  %v430_v46 = vcombine.high %v8982_v40, %v8982_v40  ;;  %v431_v47 = vcombine.high %v8984_v42, %v8984_v42  ;;  %v366_v18 = vsub.f32 -1.0, %v8982_v40  ;;  %v370_v19 = vsub.f32 1.0, %v8982_v40 }
  0x22   : > { %v7545_v5 = vrot.slane %v280_v3, 9  ;;  %v7546_v6 = vrot.slane %v281_v4, 9  ;;  %v7547_v7 = vrot.slane %v280_v3, 10  ;;  %v7548_v8 = vrot.slane %v281_v4, 10 }
  0x23   : > { %v367_v20 = vsub.f32 -1.0, %v8984_v42  ;;  %v371_v21 = vsub.f32 1.0, %v8984_v42 }
  0x24   : > { %v290_v9 = vadd.f32 %v7545_v5, %v280_v3  ;;  %v291_v10 = vadd.f32 %v7546_v6, %v281_v4 }
  0x25   : > { %1068 = vperm.xlu0 %8339, %v1026_v22   ;;  %1073 = vperm.xlu1 %8340, %v1027_v24   ;;  %v8344_v22 = vld [vmem:[%s11951_s2 + $0x8] sm:$0xff]  }
  0x26   : > { %v298_v12 = vadd.f32 %v7547_v7, %v290_v9  ;;  %v299_v13 = vadd.f32 %v7548_v8, %v291_v10 }
  0x28   : > { %v300_v16 = vadd.f32 1e-12, %v298_v12  ;;  %v301_v17 = vadd.f32 1e-12, %v299_v13  ;;  %v1034_v12 = vld [vmem:[%s11952_s3 + $0x70] sm:$0xff] }
  0x29   : > { %1078 = vperm.xlu0 %8339, %v1028_v25   ;;  %1083 = vperm.xlu1 %8340, %v1029_v29  }
  0x2a   : > { %8359 = vrsqrt.f32 %v300_v16  ;;  %v1035_v16 = vld [vmem:[%s11952_s3 + $0x78] sm:$0xff] }
  0x2b   : > { %8361 = vrsqrt.f32 %v301_v17 }
  0x2d   : > { %1088 = vperm.xlu0 %8339, %v1030_v30   ;;  %1093 = vperm.xlu1 %8340, %v1031_v48  }
  0x31   : > { %1098 = vperm.xlu0 %8339, %v1032_v49   ;;  %1103 = vperm.xlu1 %8340, %v1033_v11   ;;  %v8357_v11 = vld [vmem:[%s11951_s2 + $0x70] sm:$0xff]  }
  0x35   : > { %1108 = vperm.xlu0 %8339, %v1034_v12   ;;  %1113 = vperm.xlu1 %8340, %v1035_v16   ;;  %v8358_v12 = vld [vmem:[%s11951_s2 + $0x78] sm:$0xff]  }
  0x37   : > { %v8360_v28 = vpop.eup %8359 }
  0x38   : > { %v8362_v31 = vpop.eup %8361  ;;  %v309_v32 = vrot.slane %v8360_v28, %v8959_v26  ;;  %v313_v33 = vrot.slane %v8360_v28, %v8961_v27 }
  0x39   : > { %v317_v34 = vrot.slane %v8362_v31, %v8959_v26  ;;  %v321_v35 = vrot.slane %v8362_v31, %v8961_v27 }
  0x3a   : > { %v329_v36 = vrot.slane %v309_v32, %v8959_v26  ;;  %v333_v37 = vrot.slane %v313_v33, %v8959_v26 }
  0x3b   : > { %v337_v38 = vrot.slane %v317_v34, %v8959_v26  ;;  %v341_v39 = vrot.slane %v321_v35, %v8959_v26 }
  0x3c   : > { %v346_v41 = vcombine.low %v329_v36, %v333_v37 }
  0x3d   : > { %v347_v43 = vcombine.low %v337_v38, %v341_v39 }
  0x3e   : > { %v350_v44 = vmul.f32 %v346_v41, %v278_v1 }
  0x3f   : > { %v351_v45 = vmul.f32 %v347_v43, %v279_v2 }
  0x40   : > { %v352_v50 = vand.u32 2147483647, %v350_v44  ;;  %vm356_vm3 = vcmp.ge.f32.partialorder %v350_v44, 0.0  ;;  %v436_v51 = vcombine.high %v350_v44, %v350_v44  ;;  %v438_v52 = vrot.slane %v350_v44, 5 }
  0x41   : > { %v358_v54 = vsel %vm356_vm3, 1e-06, %v8827_v53  ;;  %v353_v55 = vand.u32 2147483647, %v351_v45  ;;  %vm357_vm4 = vcmp.ge.f32.partialorder %v351_v45, 0.0  ;;  %v437_v56 = vcombine.high %v351_v45, %v351_v45 }
  0x42   : > { %vm354_vm5 = vcmp.lt.f32.partialorder %v352_v50, 1e-06  ;;  %v439_v57 = vrot.slane %v436_v51, 5  ;;  %v359_v58 = vsel %vm357_vm4, 1e-06, %v8827_v53  ;;  %v447_v59 = vsel %vm446_vm0, %v8982_v40, %v438_v52 }
  0x43   : > { %v360_v60 = vsel %vm354_vm5, %v358_v54, %v350_v44  ;;  %vm355_vm6 = vcmp.lt.f32.partialorder %v353_v55, 1e-06  ;;  %v441_v61 = vrot.slane %v437_v56, 5  ;;  %v452_v62 = vsel %vm451_vm1, %v447_v59, 0.0 }
  0x44   : > { %8363 = vrcp.f32 %v360_v60  ;;  %v448_v63 = vsel %vm446_vm0, %v430_v46, %v439_v57  ;;  %v361_v1 = vsel %vm355_vm6, %v359_v58, %v351_v45  ;;  %v488_v2 = vpack.c.bf16 %v452_v62, %v452_v62  ;;  %v8346_v60 = vld [vmem:[%s11951_s2 + $0x18] sm:$0xff]  }
  0x45   : > { %v453_v3 = vsel %vm451_vm1, %v448_v63, 0.0  ;;  %8365 = vrcp.f32 %v361_v1  ;;  %v450_v4 = vsel %vm446_vm0, %v431_v47, %v441_v61  ;;  %v440_v5 = vrot.slane %v351_v45, 5  ;;  %v8345_v45 = vld [vmem:[%s11951_s2 + $0x10] sm:$0xff]   ;;  %v8347_v1 = vld [vmem:[%s11951_s2 + $0x20] sm:$0xff]  }
  0x46   : > { %v489_v6 = vpack.c.bf16 %v453_v3, %v453_v3  ;;  %v455_v7 = vsel %vm451_vm1, %v450_v4, 0.0  ;;  %v623_v8 = vsel %vm621_vm2, %v488_v2, 0  ;;  %v8828_v55 = vmov 0.0   ;;  %v8348_v2 = vld [vmem:[%s11951_s2 + $0x28] sm:$0xff]   ;;  %v8349_v3 = vld [vmem:[%s11951_s2 + $0x30] sm:$0xff]   ;;  %v8350_v4 = vld [vmem:[%s11951_s2 + $0x38] sm:$0xff]  }
  0x47   : > { %v491_v9 = vpack.c.bf16 %v455_v7, %v455_v7  ;;  %v449_v10 = vsel %vm446_vm0, %v8984_v42, %v440_v5  ;;  %v8351_v5 = vld [vmem:[%s11951_s2 + $0x40] sm:$0xff]   ;;  %v8353_v7 = vld [vmem:[%s11951_s2 + $0x50] sm:$0xff]  }
  0x48   : > { %7575 = vmatprep.subr.msk.bf16.mxu0 %vm621_vm2, %v489_v6  ;;  %v454_v13 = vsel %vm451_vm1, %v449_v10, 0.0  ;;  %v8352_v6 = vld [vmem:[%s11951_s2 + $0x48] sm:$0xff]  }
  0x49   : > { %7592 = vmatprep.subr.msk.bf16.mxu1 %vm621_vm2, %v491_v9  ;;  %649 = vmatpush1.bf16.msra.mxu0 %v623_v8  ;;  %v490_v15 = vpack.c.bf16 %v454_v13, %v454_v13  ;;  %v8354_v8 = vld [vmem:[%s11951_s2 + $0x58] sm:$0xff]   ;;  %v8355_v9 = vld [vmem:[%s11951_s2 + $0x60] sm:$0xff]   ;;  %v8356_v10 = vld [vmem:[%s11951_s2 + $0x68] sm:$0xff]  }
  0x4b   : > { %v629_v17 = vsel %vm621_vm2, %v490_v15, 0 }
  0x4c   : > { %842 = vmatpush1.bf16.msra.mxu1 %v629_v17  ;;  %7576 = vmatmul.mubr.msk.bf16.vlgmr.msra.gmra.mxu0 %vm572_vm7, %v8343_v14 }
  0x4d   : > { %676 = vmatprep.mubr.bf16.mxu0 %v8826_v0 }
  0x4f   : > { %7593 = vmatmul.mubr.msk.bf16.vlgmr.msra.gmra.mxu1 %vm572_vm7, %v8343_v14 }
  0x50   : > { %869 = vmatprep.mubr.bf16.mxu1 %v8826_v0 }
  0x51   : > { %v8364_v23 = vpop.eup %8363 }
  0x52   : > { %v8366_v24 = vpop.eup %8365  ;;  %v368_v25 = vmul.f32 %v8364_v23, %v366_v18  ;;  %v372_v28 = vmul.f32 %v8364_v23, %v370_v19  ;;  %v9177_v19 = vld [vmem:[%s11954_s5] sm:$0xff] }
  0x53   : > { %v369_v29 = vmul.f32 %v8366_v24, %v367_v20  ;;  %v373_v30 = vmul.f32 %v8366_v24, %v371_v21  ;;  %12155 = vst [vmem:[#allocation17_spill] sm:$0xff] %v9177_v19 }
  0x54   : > { %v374_v31 = vmin.f32 %v368_v25, %v372_v28  ;;  %v376_v32 = vmax.f32 %v368_v25, %v372_v28  ;;  %7577 = vmatmul.mubr.msk.bf16.gmra.mxu0 %vm572_vm7, %v8344_v22 }
  0x55   : > { %v375_v33 = vmin.f32 %v369_v29, %v373_v30  ;;  %v377_v34 = vmax.f32 %v369_v29, %v373_v30  ;;  %686 = vmatprep.mubr.bf16.mxu0 %v8826_v0 }
  0x56   : > { %v7549_v35 = vrot.slane %v374_v31, 9  ;;  %v7551_v36 = vrot.slane %v374_v31, 10  ;;  %v7553_v37 = vrot.slane %v376_v32, 9  ;;  %v7555_v38 = vrot.slane %v376_v32, 10 }
  0x57   : > { %v7550_v39 = vrot.slane %v375_v33, 9  ;;  %v7552_v40 = vrot.slane %v375_v33, 10  ;;  %v7554_v41 = vrot.slane %v377_v34, 9  ;;  %v7556_v42 = vrot.slane %v377_v34, 10  ;;  %7594 = vmatmul.mubr.msk.bf16.gmra.mxu1 %vm572_vm7, %v8344_v22 }
  0x58   : > { %v386_v43 = vmax.f32 %v374_v31, %v7549_v35  ;;  %v406_v44 = vmin.f32 %v376_v32, %v7553_v37  ;;  %879 = vmatprep.mubr.bf16.mxu1 %v8826_v0 }
  0x59   : > { %v387_v46 = vmax.f32 %v375_v33, %v7550_v39  ;;  %v407_v47 = vmin.f32 %v377_v34, %v7554_v41 }
  0x5a   : > { %v394_v48 = vmax.f32 %v386_v43, %v7551_v36  ;;  %v414_v49 = vmin.f32 %v406_v44, %v7555_v38 }
  0x5b   : > { %v395_v50 = vmax.f32 %v387_v46, %v7552_v40  ;;  %v415_v51 = vmin.f32 %v407_v47, %v7556_v42 }
  0x5c   : > { %v9040_v52 = vmax.f32 %v394_v48, 0.05  ;;  %7578 = vmatmul.mubr.msk.bf16.gmra.mxu0 %vm572_vm7, %v8345_v45 }
  0x5d   : > { %v9043_v53 = vmax.f32 %v395_v50, 0.05  ;;  %696 = vmatprep.mubr.bf16.mxu0 %v8826_v0 }
  0x5e   : > { %12146 = vst [vmem:[#allocation8_spill] sm:$0xff] %v9040_v52  ;;  %vm416_vm8 = vcmp.lt.f32.partialorder %v9040_v52, %v414_v49  ;;  %v9048_v54 = vsub.f32 %v414_v49, %v9040_v52 }
  0x5f   : > { %12147 = vst [vmem:[#allocation9_spill] sm:$0xff] %v9043_v53  ;;  %v9050_v56 = vsel %vm416_vm8, 1.0, %v8828_v55  ;;  %vm417_vm9 = vcmp.lt.f32.partialorder %v9043_v53, %v415_v51  ;;  %v9054_v57 = vsub.f32 %v415_v51, %v9043_v53  ;;  %7595 = vmatmul.mubr.msk.bf16.gmra.mxu1 %vm572_vm7, %v8345_v45 }
  0x60   : > { %12148 = vst [vmem:[#allocation10_spill] sm:$0xff] %v9048_v54  ;;  %12149 = vst [vmem:[#allocation11_spill] sm:$0xff] %v9050_v56  ;;  %v424_v58 = vmul.f32 0.03125, %v9048_v54  ;;  %v9058_v59 = vsel %vm417_vm9, 1.0, %v8828_v55  ;;  %889 = vmatprep.mubr.bf16.mxu1 %v8826_v0 }
  0x61   : > { %12150 = vst [vmem:[#allocation12_spill] sm:$0xff] %v9054_v57  ;;  %12151 = vst [vmem:[#allocation13_spill] sm:$0xff] %v9058_v59  ;;  %v425_v61 = vmul.f32 0.03125, %v9054_v57 }
  0x62   : > { %v9066_v62 = vmul.f32 %v9050_v56, %v424_v58  ;;  %v9263_v56 = vrot.slane %v9040_v52, %v8959_v26 }
  0x63   : > { %v9069_v63 = vmul.f32 %v9058_v59, %v425_v61 }
  0x64   : > { %12152 = vst [vmem:[#allocation14_spill] sm:$0xff] %v9066_v62  ;;  %7579 = vmatmul.mubr.msk.bf16.gmra.mxu0 %vm572_vm7, %v8346_v60  ;;  %12164 = vst [vmem:[#allocation26_spill] sm:$0xff] %v9263_v56  ;;  %v9269_v62 = vrot.slane %v9043_v53, %v8959_v26 }
  0x65   : > { %12153 = vst [vmem:[#allocation15_spill] sm:$0xff] %v9069_v63  ;;  %706 = vmatprep.mubr.bf16.mxu0 %v8826_v0  ;;  %v1383_v63 = vrot.slane %v9048_v54, %v8959_v26 }
  0x66   : > { %12165 = vst [vmem:[#allocation27_spill] sm:$0xff] %v9269_v62 }
  0x67   : > { %7596 = vmatmul.mubr.msk.bf16.gmra.mxu1 %vm572_vm7, %v8346_v60 }
  0x68   : > { %899 = vmatprep.mubr.bf16.mxu1 %v8826_v0 }
  0x6c   : > { %7580 = vmatmul.mubr.msk.bf16.gmra.mxu0 %vm572_vm7, %v8347_v1 }
  0x6d   : > { %716 = vmatprep.mubr.bf16.mxu0 %v8826_v0 }
  0x6f   : > { %7597 = vmatmul.mubr.msk.bf16.gmra.mxu1 %vm572_vm7, %v8347_v1 }
  0x70   : > { %909 = vmatprep.mubr.bf16.mxu1 %v8826_v0 }
  0x74   : > { %7581 = vmatmul.mubr.msk.bf16.gmra.mxu0 %vm572_vm7, %v8348_v2 }
  0x75   : > { %726 = vmatprep.mubr.bf16.mxu0 %v8826_v0 }
  0x77   : > { %7598 = vmatmul.mubr.msk.bf16.gmra.mxu1 %vm572_vm7, %v8348_v2 }
  0x78   : > { %919 = vmatprep.mubr.bf16.mxu1 %v8826_v0 }
  0x7c   : > { %7582 = vmatmul.mubr.msk.bf16.gmra.mxu0 %vm572_vm7, %v8349_v3 }
  0x7d   : > { %736 = vmatprep.mubr.bf16.mxu0 %v8826_v0 }
  0x7f   : > { %7599 = vmatmul.mubr.msk.bf16.gmra.mxu1 %vm572_vm7, %v8349_v3 }
  0x80   : > { %929 = vmatprep.mubr.bf16.mxu1 %v8826_v0 }
  0x84   : > { %7583 = vmatmul.mubr.msk.bf16.gmra.mxu0 %vm572_vm7, %v8350_v4 }
  0x85   : > { %746 = vmatprep.mubr.bf16.mxu0 %v8826_v0 }
  0x87   : > { %7600 = vmatmul.mubr.msk.bf16.gmra.mxu1 %vm572_vm7, %v8350_v4 }
  0x88   : > { %939 = vmatprep.mubr.bf16.mxu1 %v8826_v0 }
  0x8c   : > { %7584 = vmatmul.mubr.msk.bf16.gmra.mxu0 %vm572_vm7, %v8351_v5 }
  0x8d   : > { %756 = vmatprep.mubr.bf16.mxu0 %v8826_v0 }
  0x8f   : > { %7601 = vmatmul.mubr.msk.bf16.gmra.mxu1 %vm572_vm7, %v8351_v5 }
  0x90   : > { %949 = vmatprep.mubr.bf16.mxu1 %v8826_v0 }
  0x94   : > { %7585 = vmatmul.mubr.msk.bf16.gmra.mxu0 %vm572_vm7, %v8352_v6  ;;  %v1039_v49 = vpop.permute.xlu0 %1038  ;;  %v1049_v58 = vpop.permute.xlu1 %1048 }
  0x95   : > { %766 = vmatprep.mubr.bf16.mxu0 %v8826_v0 }
  0x97   : > { %7602 = vmatmul.mubr.msk.bf16.gmra.mxu1 %vm572_vm7, %v8352_v6 }
  0x98   : > { %959 = vmatprep.mubr.bf16.mxu1 %v8826_v0  ;;  %v1044_v2 = vpop.permute.xlu0 %1043  ;;  %v1054_v6 = vpop.permute.xlu1 %1053 }
  0x9c   : > { %7586 = vmatmul.mubr.msk.bf16.gmra.mxu0 %vm572_vm7, %v8353_v7 }
  0x9d   : > { %776 = vmatprep.mubr.bf16.mxu0 %v8826_v0 }
  0x9f   : > { %7603 = vmatmul.mubr.msk.bf16.gmra.mxu1 %vm572_vm7, %v8353_v7 }
  0xa0   : > { %969 = vmatprep.mubr.bf16.mxu1 %v8826_v0 }
  0xa4   : > { %7587 = vmatmul.mubr.msk.bf16.gmra.mxu0 %vm572_vm7, %v8354_v8 }
  0xa5   : > { %786 = vmatprep.mubr.bf16.mxu0 %v8826_v0 }
  0xa7   : > { %7604 = vmatmul.mubr.msk.bf16.gmra.mxu1 %vm572_vm7, %v8354_v8  ;;  %v1059_v8 = vpop.permute.xlu0 %1058 }
  0xa8   : > { %979 = vmatprep.mubr.bf16.mxu1 %v8826_v0 }
  0xab   : > { %v1069_v19 = vpop.permute.xlu0 %1068 }
  0xac   : > { %7588 = vmatmul.mubr.msk.bf16.gmra.mxu0 %vm572_vm7, %v8355_v9 }
  0xad   : > { %796 = vmatprep.mubr.bf16.mxu0 %v8826_v0 }
  0xaf   : > { %7605 = vmatmul.mubr.msk.bf16.gmra.mxu1 %vm572_vm7, %v8355_v9 }
  0xb0   : > { %989 = vmatprep.mubr.bf16.mxu1 %v8826_v0 }
  0xb4   : > { %7589 = vmatmul.mubr.msk.bf16.gmra.mxu0 %vm572_vm7, %v8356_v10 }
  0xb5   : > { %806 = vmatprep.mubr.bf16.mxu0 %v8826_v0 }
  0xb7   : > { %7606 = vmatmul.mubr.msk.bf16.gmra.mxu1 %vm572_vm7, %v8356_v10 }
  0xb8   : > { %999 = vmatprep.mubr.bf16.mxu1 %v8826_v0 }
  0xbc   : > { %7590 = vmatmul.mubr.msk.bf16.gmra.mxu0 %vm572_vm7, %v8357_v11 }
  0xbd   : > { %816 = vmatprep.mubr.bf16.mxu0 %v8826_v0 }
  0xbf   : > { %7607 = vmatmul.mubr.msk.bf16.gmra.mxu1 %vm572_vm7, %v8357_v11 }
  0xc0   : > { %1009 = vmatprep.mubr.bf16.mxu1 %v8826_v0  ;;  %v9172_v0 = vld [vmem:[%s11953_s4] sm:$0xf] }
  0xc1   : > { %12154 = vst [vmem:[#allocation16_spill] sm:$0xff] %v9172_v0  ;;  %v1391_v0 = vrot.slane %v9054_v57, %v8959_v26 }
  0xc4   : > { %7591 = vmatmul.mubr.msk.bf16.gmra.mxu0 %vm572_vm7, %v8358_v12 }
  0xc7   : > { %7608 = vmatmul.mubr.msk.bf16.gmra.mxu1 %vm572_vm7, %v8358_v12  ;;  %v1064_v12 = vpop.permute.xlu1 %1063 }
 0x10c   : > { %v9157_v13 = vpop.f32.mrf.mxu0 }
 0x10e   : > { %v9159_v14 = vpop.f32.mrf.mxu0 }
 0x10f   : > { %v9161_v15 = vpop.f32.mrf.mxu1 }
 0x110   : > { %v9163_v16 = vpop.f32.mrf.mxu0 }
 0x111   : > { %v9165_v17 = vpop.f32.mrf.mxu1 }
 0x112   : > { %v9167_v18 = vpop.f32.mrf.mxu0 }
 0x113   : > { %v9179_v20 = vpop.f32.mrf.mxu1 }
 0x114   : > { %v9181_v21 = vpop.f32.mrf.mxu0 }
 0x115   : > { %v9183_v22 = vpop.f32.mrf.mxu1 }
 0x116   : > { %v9185_v23 = vpop.f32.mrf.mxu0 }
 0x117   : > { %v9187_v24 = vpop.f32.mrf.mxu1 }
 0x118   : > { %v9189_v25 = vpop.f32.mrf.mxu0 }
 0x119   : > { %v9191_v28 = vpop.f32.mrf.mxu1 }
 0x11a   : > { %v9193_v29 = vpop.f32.mrf.mxu0 }
 0x11b   : > { %v9195_v30 = vpop.f32.mrf.mxu1 }
 0x11c   : > { %v9197_v31 = vpop.f32.mrf.mxu0 }
 0x11d   : > { %v9199_v32 = vpop.f32.mrf.mxu1 }
 0x11e   : > { %v9201_v33 = vpop.f32.mrf.mxu0 }
 0x11f   : > { %v9203_v34 = vpop.f32.mrf.mxu1 }
 0x120   : > { %v9205_v35 = vpop.f32.mrf.mxu0 }
 0x121   : > { %v9207_v36 = vpop.f32.mrf.mxu1 }
 0x122   : > { %v9209_v37 = vpop.f32.mrf.mxu0 }
 0x123   : > { %v9211_v38 = vpop.f32.mrf.mxu1 }
 0x124   : > { %v9213_v39 = vpop.f32.mrf.mxu0 }
 0x125   : > { %v9215_v40 = vpop.f32.mrf.mxu1 }
 0x126   : > { %v9217_v41 = vpop.f32.mrf.mxu0 }
 0x127   : > { %v9219_v42 = vpop.f32.mrf.mxu1 }
 0x128   : > { %v9221_v43 = vpop.f32.mrf.mxu0 }
 0x129   : > { %v9223_v44 = vpop.f32.mrf.mxu1 }
 0x12a   : > { %v9225_v45 = vpop.f32.mrf.mxu0 }
 0x12b   : > { %v9227_v46 = vpop.f32.mrf.mxu1 }
 0x12c   : > { %v9229_v47 = vpop.f32.mrf.mxu0 }
 0x12d   : > { %v9231_v48 = vpop.f32.mrf.mxu1 }
 0x12e   : > { %v9233_v50 = vpop.f32.mrf.mxu0 }
 0x12f   : > { %v9235_v51 = vpop.f32.mrf.mxu1 }
 0x130   : > { %v9237_v55 = vpop.f32.mrf.mxu0 }
 0x131   : > { %v9239_v60 = vpop.f32.mrf.mxu1 }
 0x132   : > { %v9241_v61 = vpop.f32.mrf.mxu0 }
 0x133   : > { %v9243_v1 = vpop.f32.mrf.mxu1 }
 0x134   : > { %v9245_v3 = vpop.f32.mrf.mxu0 }
 0x135   : > { %12156 = vst [vmem:[#allocation18_spill] sm:$0xff] %v9245_v3  ;;  %v9247_v4 = vpop.f32.mrf.mxu1  ;;  %v1074_v3 = vpop.permute.xlu1 %1073 }
 0x136   : > { %12157 = vst [vmem:[#allocation19_spill] sm:$0xff] %v9247_v4  ;;  %v9249_v5 = vpop.f32.mrf.mxu0 }
 0x137   : > { %12158 = vst [vmem:[#allocation20_spill] sm:$0xff] %v9249_v5  ;;  %v9251_v7 = vpop.f32.mrf.mxu1  ;;  %v1395_v5 = vrot.slane %v9054_v57, %v8961_v27  ;;  %v9305_v57 = vrot.slane %v1391_v0, %v8959_v26  ;;  %v9324_v0 = vadd.f32 %v1039_v49, %v9157_v13  ;;  %v9344_v13 = vadd.f32 %v1044_v2, %v9167_v18 }
 0x138   : > { %12159 = vst [vmem:[#allocation21_spill] sm:$0xff] %v9251_v7  ;;  %v9253_v9 = vpop.f32.mrf.mxu0 }
 0x139   : > { %12160 = vst [vmem:[#allocation22_spill] sm:$0xff] %v9253_v9  ;;  %v9255_v10 = vpop.f32.mrf.mxu1  ;;  %v9283_v9 = vrot.slane %v9043_v53, %v8961_v27  ;;  %v9302_v53 = vrot.slane %v9269_v62, %v8959_v26  ;;  %12172 = vst [vmem:[#allocation34_spill] sm:$0xff] %v9305_v57  ;;  %v9321_v62 = vrot.slane %v1395_v5, %v8959_v26 }
 0x13a   : > { %12161 = vst [vmem:[#allocation23_spill] sm:$0xff] %v9255_v10  ;;  %v9257_v11 = vpop.f32.mrf.mxu0  ;;  %v9327_v57 = vadd.f32 %v1039_v49, %v9161_v15  ;;  %v9341_v5 = vadd.f32 %v1044_v2, %v9179_v20  ;;  %v9347_v15 = vadd.f32 %v1049_v58, %v9181_v21  ;;  %v9361_v20 = vadd.f32 %v1054_v6, %v9189_v25 }
 0x13b   : > { %12162 = vst [vmem:[#allocation24_spill] sm:$0xff] %v9257_v11  ;;  %v9259_v59 = vpop.f32.mrf.mxu1  ;;  %v9277_v11 = vrot.slane %v9040_v52, %v8961_v27  ;;  %12168 = vst [vmem:[#allocation30_spill] sm:$0xff] %v9283_v9  ;;  %v9295_v52 = vrot.slane %v9263_v56, %v8959_v26  ;;  %v9367_v21 = vadd.f32 %v1054_v6, %v9195_v30 }
 0x13c   : > { %12163 = vst [vmem:[#allocation25_spill] sm:$0xff] %v9259_v59  ;;  %v9273_v10 = vpop.f32.mrf.mxu0  ;;  %v1387_v59 = vrot.slane %v9048_v54, %v8961_v27  ;;  %v9298_v54 = vrot.slane %v1383_v63, %v8959_v26  ;;  %12171 = vst [vmem:[#allocation33_spill] sm:$0xff] %v9302_v53  ;;  %v1079_v27 = vpop.permute.xlu0 %1078  ;;  %v9318_v63 = vrot.slane %v9283_v9, %v8959_v26 }
 0x13d   : > { %12166 = vst [vmem:[#allocation28_spill] sm:$0xff] %v9273_v10  ;;  %12167 = vst [vmem:[#allocation29_spill] sm:$0xff] %v9277_v11  ;;  %v9287_v7 = vpop.f32.mrf.mxu1  ;;  %v9330_v53 = vadd.f32 %v1039_v49, %v9159_v14  ;;  %v9338_v9 = vadd.f32 %v1039_v49, %v9165_v17  ;;  %v9352_v14 = vadd.f32 %v1044_v2, %v9183_v22  ;;  %v1084_v49 = vpop.permute.xlu1 %1083 }
 0x13e   : > { %12169 = vst [vmem:[#allocation31_spill] sm:$0xff] %v9287_v7  ;;  %v9289_v4 = vpop.f32.mrf.mxu0  ;;  %v9314_v56 = vrot.slane %v1387_v59, %v8959_v26  ;;  %12173 = vst [vmem:[#allocation35_spill] sm:$0xff] %v9341_v5  ;;  %v9358_v17 = vadd.f32 %v1049_v58, %v9185_v23  ;;  %v9364_v5 = vadd.f32 %v1049_v58, %v9191_v28 }
 0x13f   : > { %v9291_v10 = vpop.f32.mrf.mxu1  ;;  %v9370_v22 = vadd.f32 %v1054_v6, %v9193_v29  ;;  %v9379_v25 = vadd.f32 %v1059_v8, %v9203_v34  ;;  %v9382_v28 = vadd.f32 %v1059_v8, %v9201_v33  ;;  %v9385_v30 = vadd.f32 %v1064_v12, %v9205_v35 }
 0x140   : > { %12170 = vst [vmem:[#allocation32_spill] sm:$0xff] %v9291_v10  ;;  %v9307_v7 = vpop.f32.mrf.mxu0  ;;  %v9311_v10 = vrot.slane %v9277_v11, %v8959_v26  ;;  %v9333_v11 = vadd.f32 %v1044_v2, %v9163_v16  ;;  %v9355_v16 = vadd.f32 %v1049_v58, %v9187_v24  ;;  %v9373_v24 = vadd.f32 %v1059_v8, %v9197_v31  ;;  %v1089_v2 = vpop.permute.xlu0 %1088 }
 0x141   : > { %v9335_v59 = vpop.f32.mrf.mxu1  ;;  %v9388_v29 = vadd.f32 %v1059_v8, %v9207_v36  ;;  %v9391_v31 = vadd.f32 %v1064_v12, %v9211_v38  ;;  %v9400_v33 = vadd.f32 %v1064_v12, %v9215_v40  ;;  %v9403_v35 = vadd.f32 %v1069_v19, %v9219_v42  ;;  %v1094_v38 = vpop.permute.xlu1 %1093 }
 0x142   : > { %v9349_v26 = vpop.f32.mrf.mxu0  ;;  %12174 = vst [vmem:[#allocation36_spill] sm:$0xff] %v9355_v16  ;;  %12175 = vst [vmem:[#allocation37_spill] sm:$0xff] %v9373_v24  ;;  %v9376_v16 = vadd.f32 %v1054_v6, %v9199_v32  ;;  %v9394_v24 = vadd.f32 %v1064_v12, %v9209_v37  ;;  %v9397_v32 = vadd.f32 %v1069_v19, %v9213_v39 }
 0x143   : > { %v925_v18 = vpop.f32.mrf.mxu1  ;;  %v9406_v6 = vadd.f32 %v1069_v19, %v9217_v41  ;;  %v9409_v36 = vadd.f32 %v1074_v3, %v9221_v43  ;;  %v9412_v37 = vadd.f32 %v1069_v19, %v9223_v44  ;;  %v9415_v39 = vadd.f32 %v1074_v3, %v9227_v46 }
 0x144   : > { %v738_v23 = vpop.f32.mrf.mxu0  ;;  %v9418_v40 = vadd.f32 %v1074_v3, %v9225_v45  ;;  %v9421_v42 = vadd.f32 %v1079_v27, %v9229_v47  ;;  %v1099_v12 = vpop.permute.xlu0 %1098  ;;  %v9427_v43 = vadd.f32 %v1079_v27, %v9235_v51  ;;  %v9430_v19 = vadd.f32 %v1079_v27, %v9233_v50  ;;  %v12186_v50 = vld [vmem:[#allocation19_spill] sm:$0xff] }
 0x145   : > { %v927_v58 = vpop.f32.mrf.mxu1  ;;  %12176 = vst [vmem:[#allocation38_spill] sm:$0xff] %v9406_v6  ;;  %v9424_v6 = vadd.f32 %v1074_v3, %v9231_v48  ;;  %v9433_v44 = vadd.f32 %v1084_v49, %v9237_v55  ;;  %v9438_v45 = vadd.f32 %v1079_v27, %v9239_v60  ;;  %v9441_v47 = vadd.f32 %v1084_v49, %v9243_v1  ;;  %v12184_v3 = vld [vmem:[#allocation18_spill] sm:$0xff]  ;;  %v12188_v55 = vld [vmem:[#allocation21_spill] sm:$0xff] }
 0x146   : > { %v740_v34 = vpop.f32.mrf.mxu0  ;;  %12178 = vst [vmem:[#allocation40_spill] sm:$0xff] %v9427_v43  ;;  %12179 = vst [vmem:[#allocation41_spill] sm:$0xff] %v9430_v19  ;;  %v9444_v48 = vadd.f32 %v1084_v49, %v9241_v61  ;;  %v9447_v51 = vadd.f32 %v1089_v2, %v12184_v3  ;;  %v9452_v19 = vadd.f32 %v1084_v49, %v12186_v50  ;;  %v12192_v60 = vld [vmem:[#allocation22_spill] sm:$0xff]  ;;  %v12197_v49 = vld [vmem:[#allocation24_spill] sm:$0xff] }
 0x147   : > { %v931_v8 = vpop.f32.mrf.mxu1  ;;  %12177 = vst [vmem:[#allocation39_spill] sm:$0xff] %v9424_v6  ;;  %12180 = vst [vmem:[#allocation42_spill] sm:$0xff] %v9433_v44  ;;  %v9455_v44 = vadd.f32 %v1089_v2, %v12188_v55  ;;  %v12190_v6 = vld [vmem:[#allocation20_spill] sm:$0xff]  ;;  %v9461_v1 = vadd.f32 %v1094_v38, %v12192_v60  ;;  %v9472_v50 = vadd.f32 %v1094_v38, %v12197_v49 }
 0x148   : > { %v742_v41 = vpop.f32.mrf.mxu0  ;;  %12181 = vst [vmem:[#allocation43_spill] sm:$0xff] %v9438_v45  ;;  %12182 = vst [vmem:[#allocation44_spill] sm:$0xff] %v9441_v47  ;;  %v9458_v27 = vadd.f32 %v1089_v2, %v12190_v6  ;;  %v1104_v47 = vpop.permute.xlu1 %1103  ;;  %v12198_v55 = vld [vmem:[#allocation28_spill] sm:$0xff] }
 0x149   : > { %v9435_v46 = vpop.f32.mrf.mxu1  ;;  %12183 = vst [vmem:[#allocation45_spill] sm:$0xff] %v9444_v48  ;;  %12185 = vst [vmem:[#allocation18_spill] sm:$0xff] %v9447_v51  ;;  %v12195_v48 = vld [vmem:[#allocation23_spill] sm:$0xff]  ;;  %v12196_v51 = vld [vmem:[#allocation25_spill] sm:$0xff]  ;;  %v1109_v6 = vpop.permute.xlu0 %1108 }
 0x14a   : > { %v9449_v43 = vpop.f32.mrf.mxu0  ;;  %12187 = vst [vmem:[#allocation19_spill] sm:$0xff] %v9452_v19  ;;  %12189 = vst [vmem:[#allocation21_spill] sm:$0xff] %v9455_v44  ;;  %v9466_v3 = vadd.f32 %v1089_v2, %v12195_v48  ;;  %v9469_v45 = vadd.f32 %v1094_v38, %v12196_v51  ;;  %v9475_v44 = vadd.f32 %v1099_v12, %v12198_v55  ;;  %v12200_v19 = vld [vmem:[#allocation31_spill] sm:$0xff]  ;;  %v12203_v51 = vld [vmem:[#allocation32_spill] sm:$0xff] }
 0x14b   : > { %12191 = vst [vmem:[#allocation20_spill] sm:$0xff] %v9458_v27  ;;  %12193 = vst [vmem:[#allocation22_spill] sm:$0xff] %v9461_v1  ;;  %v9463_v61 = vpop.f32.mrf.mxu1  ;;  %v9478_v60 = vadd.f32 %v1094_v38, %v12200_v19  ;;  %v9481_v1 = vadd.f32 %v1099_v12, %v9289_v4  ;;  %v9488_v49 = vadd.f32 %v1099_v12, %v12203_v51 }
 0x14c   : > { %12194 = vst [vmem:[#allocation46_spill] sm:$0xff] %v9463_v61  ;;  %12199 = vst [vmem:[#allocation23_spill] sm:$0xff] %v9475_v44  ;;  %v748_v27 = vpop.f32.mrf.mxu0  ;;  %v9491_v55 = vadd.f32 %v1099_v12, %v9335_v59  ;;  %v9494_v44 = vadd.f32 %v1104_v47, %v9307_v7  ;;  %v9497_v38 = vadd.f32 %v1104_v47, %v9349_v26  ;;  %v12212_v7 = vld [vmem:[#allocation33_spill] sm:$0xff]  ;;  %v12213_v26 = vld [vmem:[#allocation34_spill] sm:$0xff] }
 0x14d   : > { %12201 = vst [vmem:[#allocation25_spill] sm:$0xff] %v9481_v1  ;;  %v9483_v61 = vpop.f32.mrf.mxu1  ;;  %v1218_v2 = vmul.f32 %v9295_v52, %v748_v27  ;;  %v1416_v48 = vmul.f32 %v9298_v54, %v748_v27  ;;  %12204 = vst [vmem:[#allocation28_spill] sm:$0xff] %v9488_v49  ;;  %v9499_v19 = vadd.f32 %v1104_v47, %v925_v18  ;;  %v9503_v1 = vpop.permute.xlu1 %1113 }
 0x14e   : > { %12202 = vst [vmem:[#allocation24_spill] sm:$0xff] %v9483_v61  ;;  %12205 = vst [vmem:[#allocation31_spill] sm:$0xff] %v9491_v55  ;;  %v750_v4 = vpop.f32.mrf.mxu0  ;;  %v9501_v61 = vadd.f32 %v1109_v6, %v738_v23  ;;  %v9507_v59 = vadd.f32 %v1104_v47, %v927_v58  ;;  %v9509_v12 = vadd.f32 %v1109_v6, %v740_v34 }
 0x14f   : > { %12206 = vst [vmem:[#allocation32_spill] sm:$0xff] %v9494_v44  ;;  %12207 = vst [vmem:[#allocation47_spill] sm:$0xff] %v9497_v38  ;;  %v1282_v27 = vadd.f32 %v1218_v2, %v9324_v0  ;;  %v941_v51 = vpop.f32.mrf.mxu1  ;;  %v1219_v49 = vmul.f32 %v9311_v10, %v750_v4  ;;  %v9513_v18 = vadd.f32 %v1109_v6, %v931_v8 }
 0x150   : > { %12208 = vst [vmem:[#allocation48_spill] sm:$0xff] %v9499_v19  ;;  %12209 = vst [vmem:[#allocation49_spill] sm:$0xff] %v9501_v61  ;;  %v1220_v44 = vmul.f32 %v12212_v7, %v941_v51  ;;  %v1418_v38 = vmul.f32 %v12213_v26, %v941_v51  ;;  %v752_v55 = vpop.f32.mrf.mxu0  ;;  %v9519_v2 = vadd.f32 %v9503_v1, %v742_v41 }
 0x151   : > { %12210 = vst [vmem:[#allocation50_spill] sm:$0xff] %v9507_v59  ;;  %12211 = vst [vmem:[#allocation51_spill] sm:$0xff] %v9509_v12  ;;  %v1283_v23 = vadd.f32 %v1219_v49, %v9330_v53  ;;  %v943_v61 = vpop.f32.mrf.mxu1  ;;  %v1222_v19 = vmul.f32 %v9295_v52, %v752_v55  ;;  %v1420_v0 = vmul.f32 %v9298_v54, %v752_v55 }
 0x152   : > { %12214 = vst [vmem:[#allocation33_spill] sm:$0xff] %v9513_v18  ;;  %12215 = vst [vmem:[#allocation34_spill] sm:$0xff] %v9519_v2  ;;  %v1284_v58 = vadd.f32 %v1220_v44, %v9327_v57  ;;  %v1417_v34 = vmul.f32 %v9314_v56, %v750_v4  ;;  %v1221_v47 = vmul.f32 %v9318_v63, %v943_v61  ;;  %v754_v51 = vpop.f32.mrf.mxu0 }
 0x153   : > { %v1286_v8 = vadd.f32 %v1222_v19, %v9333_v11  ;;  %v9525_v12 = vpack.c.bf16 %v1420_v0, %v1416_v48  ;;  %v945_v53 = vpop.f32.mrf.mxu1  ;;  %v1223_v49 = vmul.f32 %v9311_v10, %v754_v51  ;;  %v1421_v18 = vmul.f32 %v9314_v56, %v754_v51 }
 0x154   : > { %v1285_v55 = vadd.f32 %v1221_v47, %v9338_v9  ;;  %v1419_v41 = vmul.f32 %v9321_v62, %v943_v61  ;;  %v1224_v57 = vmul.f32 %v12212_v7, %v945_v53  ;;  %v1422_v44 = vmul.f32 %v12213_v26, %v945_v53  ;;  %v758_v4 = vpop.f32.mrf.mxu0 }
 0x155   : > { %12216 = vst [vmem:[#allocation52_spill] sm:$0xff] %v9525_v12  ;;  %v9533_v2 = vpack.c.bf16 %v1286_v8, %v1282_v27  ;;  %v1287_v11 = vadd.f32 %v1223_v49, %v9344_v13  ;;  %v9536_v48 = vpack.c.bf16 %v1421_v18, %v1417_v34  ;;  %v947_v19 = vpop.f32.mrf.mxu1  ;;  %v1226_v0 = vmul.f32 %v9295_v52, %v758_v4  ;;  %v12219_v12 = vld [vmem:[#allocation35_spill] sm:$0xff] }
 0x156   : > { %v1288_v51 = vadd.f32 %v1224_v57, %v12219_v12  ;;  %v9540_v59 = vpack.c.bf16 %v1422_v44, %v1418_v38  ;;  %v1225_v9 = vmul.f32 %v9318_v63, %v947_v19  ;;  %v1423_v61 = vmul.f32 %v9321_v62, %v947_v19  ;;  %v760_v47 = vpop.f32.mrf.mxu0 }
 0x157   : > { %12217 = vst [vmem:[#allocation53_spill] sm:$0xff] %v9533_v2  ;;  %12218 = vst [vmem:[#allocation54_spill] sm:$0xff] %v9536_v48  ;;  %v9545_v53 = vadd.f32 %v1109_v6, %v9435_v46  ;;  %v9547_v27 = vpack.c.bf16 %v1287_v11, %v1283_v23  ;;  %v1290_v13 = vadd.f32 %v1226_v0, %v9347_v15  ;;  %v951_v18 = vpop.f32.mrf.mxu1  ;;  %v12259_v48 = vld [vmem:[#allocation44_spill] sm:$0xff] }
 0x158   : > { %12220 = vst [vmem:[#allocation35_spill] sm:$0xff] %v9540_v59  ;;  %v1227_v34 = vmul.f32 %v9311_v10, %v760_v47  ;;  %v9551_v8 = vpack.c.bf16 %v1288_v51, %v1284_v58  ;;  %v1289_v38 = vadd.f32 %v1225_v9, %v9352_v14  ;;  %v9554_v12 = vpack.c.bf16 %v1423_v61, %v1419_v41  ;;  %v762_v57 = vpop.f32.mrf.mxu0  ;;  %v12225_v58 = vld [vmem:[#allocation36_spill] sm:$0xff] }
 0x159   : > { %12221 = vst [vmem:[#allocation55_spill] sm:$0xff] %v9547_v27  ;;  %v1228_v49 = vmul.f32 %v12212_v7, %v951_v18  ;;  %v1424_v44 = vmul.f32 %v9298_v54, %v758_v4  ;;  %v1426_v46 = vmul.f32 %v12213_v26, %v951_v18  ;;  %v953_v23 = vpop.f32.mrf.mxu1  ;;  %v1230_v15 = vmul.f32 %v9295_v52, %v762_v57 }
 0x15a   : > { %12222 = vst [vmem:[#allocation56_spill] sm:$0xff] %v9551_v8  ;;  %12223 = vst [vmem:[#allocation57_spill] sm:$0xff] %v9554_v12  ;;  %v1291_v6 = vadd.f32 %v1227_v34, %v9358_v17  ;;  %v9561_v11 = vpack.c.bf16 %v1289_v38, %v1285_v55  ;;  %v1425_v14 = vmul.f32 %v9314_v56, %v760_v47  ;;  %v764_v0 = vpop.f32.mrf.mxu0 }
 0x15b   : > { %v1292_v19 = vadd.f32 %v1228_v49, %v12225_v58  ;;  %v1229_v41 = vmul.f32 %v9318_v63, %v953_v23  ;;  %v1294_v51 = vadd.f32 %v1230_v15, %v9361_v20  ;;  %v1428_v4 = vmul.f32 %v9298_v54, %v762_v57  ;;  %v955_v9 = vpop.f32.mrf.mxu1 }
 0x15c   : > { %12224 = vst [vmem:[#allocation58_spill] sm:$0xff] %v9561_v11  ;;  %v1231_v61 = vmul.f32 %v9311_v10, %v764_v0  ;;  %v1429_v17 = vmul.f32 %v9314_v56, %v764_v0  ;;  %v1427_v55 = vmul.f32 %v9321_v62, %v953_v23  ;;  %v1232_v34 = vmul.f32 %v12212_v7, %v955_v9  ;;  %v768_v38 = vpop.f32.mrf.mxu0 }
 0x15d   : > { %v1293_v18 = vadd.f32 %v1229_v41, %v9364_v5  ;;  %v1430_v47 = vmul.f32 %v12213_v26, %v955_v9  ;;  %v9574_v49 = vpack.c.bf16 %v1294_v51, %v1290_v13  ;;  %v9576_v58 = vpack.c.bf16 %v1428_v4, %v1424_v44  ;;  %v957_v15 = vpop.f32.mrf.mxu1 }
 0x15e   : > { %v1295_v20 = vadd.f32 %v1231_v61, %v9370_v22  ;;  %v9579_v57 = vpack.c.bf16 %v1429_v17, %v1425_v14  ;;  %v1296_v0 = vadd.f32 %v1232_v34, %v9367_v21  ;;  %v1233_v5 = vmul.f32 %v9318_v63, %v957_v15  ;;  %v770_v41 = vpop.f32.mrf.mxu0  ;;  %v12233_v17 = vld [vmem:[#allocation37_spill] sm:$0xff] }
 0x15f   : > { %12226 = vst [vmem:[#allocation36_spill] sm:$0xff] %v9574_v49  ;;  %12227 = vst [vmem:[#allocation59_spill] sm:$0xff] %v9576_v58  ;;  %v9582_v8 = vpack.c.bf16 %v1430_v47, %v1426_v46  ;;  %v1431_v23 = vmul.f32 %v9321_v62, %v957_v15  ;;  %v9588_v13 = vadd.f32 %v9503_v1, %v9449_v43  ;;  %v961_v14 = vpop.f32.mrf.mxu1 }
 0x160   : > { %12228 = vst [vmem:[#allocation60_spill] sm:$0xff] %v9579_v57  ;;  %v9590_v44 = vpack.c.bf16 %v1295_v20, %v1291_v6  ;;  %v1234_v22 = vmul.f32 %v9295_v52, %v768_v38  ;;  %v1235_v51 = vmul.f32 %v9311_v10, %v770_v41  ;;  %v9594_v4 = vpack.c.bf16 %v1296_v0, %v1292_v19  ;;  %v772_v61 = vpop.f32.mrf.mxu0 }
 0x161   : > { %12229 = vst [vmem:[#allocation61_spill] sm:$0xff] %v9582_v8  ;;  %v1297_v21 = vadd.f32 %v1233_v5, %v9376_v16  ;;  %v9597_v46 = vpack.c.bf16 %v1431_v23, %v1427_v55  ;;  %v1236_v9 = vmul.f32 %v12212_v7, %v961_v14  ;;  %v1432_v43 = vmul.f32 %v9298_v54, %v768_v38  ;;  %v963_v20 = vpop.f32.mrf.mxu1 }
 0x162   : > { %12230 = vst [vmem:[#allocation62_spill] sm:$0xff] %v9590_v44  ;;  %12231 = vst [vmem:[#allocation63_spill] sm:$0xff] %v9594_v4  ;;  %v1298_v34 = vadd.f32 %v1234_v22, %v12233_v17  ;;  %v1434_v6 = vmul.f32 %v12213_v26, %v961_v14  ;;  %v1299_v47 = vadd.f32 %v1235_v51, %v9382_v28  ;;  %v774_v0 = vpop.f32.mrf.mxu0 }
 0x163   : > { %12232 = vst [vmem:[#allocation64_spill] sm:$0xff] %v9597_v46  ;;  %v9604_v15 = vpack.c.bf16 %v1297_v21, %v1293_v18  ;;  %v1300_v19 = vadd.f32 %v1236_v9, %v9379_v25  ;;  %v1433_v16 = vmul.f32 %v9314_v56, %v770_v41  ;;  %v1237_v55 = vmul.f32 %v9318_v63, %v963_v20  ;;  %v965_v22 = vpop.f32.mrf.mxu1 }
 0x164   : > { %v1238_v5 = vmul.f32 %v9295_v52, %v772_v61  ;;  %v1436_v23 = vmul.f32 %v9298_v54, %v772_v61  ;;  %v1239_v38 = vmul.f32 %v9311_v10, %v774_v0  ;;  %v1437_v14 = vmul.f32 %v9314_v56, %v774_v0  ;;  %v778_v51 = vpop.f32.mrf.mxu0 }
 0x165   : > { %12234 = vst [vmem:[#allocation37_spill] sm:$0xff] %v9604_v15  ;;  %v1301_v28 = vadd.f32 %v1237_v55, %v9388_v29  ;;  %v1435_v18 = vmul.f32 %v9321_v62, %v963_v20  ;;  %v1240_v25 = vmul.f32 %v12212_v7, %v965_v22  ;;  %v1438_v41 = vmul.f32 %v12213_v26, %v965_v22  ;;  %v967_v2 = vpop.f32.mrf.mxu1 }
 0x166   : > { %v1302_v21 = vadd.f32 %v1238_v5, %v9385_v30  ;;  %v9618_v9 = vpack.c.bf16 %v1436_v23, %v1432_v43  ;;  %v1303_v61 = vadd.f32 %v1239_v38, %v9394_v24  ;;  %v9621_v17 = vpack.c.bf16 %v1437_v14, %v1433_v16  ;;  %v780_v55 = vpop.f32.mrf.mxu0 }
 0x167   : > { %v1304_v0 = vadd.f32 %v1240_v25, %v9391_v31  ;;  %v9624_v59 = vpack.c.bf16 %v1438_v41, %v1434_v6  ;;  %v1241_v29 = vmul.f32 %v9318_v63, %v967_v2  ;;  %v1439_v20 = vmul.f32 %v9321_v62, %v967_v2  ;;  %v971_v43 = vpop.f32.mrf.mxu1 }
 0x168   : > { %12235 = vst [vmem:[#allocation65_spill] sm:$0xff] %v9618_v9  ;;  %12236 = vst [vmem:[#allocation66_spill] sm:$0xff] %v9621_v17  ;;  %v9628_v22 = vpack.c.bf16 %v1302_v21, %v1298_v34  ;;  %v9630_v11 = vpack.c.bf16 %v1303_v61, %v1299_v47  ;;  %v1242_v30 = vmul.f32 %v9295_v52, %v778_v51  ;;  %v782_v23 = vpop.f32.mrf.mxu0 }
 0x169   : > { %12237 = vst [vmem:[#allocation67_spill] sm:$0xff] %v9624_v59  ;;  %v1440_v24 = vmul.f32 %v9298_v54, %v778_v51  ;;  %v9634_v16 = vpack.c.bf16 %v1304_v0, %v1300_v19  ;;  %v1305_v31 = vadd.f32 %v1241_v29, %v9400_v33  ;;  %v9637_v6 = vpack.c.bf16 %v1439_v20, %v1435_v18  ;;  %v973_v14 = vpop.f32.mrf.mxu1  ;;  %v12243_v51 = vld [vmem:[#allocation38_spill] sm:$0xff] }
 0x16a   : > { %12238 = vst [vmem:[#allocation68_spill] sm:$0xff] %v9628_v22  ;;  %12239 = vst [vmem:[#allocation69_spill] sm:$0xff] %v9630_v11  ;;  %v1244_v5 = vmul.f32 %v12212_v7, %v971_v43  ;;  %v1306_v2 = vadd.f32 %v1242_v30, %v9397_v32  ;;  %v1442_v34 = vmul.f32 %v12213_v26, %v971_v43  ;;  %v784_v41 = vpop.f32.mrf.mxu0  ;;  %v12287_v11 = vld [vmem:[#allocation48_spill] sm:$0xff] }
 0x16b   : > { %12240 = vst [vmem:[#allocation70_spill] sm:$0xff] %v9634_v16  ;;  %12241 = vst [vmem:[#allocation71_spill] sm:$0xff] %v9637_v6  ;;  %v1243_v47 = vmul.f32 %v9311_v10, %v780_v55  ;;  %v1441_v38 = vmul.f32 %v9314_v56, %v780_v55  ;;  %v9644_v25 = vpack.c.bf16 %v1305_v31, %v1301_v28  ;;  %v975_v0 = vpop.f32.mrf.mxu1 }
 0x16c   : > { %v1308_v19 = vadd.f32 %v1244_v5, %v9403_v35  ;;  %v1245_v33 = vmul.f32 %v9318_v63, %v973_v14  ;;  %v1443_v18 = vmul.f32 %v9321_v62, %v973_v14  ;;  %v1246_v32 = vmul.f32 %v9295_v52, %v782_v23  ;;  %v788_v30 = vpop.f32.mrf.mxu0 }
 0x16d   : > { %12242 = vst [vmem:[#allocation72_spill] sm:$0xff] %v9644_v25  ;;  %v1307_v21 = vadd.f32 %v1243_v47, %v12243_v51  ;;  %v1444_v61 = vmul.f32 %v9298_v54, %v782_v23  ;;  %v1247_v29 = vmul.f32 %v9311_v10, %v784_v41  ;;  %v1248_v28 = vmul.f32 %v12212_v7, %v975_v0  ;;  %v977_v47 = vpop.f32.mrf.mxu1 }
 0x16e   : > { %v1309_v20 = vadd.f32 %v1245_v33, %v9412_v37  ;;  %v1446_v35 = vmul.f32 %v12213_v26, %v975_v0  ;;  %v1445_v55 = vmul.f32 %v9314_v56, %v784_v41  ;;  %v1310_v43 = vadd.f32 %v1246_v32, %v9409_v36  ;;  %v790_v0 = vpop.f32.mrf.mxu0 }
 0x16f   : > { %v9658_v31 = vpack.c.bf16 %v1444_v61, %v1440_v24  ;;  %v1311_v5 = vadd.f32 %v1247_v29, %v9418_v40  ;;  %v1250_v23 = vmul.f32 %v9295_v52, %v788_v30  ;;  %v1312_v14 = vadd.f32 %v1248_v28, %v9415_v39  ;;  %v981_v24 = vpop.f32.mrf.mxu1  ;;  %v12250_v61 = vld [vmem:[#allocation39_spill] sm:$0xff] }
 0x170   : > { %v9663_v51 = vpack.c.bf16 %v1446_v35, %v1442_v34  ;;  %v9665_v37 = vpack.c.bf16 %v1445_v55, %v1441_v38  ;;  %v1249_v33 = vmul.f32 %v9318_v63, %v977_v47  ;;  %v9668_v41 = vpack.c.bf16 %v1310_v43, %v1306_v2  ;;  %v792_v29 = vpop.f32.mrf.mxu0 }
 0x171   : > { %12244 = vst [vmem:[#allocation38_spill] sm:$0xff] %v9658_v31  ;;  %v9670_v27 = vpack.c.bf16 %v1311_v5, %v1307_v21  ;;  %v1447_v36 = vmul.f32 %v9321_v62, %v977_v47  ;;  %v1314_v40 = vadd.f32 %v1250_v23, %v9421_v42  ;;  %v9674_v32 = vpack.c.bf16 %v1312_v14, %v1308_v19  ;;  %v983_v55 = vpop.f32.mrf.mxu1  ;;  %v12253_v19 = vld [vmem:[#allocation40_spill] sm:$0xff]  ;;  %v12254_v23 = vld [vmem:[#allocation41_spill] sm:$0xff] }
 0x172   : > { %12245 = vst [vmem:[#allocation73_spill] sm:$0xff] %v9663_v51  ;;  %12246 = vst [vmem:[#allocation74_spill] sm:$0xff] %v9665_v37  ;;  %v1313_v39 = vadd.f32 %v1249_v33, %v12250_v61  ;;  %v1448_v34 = vmul.f32 %v9298_v54, %v788_v30  ;;  %v1252_v38 = vmul.f32 %v12212_v7, %v981_v24  ;;  %v794_v47 = vpop.f32.mrf.mxu0 }
 0x173   : > { %12247 = vst [vmem:[#allocation75_spill] sm:$0xff] %v9668_v41  ;;  %12248 = vst [vmem:[#allocation76_spill] sm:$0xff] %v9670_v27  ;;  %v9679_v28 = vpack.c.bf16 %v1447_v36, %v1443_v18  ;;  %v1450_v2 = vmul.f32 %v12213_v26, %v981_v24  ;;  %v1251_v21 = vmul.f32 %v9311_v10, %v790_v0  ;;  %v985_v36 = vpop.f32.mrf.mxu1  ;;  %v12300_v27 = vld [vmem:[#allocation34_spill] sm:$0xff] }
 0x174   : > { %12249 = vst [vmem:[#allocation77_spill] sm:$0xff] %v9674_v32  ;;  %v1449_v35 = vmul.f32 %v9314_v56, %v790_v0  ;;  %v9684_v42 = vpack.c.bf16 %v1313_v39, %v1309_v20  ;;  %v1316_v43 = vadd.f32 %v1252_v38, %v12253_v19  ;;  %v1253_v5 = vmul.f32 %v9318_v63, %v983_v55  ;;  %v12255_v0 = vld [vmem:[#allocation43_spill] sm:$0xff]  ;;  %v798_v19 = vpop.f32.mrf.mxu0 }
 0x175   : > { %12251 = vst [vmem:[#allocation39_spill] sm:$0xff] %v9679_v28  ;;  %v1451_v30 = vmul.f32 %v9321_v62, %v983_v55  ;;  %v1315_v14 = vadd.f32 %v1251_v21, %v12254_v23  ;;  %v1254_v18 = vmul.f32 %v9295_v52, %v792_v29  ;;  %v1452_v33 = vmul.f32 %v9298_v54, %v792_v29  ;;  %v12256_v55 = vld [vmem:[#allocation42_spill] sm:$0xff]  ;;  %v12258_v21 = vld [vmem:[#allocation45_spill] sm:$0xff]  ;;  %v987_v49 = vpop.f32.mrf.mxu1 }
 0x176   : > { %12252 = vst [vmem:[#allocation78_spill] sm:$0xff] %v9684_v42  ;;  %v1255_v24 = vmul.f32 %v9311_v10, %v794_v47  ;;  %v1317_v61 = vadd.f32 %v1253_v5, %v12255_v0  ;;  %v1256_v20 = vmul.f32 %v12212_v7, %v985_v36  ;;  %v1454_v39 = vmul.f32 %v12213_v26, %v985_v36  ;;  %v800_v0 = vpop.f32.mrf.mxu0 }
 0x177   : > { %v1453_v38 = vmul.f32 %v9314_v56, %v794_v47  ;;  %v1318_v4 = vadd.f32 %v1254_v18, %v12256_v55  ;;  %v9698_v12 = vpack.c.bf16 %v1452_v33, %v1448_v34  ;;  %v1258_v29 = vmul.f32 %v9295_v52, %v798_v19  ;;  %v12264_v18 = vld [vmem:[#allocation18_spill] sm:$0xff] }
 0x178   : > { %v1319_v23 = vadd.f32 %v1255_v24, %v12258_v21  ;;  %v1320_v15 = vadd.f32 %v1256_v20, %v12259_v48  ;;  %v9703_v8 = vpack.c.bf16 %v1454_v39, %v1450_v2  ;;  %v1257_v36 = vmul.f32 %v9318_v63, %v987_v49  ;;  %v991_v24 = vpop.f32.mrf.mxu1  ;;  %v12266_v21 = vld [vmem:[#allocation19_spill] sm:$0xff]  ;;  %v802_v20 = vpop.f32.mrf.mxu0 }
 0x179   : > { %12257 = vst [vmem:[#allocation40_spill] sm:$0xff] %v9698_v12  ;;  %v9705_v5 = vpack.c.bf16 %v1453_v38, %v1449_v35  ;;  %v9708_v47 = vpack.c.bf16 %v1318_v4, %v1314_v40  ;;  %v1455_v34 = vmul.f32 %v9321_v62, %v987_v49  ;;  %v1322_v33 = vadd.f32 %v1258_v29, %v12264_v18 }
 0x17a   : > { %12260 = vst [vmem:[#allocation41_spill] sm:$0xff] %v9703_v8  ;;  %v9710_v44 = vpack.c.bf16 %v1319_v23, %v1315_v14  ;;  %v9714_v55 = vpack.c.bf16 %v1320_v15, %v1316_v43  ;;  %v1321_v48 = vadd.f32 %v1257_v36, %v12266_v21  ;;  %v1456_v2 = vmul.f32 %v9298_v54, %v798_v19  ;;  %v993_v14 = vpop.f32.mrf.mxu1  ;;  %v12269_v15 = vld [vmem:[#allocation21_spill] sm:$0xff]  ;;  %v804_v29 = vpop.f32.mrf.mxu0  ;;  %v12270_v36 = vld [vmem:[#allocation20_spill] sm:$0xff] }
 0x17b   : > { %12261 = vst [vmem:[#allocation43_spill] sm:$0xff] %v9705_v5  ;;  %12262 = vst [vmem:[#allocation42_spill] sm:$0xff] %v9708_v47  ;;  %v1260_v35 = vmul.f32 %v12212_v7, %v991_v24  ;;  %v9719_v39 = vpack.c.bf16 %v1455_v34, %v1451_v30  ;;  %v1458_v4 = vmul.f32 %v12213_v26, %v991_v24 }
 0x17c   : > { %12263 = vst [vmem:[#allocation45_spill] sm:$0xff] %v9710_v44  ;;  %12265 = vst [vmem:[#allocation44_spill] sm:$0xff] %v9714_v55  ;;  %v1259_v40 = vmul.f32 %v9311_v10, %v800_v0  ;;  %v1457_v49 = vmul.f32 %v9314_v56, %v800_v0  ;;  %v9724_v38 = vpack.c.bf16 %v1321_v48, %v1317_v61  ;;  %v995_v24 = vpop.f32.mrf.mxu1 }
 0x17d   : > { %12267 = vst [vmem:[#allocation18_spill] sm:$0xff] %v9719_v39  ;;  %v1324_v43 = vadd.f32 %v1260_v35, %v12269_v15  ;;  %v1261_v23 = vmul.f32 %v9318_v63, %v993_v14  ;;  %v1459_v19 = vmul.f32 %v9321_v62, %v993_v14  ;;  %v1262_v30 = vmul.f32 %v9295_v52, %v802_v20  ;;  %v808_v15 = vpop.f32.mrf.mxu0  ;;  %v12271_v14 = vld [vmem:[#allocation22_spill] sm:$0xff] }
 0x17e   : > { %12268 = vst [vmem:[#allocation19_spill] sm:$0xff] %v9724_v38  ;;  %v1323_v18 = vadd.f32 %v1259_v40, %v12270_v36  ;;  %v1460_v34 = vmul.f32 %v9298_v54, %v802_v20  ;;  %v1263_v21 = vmul.f32 %v9311_v10, %v804_v29  ;;  %v1264_v61 = vmul.f32 %v12212_v7, %v995_v24  ;;  %v997_v36 = vpop.f32.mrf.mxu1 }
 0x17f   : > { %v1325_v0 = vadd.f32 %v1261_v23, %v9466_v3  ;;  %v1462_v48 = vmul.f32 %v12213_v26, %v995_v24  ;;  %v1461_v35 = vmul.f32 %v9314_v56, %v804_v29  ;;  %v1326_v16 = vadd.f32 %v1262_v30, %v12271_v14  ;;  %v810_v24 = vpop.f32.mrf.mxu0  ;;  %v12277_v30 = vld [vmem:[#allocation23_spill] sm:$0xff] }
 0x180   : > { %v9738_v58 = vpack.c.bf16 %v1460_v34, %v1456_v2  ;;  %v1327_v40 = vadd.f32 %v1263_v21, %v9472_v50  ;;  %v1266_v20 = vmul.f32 %v9295_v52, %v808_v15  ;;  %v1328_v46 = vadd.f32 %v1264_v61, %v9469_v45  ;;  %v1001_v34 = vpop.f32.mrf.mxu1 }
 0x181   : > { %v9743_v22 = vpack.c.bf16 %v1462_v48, %v1458_v4  ;;  %v9745_v3 = vpack.c.bf16 %v1461_v35, %v1457_v49  ;;  %v1265_v23 = vmul.f32 %v9318_v63, %v997_v36  ;;  %v9748_v29 = vpack.c.bf16 %v1326_v16, %v1322_v33  ;;  %v812_v61 = vpop.f32.mrf.mxu0 }
 0x182   : > { %12272 = vst [vmem:[#allocation21_spill] sm:$0xff] %v9738_v58  ;;  %v9750_v57 = vpack.c.bf16 %v1327_v40, %v1323_v18  ;;  %v1463_v2 = vmul.f32 %v9321_v62, %v997_v36  ;;  %v1330_v50 = vadd.f32 %v1266_v20, %v12277_v30  ;;  %v9754_v21 = vpack.c.bf16 %v1328_v46, %v1324_v43  ;;  %v1003_v35 = vpop.f32.mrf.mxu1  ;;  %v12281_v46 = vld [vmem:[#allocation28_spill] sm:$0xff]  ;;  %v12282_v36 = vld [vmem:[#allocation25_spill] sm:$0xff] }
 0x183   : > { %12273 = vst [vmem:[#allocation20_spill] sm:$0xff] %v9743_v22  ;;  %12274 = vst [vmem:[#allocation22_spill] sm:$0xff] %v9745_v3  ;;  %v1329_v45 = vadd.f32 %v1265_v23, %v9478_v60  ;;  %v1464_v4 = vmul.f32 %v9298_v54, %v808_v15  ;;  %v1268_v49 = vmul.f32 %v12212_v7, %v1001_v34  ;;  %v814_v40 = vpop.f32.mrf.mxu0 }
 0x184   : > { %12275 = vst [vmem:[#allocation79_spill] sm:$0xff] %v9748_v29  ;;  %12276 = vst [vmem:[#allocation80_spill] sm:$0xff] %v9750_v57  ;;  %v9759_v48 = vpack.c.bf16 %v1463_v2, %v1459_v19  ;;  %v1466_v16 = vmul.f32 %v12213_v26, %v1001_v34  ;;  %v1267_v33 = vmul.f32 %v9311_v10, %v810_v24  ;;  %v1005_v2 = vpop.f32.mrf.mxu1 }
 0x185   : > { %12278 = vst [vmem:[#allocation23_spill] sm:$0xff] %v9754_v21  ;;  %v1465_v18 = vmul.f32 %v9314_v56, %v810_v24  ;;  %v9764_v14 = vpack.c.bf16 %v1329_v45, %v1325_v0  ;;  %v1332_v43 = vadd.f32 %v1268_v49, %v12281_v46  ;;  %v1269_v60 = vmul.f32 %v9318_v63, %v1003_v35  ;;  %v12283_v24 = vld [vmem:[#allocation31_spill] sm:$0xff]  ;;  %v818_v46 = vpop.f32.mrf.mxu0 }
 0x186   : > { %12279 = vst [vmem:[#allocation81_spill] sm:$0xff] %v9759_v48  ;;  %v1467_v15 = vmul.f32 %v9321_v62, %v1003_v35  ;;  %v1331_v20 = vadd.f32 %v1267_v33, %v12282_v36  ;;  %v1270_v19 = vmul.f32 %v9295_v52, %v812_v61  ;;  %v1468_v23 = vmul.f32 %v9298_v54, %v812_v61  ;;  %v12284_v35 = vld [vmem:[#allocation32_spill] sm:$0xff]  ;;  %v12286_v33 = vld [vmem:[#allocation47_spill] sm:$0xff]  ;;  %v1007_v25 = vpop.f32.mrf.mxu1 }
 0x187   : > { %12280 = vst [vmem:[#allocation82_spill] sm:$0xff] %v9764_v14  ;;  %v1271_v30 = vmul.f32 %v9311_v10, %v814_v40  ;;  %v1333_v34 = vadd.f32 %v1269_v60, %v12283_v24  ;;  %v1272_v0 = vmul.f32 %v12212_v7, %v1005_v2  ;;  %v1470_v45 = vmul.f32 %v12213_v26, %v1005_v2  ;;  %v820_v24 = vpop.f32.mrf.mxu0 }
 0x188   : > { %v1469_v49 = vmul.f32 %v9314_v56, %v814_v40  ;;  %v1334_v59 = vadd.f32 %v1270_v19, %v12284_v35  ;;  %v9778_v9 = vpack.c.bf16 %v1468_v23, %v1464_v4  ;;  %v1274_v61 = vmul.f32 %v9295_v52, %v818_v46  ;;  %v12291_v19 = vld [vmem:[#allocation49_spill] sm:$0xff]  ;;  %v12292_v35 = vld [vmem:[#allocation46_spill] sm:$0xff] }
 0x189   : > { %v1335_v36 = vadd.f32 %v1271_v30, %v12286_v33  ;;  %v1336_v32 = vadd.f32 %v1272_v0, %v12287_v11  ;;  %v9783_v41 = vpack.c.bf16 %v1470_v45, %v1466_v16  ;;  %v1273_v2 = vmul.f32 %v9318_v63, %v1007_v25  ;;  %v1011_v30 = vpop.f32.mrf.mxu1  ;;  %v12294_v16 = vld [vmem:[#allocation50_spill] sm:$0xff]  ;;  %v822_v45 = vpop.f32.mrf.mxu0 }
 0x18a   : > { %12285 = vst [vmem:[#allocation28_spill] sm:$0xff] %v9778_v9  ;;  %v9785_v60 = vpack.c.bf16 %v1469_v49, %v1465_v18  ;;  %v9788_v40 = vpack.c.bf16 %v1334_v59, %v1330_v50  ;;  %v1471_v4 = vmul.f32 %v9321_v62, %v1007_v25  ;;  %v1338_v23 = vadd.f32 %v1274_v61, %v12291_v19  ;;  %v12297_v61 = vld [vmem:[#allocation33_spill] sm:$0xff] }
 0x18b   : > { %12288 = vst [vmem:[#allocation25_spill] sm:$0xff] %v9783_v41  ;;  %v9790_v42 = vpack.c.bf16 %v1335_v36, %v1331_v20  ;;  %v1178_v33 = vadd.f32 %v9503_v1, %v12292_v35  ;;  %v9796_v11 = vpack.c.bf16 %v1336_v32, %v1332_v43  ;;  %v1337_v18 = vadd.f32 %v1273_v2, %v12294_v16  ;;  %v1013_v20 = vpop.f32.mrf.mxu1  ;;  %v824_v2 = vpop.f32.mrf.mxu0  ;;  %v12298_v35 = vld [vmem:[#allocation51_spill] sm:$0xff] }
 0x18c   : > { %12289 = vst [vmem:[#allocation31_spill] sm:$0xff] %v9788_v40  ;;  %v1276_v0 = vmul.f32 %v12212_v7, %v1011_v30  ;;  %v9800_v49 = vpack.c.bf16 %v1471_v4, %v1467_v15  ;;  %v1472_v59 = vmul.f32 %v9298_v54, %v818_v46  ;;  %v1474_v50 = vmul.f32 %v12213_v26, %v1011_v30 }
 0x18d   : > { %12290 = vst [vmem:[#allocation32_spill] sm:$0xff] %v9790_v42  ;;  %12293 = vst [vmem:[#allocation47_spill] sm:$0xff] %v9796_v11  ;;  %v1275_v25 = vmul.f32 %v9311_v10, %v820_v24  ;;  %v9805_v36 = vpack.c.bf16 %v1337_v18, %v1333_v34  ;;  %v1473_v32 = vmul.f32 %v9314_v56, %v820_v24  ;;  %v1015_v4 = vpop.f32.mrf.mxu1 }
 0x18e   : > { %12295 = vst [vmem:[#allocation48_spill] sm:$0xff] %v9800_v49  ;;  %v1340_v19 = vadd.f32 %v1276_v0, %v12297_v61  ;;  %v1277_v43 = vmul.f32 %v9318_v63, %v1013_v20  ;;  %v1278_v15 = vmul.f32 %v9295_v52, %v822_v45  ;;  %v1476_v46 = vmul.f32 %v9298_v54, %v822_v45  ;;  %v12299_v0 = vld [vmem:[#allocation24_spill] sm:$0xff] }
 0x18f   : > { %12296 = vst [vmem:[#allocation49_spill] sm:$0xff] %v9805_v36  ;;  %v1339_v16 = vadd.f32 %v1275_v25, %v12298_v35  ;;  %v1279_v30 = vmul.f32 %v9311_v10, %v824_v2  ;;  %v1280_v34 = vmul.f32 %v12212_v7, %v1015_v4  ;;  %v1478_v18 = vmul.f32 %v12213_v26, %v1015_v4  ;;  %v1017_v45 = vpop.f32.mrf.mxu1 }
 0x190   : > { %v1341_v6 = vadd.f32 %v1277_v43, %v9545_v53  ;;  %v1477_v24 = vmul.f32 %v9314_v56, %v824_v2  ;;  %v1179_v61 = vadd.f32 %v9503_v1, %v12299_v0  ;;  %v1342_v25 = vadd.f32 %v1278_v15, %v12300_v27 }
 0x191   : > { %v9821_v52 = vpack.c.bf16 %v1476_v46, %v1472_v59  ;;  %v1343_v54 = vadd.f32 %v1279_v30, %v9588_v13  ;;  %v1344_v10 = vadd.f32 %v1280_v34, %v1178_v33  ;;  %v9824_v35 = vpack.c.bf16 %v1478_v18, %v1474_v50 }
 0x192   : > { %v9826_v53 = vpack.c.bf16 %v1477_v24, %v1473_v32  ;;  %v1281_v7 = vmul.f32 %v9318_v63, %v1017_v45  ;;  %v1475_v56 = vmul.f32 %v9321_v62, %v1013_v20  ;;  %v9830_v26 = vpack.c.bf16 %v1342_v25, %v1338_v23 }
 0x193   : > { %12301 = vst [vmem:[#allocation46_spill] sm:$0xff] %v9821_v52  ;;  %12302 = vst [vmem:[#allocation50_spill] sm:$0xff] %v9824_v35  ;;  %v9832_v1 = vpack.c.bf16 %v1343_v54, %v1339_v16  ;;  %v1479_v27 = vmul.f32 %v9321_v62, %v1017_v45  ;;  %v9835_v59 = vpack.c.bf16 %v1344_v10, %v1340_v19  ;;  %v9844_v50 = vmov 0.0  }
 0x194   : > { %12303 = vst [vmem:[#allocation33_spill] sm:$0xff] %v9830_v26  ;;  %v1345_v43 = vadd.f32 %v1281_v7, %v1179_v61  ;;  %v9846_v63 = vmov 0.0   ;;  %v9848_v20 = vmov 0.0   ;;  %v9850_v23 = vmov 0.0  }
 0x195   : > { %12304 = vst [vmem:[#allocation51_spill] sm:$0xff] %v9832_v1  ;;  %12305 = vst [vmem:[#allocation24_spill] sm:$0xff] %v9835_v59  ;;  %v9837_v13 = vpack.c.bf16 %v1479_v27, %v1475_v56  ;;  %v9852_v32 = vmov 0.0   ;;  %v9854_v62 = vmov 0.0   ;;  %v9856_v19 = vmov 0.0  }
 0x196   : > { %v9839_v33 = vpack.c.bf16 %v1345_v43, %v1341_v6  ;;  %v9858_v2 = vmov 0.0   ;;  %v9860_v6 = vmov 0.0   ;;  %v9862_v16 = vmov 0.0  }
 0x197   : > { %12306 = vst [vmem:[#allocation34_spill] sm:$0xff] %v9837_v13  ;;  %v9864_v15 = vmov 0.0   ;;  %v9866_v46 = vmov 0.0   ;;  %v9868_v4 = vmov 1.0   ;;  %v9870_v30 = vmov 1.0  }
 0x198   : > { %12307 = vst [vmem:[#allocation83_spill] sm:$0xff] %v9839_v33  ;;  %v9872_v34 = vmov 1.0   ;;  %v9874_v18 = vmov 1.0  }
 0x199 LB: >> { %v12312_v9 = vld [vmem:[#allocation28_spill] sm:$0xff]  ;;  %v12313_v41 = vld [vmem:[#allocation25_spill] sm:$0xff]  ;;  %v12318_v3 = vld [vmem:[#allocation22_spill] sm:$0xff]  ;;  %12339 = vst [vmem:[#allocation84_spill] sm:$0xff] %v8760_v50  ;;  %v12013_v24 = vmov 0   ;;  %s7609_s14 = sshll.u32 %s8824_s11, 3  ;;  %v8812_v30 = vphi %v9870_v30, %v7235_v30   ;;  %v8808_v4 = vphi %v9868_v4, %v12640_v4   ;;  %v8804_v46 = vphi %v9866_v46, %v12639_v46   ;;  %v8800_v15 = vphi %v9864_v15, %v12638_v15   ;;  %v8796_v16 = vphi %v9862_v16, %v12637_v16   ;;  %v8792_v6 = vphi %v9860_v6, %v12636_v6   ;;  %v8788_v2 = vphi %v9858_v2, %v12635_v2   ;;  %v8784_v19 = vphi %v9856_v19, %v12634_v19   ;;  %v8780_v62 = vphi %v9854_v62, %v12633_v62   ;;  %v8776_v32 = vphi %v9852_v32, %v12632_v32   ;;  %v8772_v23 = vphi %v9850_v23, %v12631_v23   ;;  %v8768_v20 = vphi %v9848_v20, %v12630_v20   ;;  %v8764_v63 = vphi %v9846_v63, %v12629_v63   ;;  %v8760_v50 = vphi %v9844_v50, %v12628_v50   ;;  %s8824_s11 = sphi %s9876_s11, %s1519_s11   ;;  %v8820_v18 = vphi %v9874_v18, %v12642_v18   ;;  %v8816_v34 = vphi %v9872_v34, %v12641_v34  }
 0x19a   : >> { %v12308_v35 = vld [vmem:[#allocation50_spill] sm:$0xff]  ;;  %v12316_v42 = vld [vmem:[#allocation32_spill] sm:$0xff]  ;;  %v12317_v36 = vld [vmem:[#allocation49_spill] sm:$0xff]  ;;  %12340 = vst [vmem:[#allocation85_spill] sm:$0xff] %v8764_v63  ;;  %5543 = vmatprep.mubr.bf16.mxu0 %v12013_v24  ;;  %5584 = vmatprep.mubr.bf16.mxu1 %v12013_v24  ;;  %s9933_s15 = scvt.s32.f32 %s7609_s14  ;;  %s1519_s11 = sadd.s32 1, %s8824_s11  }
 0x19b   : >> { %v12314_v26 = vld [vmem:[#allocation33_spill] sm:$0xff]  ;;  %v12320_v11 = vld [vmem:[#allocation47_spill] sm:$0xff]  ;;  %v12321_v22 = vld [vmem:[#allocation20_spill] sm:$0xff]  ;;  %12341 = vst [vmem:[#allocation86_spill] sm:$0xff] %v8768_v20  ;;  %8367 = vset.pattern.permute.xlu0 %v12013_v24  ;;  %p11787_p7 = scmp.ge.s32.totalorder %s1519_s11, 4  }
 0x19c   : >> { %v12310_v1 = vld [vmem:[#allocation51_spill] sm:$0xff]  ;;  %v12315_v59 = vld [vmem:[#allocation24_spill] sm:$0xff]  ;;  %v12319_v48 = vld [vmem:[#allocation81_spill] sm:$0xff]  ;;  %12342 = vst [vmem:[#allocation87_spill] sm:$0xff] %v8772_v23  ;;  %s1538_s16 = sadd.f32 0.5, %s9933_s15  ;;  %v12356_v23 = vmov 0  }
 0x19d   : >> { %v12322_v58 = vld [vmem:[#allocation21_spill] sm:$0xff]  ;;  %v12323_v40 = vld [vmem:[#allocation31_spill] sm:$0xff]  ;;  %v12324_v57 = vld [vmem:[#allocation80_spill] sm:$0xff]  ;;  %12343 = vst [vmem:[#allocation88_spill] sm:$0xff] %v8776_v32  ;;  %s1842_s17 = sadd.f32 1.5, %s9933_s15  ;;  %vm7379_vm12 = vcmask (%p11787_p7), 1044480  }
 0x19e   : >> { %v12311_v13 = vld [vmem:[#allocation34_spill] sm:$0xff]  ;;  %v12326_v5 = vld [vmem:[#allocation43_spill] sm:$0xff]  ;;  %v12328_v12 = vld [vmem:[#allocation40_spill] sm:$0xff]  ;;  %12344 = vst [vmem:[#allocation89_spill] sm:$0xff] %v8780_v62  ;;  %s9938_s18 = smul.f32 0.03125, %s1538_s16  ;;  %vm7388_vm13 = vcmask (%p11787_p7), 1046528  }
 0x19f   : >> { %v12309_v33 = vld [vmem:[#allocation83_spill] sm:$0xff]  ;;  %v12325_v14 = vld [vmem:[#allocation82_spill] sm:$0xff]  ;;  %v12330_v49 = vld [vmem:[#allocation48_spill] sm:$0xff]  ;;  %12345 = vst [vmem:[#allocation90_spill] sm:$0xff] %v8784_v19  ;;  %s9941_s12 = smul.f32 0.03125, %s1842_s17  ;;  %s8159_s11 = sshll.u32 (%p11787_p7), %s8887_s25, 9 }
 0x1a0   : >> { %v12327_v39 = vld [vmem:[#allocation18_spill] sm:$0xff]  ;;  %v12329_v29 = vld [vmem:[#allocation79_spill] sm:$0xff]  ;;  %v12332_v8 = vld [vmem:[#allocation41_spill] sm:$0xff]  ;;  %12346 = vst [vmem:[#allocation91_spill] sm:$0xff] %v8788_v2  ;;  %s1542_s10 = sshrl.u32 %s9938_s18, 16  ;;  %p1541_p11 = scmp.ne.f32.partialorder %s9938_s18, %s9938_s18 }
 0x1a1   : >> { %v12331_v21 = vld [vmem:[#allocation23_spill] sm:$0xff]  ;;  %v12333_v37 = vld [vmem:[#allocation74_spill] sm:$0xff]  ;;  %v12335_v44 = vld [vmem:[#allocation45_spill] sm:$0xff]  ;;  %12347 = vst [vmem:[#allocation92_spill] sm:$0xff] %v8792_v6  ;;  %s1543_s19 = sand.u32 1, %s1542_s10  ;;  %s1846_s29 = sshrl.u32 %s9941_s12, 16 }
 0x1a2   : >> { %v12334_v28 = vld [vmem:[#allocation39_spill] sm:$0xff]  ;;  %v12337_v47 = vld [vmem:[#allocation42_spill] sm:$0xff]  ;;  %12348 = vst [vmem:[#allocation93_spill] sm:$0xff] %v8796_v16  ;;  %12349 = vst [vmem:[#allocation94_spill] sm:$0xff] %v8800_v15  ;;  %s1544_s20 = sadd.s32 32767, %s1543_s19  ;;  %s1847_s9 = sand.u32 1, %s1846_s29 }
 0x1a3   : >> { %v12336_v38 = vld [vmem:[#allocation19_spill] sm:$0xff]  ;;  %v12338_v52 = vld [vmem:[#allocation46_spill] sm:$0xff]  ;;  %12350 = vst [vmem:[#allocation95_spill] sm:$0xff] %v8804_v46  ;;  %12351 = vst [vmem:[#allocation96_spill] sm:$0xff] %v8808_v4  ;;  %s1545_s26 = sadd.s32 %s1544_s20, %s9938_s18  ;;  %s1848_s1 = sadd.s32 32767, %s1847_s9 }
 0x1a4   : >> { %12352 = vst [vmem:[#allocation97_spill] sm:$0xff] %v8812_v30  ;;  %12353 = vst [vmem:[#allocation98_spill] sm:$0xff] %v8816_v34  ;;  %v12355_v0 = vld [vmem:[#allocation17_spill] sm:$0xff]  ;;  %s1546_s28 = sand.u32 4294901760, %s1545_s26  ;;  %p1845_p12 = scmp.ne.f32.partialorder %s9941_s12, %s9941_s12  ;;  %v12357_v55 = vld [vmem:[#allocation44_spill] sm:$0xff] }
 0x1a5   : >> { %12354 = vst [vmem:[#allocation99_spill] sm:$0xff] %v8820_v18  ;;  %4228 = vperm.xlu0 %8367, %v12355_v0   ;;  %s12661_s28 = smov (%p1541_p11, %s1546_s28), 2143289344  ;;  %v12358_v31 = vld [vmem:[#allocation38_spill] sm:$0xff]  ;;  %v12359_v51 = vld [vmem:[#allocation73_spill] sm:$0xff]  ;;  %v12364_v16 = vld [vmem:[#allocation75_spill] sm:$0xff]  ;;  %s2146_s10 = sadd.f32 2.5, %s9933_s15 }
 0x1a6   : >> { %s1549_s14 = sshrl.u32 %s12661_s28, 16  ;;  %v12360_v17 = vld [vmem:[#allocation66_spill] sm:$0xff]  ;;  %v12365_v34 = vld [vmem:[#allocation77_spill] sm:$0xff]  ;;  %v12367_v18 = vld [vmem:[#allocation72_spill] sm:$0xff]  ;;  %s11902_s25 = scalar_lea.hbm (%p11787_p7), %s11955_s6, %s8159_s11 }
 0x1a7   : >> { %s1550_s0 = sshll.u32 %s1549_s14, 16  ;;  %v12363_v62 = vld [vmem:[#allocation78_spill] sm:$0xff]  ;;  %s10074_s20 = smul.f32 0.03125, %s2146_s10 }
 0x1a8   : >> { %s1551_s16 = sor.u32 %s1550_s0, %s1549_s14  ;;  %s9970_s0 = sadd.s32 %s1848_s1, %s9941_s12 }
 0x1a9   : >> { %v9947_v61 = vstv %s1551_s16  ;;  %s1850_s1 = sand.u32 4294901760, %s9970_s0  ;;  %s2150_s26 = sshrl.u32 %s10074_s20, 16 }
 0x1aa   : >> { %v1583_v25 = vmul.bf16 %v9947_v61, %v9826_v53  ;;  %v1585_v54 = vmul.bf16 %v9947_v61, %v12311_v13  ;;  %v1582_v45 = vmul.bf16 %v9947_v61, %v12338_v52  ;;  %v1584_v10 = vmul.bf16 %v9947_v61, %v12308_v35  ;;  %s12663_s1 = smov (%p1845_p12, %s1850_s1), 2143289344  ;;  %s2151_s28 = sand.u32 1, %s2150_s26 }
 0x1ab   : >> { %v1579_v7 = vmul.bf16 %v9947_v61, %v9785_v60  ;;  %v1581_v56 = vmul.bf16 %v9947_v61, %v12330_v49  ;;  %v1578_v27 = vmul.bf16 %v9947_v61, %v12312_v9  ;;  %v1580_v43 = vmul.bf16 %v9947_v61, %v12313_v41  ;;  %s1853_s9 = sshrl.u32 %s12663_s1, 16  ;;  %s2152_s29 = sadd.s32 32767, %s2151_s28 }
 0x1ac   : >> { %v1615_v0 = vadd.bf16 %v1583_v25, %v12310_v1  ;;  %v1617_v24 = vadd.bf16 %v1585_v54, %v12309_v33  ;;  %v1614_v50 = vadd.bf16 %v1582_v45, %v12314_v26  ;;  %v1616_v20 = vadd.bf16 %v1584_v10, %v12315_v59  ;;  %s1854_s17 = sshll.u32 %s1853_s9, 16  ;;  %s10135_s14 = sadd.s32 %s2152_s29, %s10074_s20 }
 0x1ad   : >> { %v1611_v32 = vadd.bf16 %v1579_v7, %v12316_v42  ;;  %v1613_v19 = vadd.bf16 %v1581_v56, %v12317_v36  ;;  %v1610_v6 = vadd.bf16 %v1578_v27, %v12323_v40  ;;  %v1612_v63 = vadd.bf16 %v1580_v43, %v12320_v11  ;;  %s1855_s19 = sor.u32 %s1854_s17, %s1853_s9  ;;  %p2149_p13 = scmp.ne.f32.partialorder %s10074_s20, %s10074_s20 }
 0x1ae   : >> { %v1647_v15 = vmax.bf16 %v12356_v23, %v1615_v0  ;;  %v1649_v25 = vmax.bf16 %v12356_v23, %v1617_v24  ;;  %v1646_v54 = vmax.bf16 %v12356_v23, %v1614_v50  ;;  %v1648_v45 = vmax.bf16 %v12356_v23, %v1616_v20  ;;  %s2154_s16 = sand.u32 4294901760, %s10135_s14  ;;  %s2450_s9 = sadd.f32 3.5, %s9933_s15 }
 0x1af   : >> { %v1643_v10 = vmax.bf16 %v12356_v23, %v1611_v32  ;;  %v1645_v7 = vmax.bf16 %v12356_v23, %v1613_v19  ;;  %v1642_v56 = vmax.bf16 %v12356_v23, %v1610_v6  ;;  %v1644_v27 = vmax.bf16 %v12356_v23, %v1612_v63  ;;  %s12665_s16 = smov (%p2149_p13, %s2154_s16), 2143289344 }
 0x1b0   : >> { %5511 = vmatprep.subr.bf16.mxu0 %v1647_v15  ;;  %5552 = vmatprep.subr.bf16.mxu1 %v1649_v25  ;;  %v1575_v50 = vmul.bf16 %v9947_v61, %v12318_v3  ;;  %v1577_v20 = vmul.bf16 %v9947_v61, %v12319_v48  ;;  %v1574_v32 = vmul.bf16 %v9947_v61, %v12322_v58  ;;  %s2157_s0 = sshrl.u32 %s12665_s16, 16  ;;  %s10224_s10 = smul.f32 0.03125, %s2450_s9 }
 0x1b1   : >> { %5512 = vmatpush1.bf16.msra.mxu0 %v1646_v54  ;;  %5553 = vmatpush1.bf16.msra.mxu1 %v1648_v45  ;;  %v1576_v19 = vmul.bf16 %v9947_v61, %v12321_v22  ;;  %v1571_v63 = vmul.bf16 %v9947_v61, %v12326_v5  ;;  %v1573_v6 = vmul.bf16 %v9947_v61, %v12327_v39  ;;  %s2158_s1 = sshll.u32 %s2157_s0, 16 }
 0x1b2   : >> { %5513 = vmatprep.subr.bf16.mxu0 %v1643_v10  ;;  %5554 = vmatprep.subr.bf16.mxu1 %v1645_v7  ;;  %v1607_v15 = vadd.bf16 %v1575_v50, %v12324_v57  ;;  %v1609_v24 = vadd.bf16 %v1577_v20, %v12325_v14  ;;  %v1606_v43 = vadd.bf16 %v1574_v32, %v12329_v29  ;;  %s2159_s17 = sor.u32 %s2158_s1, %s2157_s0  ;;  %p2453_p0 = scmp.ne.f32.partialorder %s10224_s10, %s10224_s10 }
 0x1b3   : >> { %v1608_v0 = vadd.bf16 %v1576_v19, %v12331_v21  ;;  %v1603_v25 = vadd.bf16 %v1571_v63, %v12335_v44  ;;  %v1605_v54 = vadd.bf16 %v1573_v6, %v12336_v38  ;;  %v1570_v45 = vmul.bf16 %v9947_v61, %v12328_v12  ;;  %s2754_s1 = sadd.f32 4.5, %s9933_s15 }
 0x1b4   : >> { %v1639_v10 = vmax.bf16 %v12356_v23, %v1607_v15  ;;  %v1641_v7 = vmax.bf16 %v12356_v23, %v1609_v24  ;;  %v1638_v50 = vmax.bf16 %v12356_v23, %v1606_v43  ;;  %v1572_v20 = vmul.bf16 %v9947_v61, %v12332_v8 }
 0x1b5   : >> { %5514 = vmatpush1.bf16.msra.mxu0 %v1642_v56  ;;  %5555 = vmatpush1.bf16.msra.mxu1 %v1644_v27  ;;  %v1640_v32 = vmax.bf16 %v12356_v23, %v1608_v0  ;;  %v1635_v19 = vmax.bf16 %v12356_v23, %v1603_v25  ;;  %v1637_v63 = vmax.bf16 %v12356_v23, %v1605_v54 }
 0x1b6   : >> { %5515 = vmatprep.subr.bf16.mxu0 %v1639_v10  ;;  %5556 = vmatprep.subr.bf16.mxu1 %v1641_v7  ;;  %v1602_v6 = vadd.bf16 %v1570_v45, %v12337_v47  ;;  %v1604_v15 = vadd.bf16 %v1572_v20, %v12357_v55  ;;  %v1567_v24 = vmul.bf16 %v9947_v61, %v12333_v37  ;;  %v12361_v45 = vld [vmem:[#allocation76_spill] sm:$0xff]  ;;  %v12362_v7 = vld [vmem:[#allocation71_spill] sm:$0xff]  ;;  %v12379_v55 = vld [vmem:[#allocation37_spill] sm:$0xff] }
 0x1b7   : >> { %v1569_v56 = vmul.bf16 %v9947_v61, %v12334_v28  ;;  %v1566_v27 = vmul.bf16 %v9947_v61, %v12358_v31  ;;  %v1568_v43 = vmul.bf16 %v9947_v61, %v12359_v51  ;;  %v1563_v0 = vmul.bf16 %v9947_v61, %v12360_v17  ;;  %v12378_v31 = vld [vmem:[#allocation61_spill] sm:$0xff]  ;;  %v12386_v17 = vld [vmem:[#allocation52_spill] sm:$0xff] }
 0x1b8   : >> { %v1634_v25 = vmax.bf16 %v12356_v23, %v1602_v6  ;;  %v1636_v54 = vmax.bf16 %v12356_v23, %v1604_v15  ;;  %v1599_v10 = vadd.bf16 %v1567_v24, %v12361_v45  ;;  %v1565_v20 = vmul.bf16 %v9947_v61, %v12362_v7  ;;  %v12366_v15 = vld [vmem:[#allocation69_spill] sm:$0xff] }
 0x1b9   : >> { %5516 = vmatpush1.bf16.msra.mxu0 %v1638_v50  ;;  %5557 = vmatpush1.bf16.msra.mxu1 %v1640_v32  ;;  %v1601_v4 = vadd.bf16 %v1569_v56, %v12363_v62  ;;  %v1598_v2 = vadd.bf16 %v1566_v27, %v12364_v16  ;;  %v1600_v46 = vadd.bf16 %v1568_v43, %v12365_v34  ;;  %v12368_v16 = vld [vmem:[#allocation65_spill] sm:$0xff] }
 0x1ba   : >> { %5517 = vmatprep.subr.bf16.mxu0 %v1635_v19  ;;  %5558 = vmatprep.subr.bf16.mxu1 %v1637_v63  ;;  %v1631_v6 = vmax.bf16 %v12356_v23, %v1599_v10  ;;  %v1595_v30 = vadd.bf16 %v1563_v0, %v12366_v15  ;;  %v1597_v7 = vadd.bf16 %v1565_v20, %v12367_v18  ;;  %v12369_v63 = vld [vmem:[#allocation67_spill] sm:$0xff]  ;;  %v12370_v0 = vld [vmem:[#allocation60_spill] sm:$0xff] }
 0x1bb   : >> { %v1633_v50 = vmax.bf16 %v12356_v23, %v1601_v4  ;;  %v1630_v32 = vmax.bf16 %v12356_v23, %v1598_v2  ;;  %v1632_v62 = vmax.bf16 %v12356_v23, %v1600_v46  ;;  %v1562_v34 = vmul.bf16 %v9947_v61, %v12368_v16  ;;  %v12371_v2 = vld [vmem:[#allocation68_spill] sm:$0xff]  ;;  %v12374_v15 = vld [vmem:[#allocation59_spill] sm:$0xff] }
 0x1bc   : >> { %v1627_v27 = vmax.bf16 %v12356_v23, %v1595_v30  ;;  %v1629_v19 = vmax.bf16 %v12356_v23, %v1597_v7  ;;  %v1564_v10 = vmul.bf16 %v9947_v61, %v12369_v63  ;;  %v1559_v18 = vmul.bf16 %v9947_v61, %v12370_v0  ;;  %v12372_v4 = vld [vmem:[#allocation64_spill] sm:$0xff]  ;;  %v12376_v7 = vld [vmem:[#allocation70_spill] sm:$0xff] }
 0x1bd   : >> { %5518 = vmatpush1.bf16.msra.mxu0 %v1634_v25  ;;  %5559 = vmatpush1.bf16.msra.mxu1 %v1636_v54  ;;  %v1594_v46 = vadd.bf16 %v1562_v34, %v12371_v2  ;;  %v12373_v24 = vmov %v12372_v4  ;;  %v1561_v20 = vmul.bf16 %v9947_v61, %v12372_v4  ;;  %v12375_v56 = vmov %v12374_v15  ;;  %v12377_v63 = vld [vmem:[#allocation62_spill] sm:$0xff] }
 0x1be   : >> { %v1558_v30 = vmul.bf16 %v9947_v61, %v12374_v15  ;;  %5519 = vmatprep.subr.bf16.mxu0 %v1631_v6  ;;  %5560 = vmatprep.subr.bf16.mxu1 %v1633_v50  ;;  %v1596_v16 = vadd.bf16 %v1564_v10, %v12376_v7  ;;  %v1591_v51 = vadd.bf16 %v1559_v18, %v12377_v63  ;;  %v12380_v54 = vld [vmem:[#allocation54_spill] sm:$0xff]  ;;  %v10072_v2 = vstv %s1855_s19  ;;  %v12381_v50 = vld [vmem:[#allocation36_spill] sm:$0xff]  ;;  %v12382_v18 = vld [vmem:[#allocation57_spill] sm:$0xff]  ;;  %s2454_s19 = sshrl.u32 %s10224_s10, 16 }
 0x1bf   : >> { %v1560_v0 = vmul.bf16 %v9947_v61, %v12378_v31  ;;  %v1593_v25 = vadd.bf16 %v1561_v20, %v12379_v55  ;;  %v1555_v34 = vmul.bf16 %v9947_v61, %v12380_v54  ;;  %v1626_v4 = vmax.bf16 %v12356_v23, %v1594_v46  ;;  %v12383_v54 = vld [vmem:[#allocation63_spill] sm:$0xff]  ;;  %v12385_v7 = vld [vmem:[#allocation58_spill] sm:$0xff]  ;;  %s2455_s26 = sand.u32 1, %s2454_s19 }
 0x1c0   : >> { %v1628_v6 = vmax.bf16 %v12356_v23, %v1596_v16  ;;  %v1590_v10 = vadd.bf16 %v1558_v30, %v12381_v50  ;;  %v1557_v15 = vmul.bf16 %v9947_v61, %v12382_v18  ;;  %v1623_v20 = vmax.bf16 %v12356_v23, %v1591_v51  ;;  %v12384_v31 = vld [vmem:[#allocation55_spill] sm:$0xff]  ;;  %s2456_s28 = sadd.s32 32767, %s2455_s26 }
 0x1c1   : >> { %5520 = vmatpush1.bf16.msra.mxu0 %v1630_v32  ;;  %5561 = vmatpush1.bf16.msra.mxu1 %v1632_v62  ;;  %v1625_v63 = vmax.bf16 %v12356_v23, %v1593_v25  ;;  %v1592_v55 = vadd.bf16 %v1560_v0, %v12383_v54  ;;  %v1587_v46 = vadd.bf16 %v1555_v34, %v12384_v31  ;;  %v12387_v50 = vld [vmem:[#allocation35_spill] sm:$0xff]  ;;  %v12390_v34 = vld [vmem:[#allocation56_spill] sm:$0xff]  ;;  %s10281_s29 = sadd.s32 %s2456_s28, %s10224_s10 }
 0x1c2   : >> { %5521 = vmatprep.subr.bf16.mxu0 %v1627_v27  ;;  %5562 = vmatprep.subr.bf16.mxu1 %v1629_v19  ;;  %v1589_v16 = vadd.bf16 %v1557_v15, %v12385_v7  ;;  %v1554_v30 = vmul.bf16 %v9947_v61, %v12386_v17  ;;  %v12388_v43 = vmov %v12387_v50  ;;  %v1556_v18 = vmul.bf16 %v9947_v61, %v12387_v50  ;;  %v12389_v27 = vld [vmem:[#allocation53_spill] sm:$0xff]  ;;  %s2458_s14 = sand.u32 4294901760, %s10281_s29 }
 0x1c3   : >> { %v1887_v32 = vmul.bf16 %v10072_v2, %v9826_v53  ;;  %v1889_v51 = vmul.bf16 %v10072_v2, %v12311_v13  ;;  %v1622_v62 = vmax.bf16 %v12356_v23, %v1590_v10  ;;  %v1886_v0 = vmul.bf16 %v10072_v2, %v12338_v52  ;;  %s12667_s14 = smov (%p2453_p0, %s2458_s14), 2143289344 }
 0x1c4   : >> { %v1586_v19 = vadd.bf16 %v1554_v30, %v12389_v27  ;;  %v1888_v25 = vmul.bf16 %v10072_v2, %v12308_v35  ;;  %v1624_v61 = vmax.bf16 %v12356_v23, %v1592_v55  ;;  %v12391_v7 = vmov %v12390_v34  ;;  %s2461_s16 = sshrl.u32 %s12667_s14, 16 }
 0x1c5   : >> { %5522 = vmatpush1.bf16.msra.mxu0 %v1626_v4  ;;  %5563 = vmatpush1.bf16.msra.mxu1 %v1628_v6  ;;  %v1588_v15 = vadd.bf16 %v1556_v18, %v12390_v34  ;;  %v1919_v50 = vadd.bf16 %v1887_v32, %v12310_v1  ;;  %v1619_v10 = vmax.bf16 %v12356_v23, %v1587_v46  ;;  %s2462_s0 = sshll.u32 %s2461_s16, 16 }
 0x1c6   : >> { %5523 = vmatprep.subr.bf16.mxu0 %v1623_v20  ;;  %5564 = vmatprep.subr.bf16.mxu1 %v1625_v63  ;;  %v1621_v30 = vmax.bf16 %v12356_v23, %v1589_v16  ;;  %v1921_v27 = vadd.bf16 %v1889_v51, %v12309_v33  ;;  %v1618_v52 = vmax.bf16 %v12356_v23, %v1586_v19  ;;  %s2463_s9 = sor.u32 %s2462_s0, %s2461_s16 }
 0x1c7   : >> { %v1918_v4 = vadd.bf16 %v1886_v0, %v12314_v26  ;;  %v1920_v6 = vadd.bf16 %v1888_v25, %v12315_v59  ;;  %v1883_v55 = vmul.bf16 %v10072_v2, %v9785_v60  ;;  %v1620_v18 = vmax.bf16 %v12356_v23, %v1588_v15 }
 0x1c8   : >> { %v1951_v20 = vmax.bf16 %v12356_v23, %v1919_v50  ;;  %v1885_v63 = vmul.bf16 %v10072_v2, %v12330_v49  ;;  %v1882_v46 = vmul.bf16 %v10072_v2, %v12312_v9  ;;  %v1884_v32 = vmul.bf16 %v10072_v2, %v12313_v41 }
 0x1c9   : >> { %5524 = vmatpush1.bf16.msra.mxu0 %v1622_v62  ;;  %5565 = vmatpush1.bf16.msra.mxu1 %v1624_v61  ;;  %v1915_v16 = vadd.bf16 %v1883_v55, %v12316_v42  ;;  %v1879_v51 = vmul.bf16 %v10072_v2, %v12318_v3  ;;  %v1953_v19 = vmax.bf16 %v12356_v23, %v1921_v27 }
 0x1ca   : >> { %5525 = vmatprep.subr.bf16.mxu0 %v1619_v10  ;;  %5566 = vmatprep.subr.bf16.mxu1 %v1621_v30  ;;  %v1917_v0 = vadd.bf16 %v1885_v63, %v12317_v36  ;;  %v1881_v62 = vmul.bf16 %v10072_v2, %v12319_v48  ;;  %v1914_v25 = vadd.bf16 %v1882_v46, %v12323_v40  ;;  %v12392_v46 = vld [vmem:[#allocation16_spill] sm:$0xff] }
 0x1cb   : >> { %v1916_v61 = vadd.bf16 %v1884_v32, %v12320_v11  ;;  %v1950_v34 = vmax.bf16 %v12356_v23, %v1918_v4  ;;  %v1878_v15 = vmul.bf16 %v10072_v2, %v12322_v58  ;;  %v1880_v50 = vmul.bf16 %v10072_v2, %v12321_v22 }
 0x1cc   : >> { %v1952_v27 = vmax.bf16 %v12356_v23, %v1920_v6  ;;  %v1947_v10 = vmax.bf16 %v12356_v23, %v1915_v16  ;;  %v1911_v30 = vadd.bf16 %v1879_v51, %v12324_v57  ;;  %v1949_v4 = vmax.bf16 %v12356_v23, %v1917_v0 }
 0x1cd   : >> { %5526 = vmatpush1.bf16.msra.mxu0 %v1618_v52  ;;  %5567 = vmatpush1.bf16.msra.mxu1 %v1620_v18  ;;  %v1913_v55 = vadd.bf16 %v1881_v62, %v12325_v14  ;;  %v1875_v63 = vmul.bf16 %v10072_v2, %v12326_v5  ;;  %v1946_v52 = vmax.bf16 %v12356_v23, %v1914_v25 }
 0x1ce   : >> { %5593 = vmatprep.subr.bf16.mxu0 %v1951_v20  ;;  %5634 = vmatprep.subr.bf16.mxu1 %v1953_v19  ;;  %v1948_v18 = vmax.bf16 %v12356_v23, %v1916_v61  ;;  %v1877_v6 = vmul.bf16 %v10072_v2, %v12327_v39  ;;  %v1874_v20 = vmul.bf16 %v10072_v2, %v12328_v12 }
 0x1cf   : >> { %v12393_v51 = vmov %v12392_v46  ;;  %v1910_v16 = vadd.bf16 %v1878_v15, %v12329_v29  ;;  %v1912_v32 = vadd.bf16 %v1880_v50, %v12331_v21  ;;  %v1876_v19 = vmul.bf16 %v10072_v2, %v12332_v8 }
 0x1d0   : >> { %5544 = vmatmul.mubr.bf16.vlgmr.msra.gmra.mxu0 %v12392_v46  ;;  %5585 = vmatmul.mubr.bf16.vlgmr.msra.gmra.mxu1 %v12393_v51  ;;  %v1907_v0 = vadd.bf16 %v1875_v63, %v12335_v44  ;;  %v1909_v62 = vadd.bf16 %v1877_v6, %v12336_v38  ;;  %v1871_v25 = vmul.bf16 %v10072_v2, %v12333_v37  ;;  %v12396_v6 = vld [vmem:[#allocation73_spill] sm:$0xff] }
 0x1d1   : >> { %5594 = vmatpush1.bf16.msra.mxu0 %v1950_v34  ;;  %5635 = vmatpush1.bf16.msra.mxu1 %v1952_v27  ;;  %v1943_v61 = vmax.bf16 %v12356_v23, %v1911_v30  ;;  %v1945_v15 = vmax.bf16 %v12356_v23, %v1913_v55  ;;  %v1873_v50 = vmul.bf16 %v10072_v2, %v12334_v28  ;;  %v12394_v27 = vld [vmem:[#allocation38_spill] sm:$0xff]  ;;  %v12404_v28 = vld [vmem:[#allocation60_spill] sm:$0xff] }
 0x1d2   : >> { %5595 = vmatprep.subr.bf16.mxu0 %v1947_v10  ;;  %5636 = vmatprep.subr.bf16.mxu1 %v1949_v4  ;;  %v1906_v34 = vadd.bf16 %v1874_v20, %v12337_v47  ;;  %v1870_v63 = vmul.bf16 %v10072_v2, %v12394_v27  ;;  %v1942_v10 = vmax.bf16 %v12356_v23, %v1910_v16  ;;  %v12395_v4 = vld [vmem:[#allocation44_spill] sm:$0xff]  ;;  %v12397_v16 = vld [vmem:[#allocation78_spill] sm:$0xff] }
 0x1d3   : >> { %5625 = vmatprep.mubr.bf16.mxu0 %v12356_v23  ;;  %v1944_v30 = vmax.bf16 %v12356_v23, %v1912_v32  ;;  %v1908_v55 = vadd.bf16 %v1876_v19, %v12395_v4  ;;  %v1872_v46 = vmul.bf16 %v10072_v2, %v12396_v6  ;;  %5666 = vmatprep.mubr.bf16.mxu1 %v12356_v23  ;;  %v12398_v32 = vld [vmem:[#allocation66_spill] sm:$0xff]  ;;  %v12399_v4 = vld [vmem:[#allocation71_spill] sm:$0xff] }
 0x1d4   : >> { %v1939_v20 = vmax.bf16 %v12356_v23, %v1907_v0  ;;  %v1941_v27 = vmax.bf16 %v12356_v23, %v1909_v62  ;;  %v1903_v47 = vadd.bf16 %v1871_v25, %v12361_v45  ;;  %v1905_v44 = vadd.bf16 %v1873_v50, %v12397_v16  ;;  %v12401_v62 = vld [vmem:[#allocation77_spill] sm:$0xff]  ;;  %v12403_v50 = vld [vmem:[#allocation67_spill] sm:$0xff] }
 0x1d5   : >> { %5596 = vmatpush1.bf16.msra.mxu0 %v1946_v52  ;;  %5637 = vmatpush1.bf16.msra.mxu1 %v1948_v18  ;;  %v1867_v19 = vmul.bf16 %v10072_v2, %v12398_v32  ;;  %v1869_v6 = vmul.bf16 %v10072_v2, %v12399_v4  ;;  %v1938_v52 = vmax.bf16 %v12356_v23, %v1906_v34  ;;  %v12400_v18 = vld [vmem:[#allocation75_spill] sm:$0xff] }
 0x1d6   : >> { %5597 = vmatprep.subr.bf16.mxu0 %v1943_v61  ;;  %5638 = vmatprep.subr.bf16.mxu1 %v1945_v15  ;;  %v1902_v8 = vadd.bf16 %v1870_v63, %v12400_v18  ;;  %v1940_v0 = vmax.bf16 %v12356_v23, %v1908_v55  ;;  %v1904_v25 = vadd.bf16 %v1872_v46, %v12401_v62  ;;  %v12402_v61 = vld [vmem:[#allocation65_spill] sm:$0xff]  ;;  %v12407_v62 = vld [vmem:[#allocation72_spill] sm:$0xff] }
 0x1d7   : >> { %v1866_v15 = vmul.bf16 %v10072_v2, %v12402_v61  ;;  %v1868_v16 = vmul.bf16 %v10072_v2, %v12403_v50  ;;  %v1935_v4 = vmax.bf16 %v12356_v23, %v1903_v47  ;;  %v1863_v34 = vmul.bf16 %v10072_v2, %v12404_v28  ;;  %v12405_v46 = vld [vmem:[#allocation69_spill] sm:$0xff]  ;;  %v12408_v50 = vld [vmem:[#allocation68_spill] sm:$0xff] }
 0x1d8   : >> { %v1865_v63 = vmul.bf16 %v10072_v2, %v12373_v24  ;;  %v1937_v55 = vmax.bf16 %v12356_v23, %v1905_v44  ;;  %v12406_v21 = vmov %v12405_v46  ;;  %v1899_v18 = vadd.bf16 %v1867_v19, %v12405_v46  ;;  %v12410_v24 = vld [vmem:[#allocation70_spill] sm:$0xff]  ;;  %v12414_v19 = vld [vmem:[#allocation37_spill] sm:$0xff] }
 0x1d9   : >> { %5598 = vmatpush1.bf16.msra.mxu0 %v1942_v10  ;;  %5639 = vmatpush1.bf16.msra.mxu1 %v1944_v30  ;;  %v1901_v37 = vadd.bf16 %v1869_v6, %v12407_v62  ;;  %v1934_v10 = vmax.bf16 %v12356_v23, %v1902_v8  ;;  %v1862_v47 = vmul.bf16 %v10072_v2, %v12375_v56  ;;  %v12413_v44 = vld [vmem:[#allocation62_spill] sm:$0xff] }
 0x1da   : >> { %5599 = vmatprep.subr.bf16.mxu0 %v1939_v20  ;;  %5640 = vmatprep.subr.bf16.mxu1 %v1941_v27  ;;  %v1936_v30 = vmax.bf16 %v12356_v23, %v1904_v25  ;;  %v12409_v28 = vmov %v12408_v50  ;;  %v1898_v61 = vadd.bf16 %v1866_v15, %v12408_v50  ;;  %v1900_v32 = vadd.bf16 %v1868_v16, %v12410_v24  ;;  %v12411_v20 = vld [vmem:[#allocation61_spill] sm:$0xff]  ;;  %v12416_v8 = vld [vmem:[#allocation54_spill] sm:$0xff] }
 0x1db   : >> { %v12412_v45 = vmov %v12411_v20  ;;  %v1864_v27 = vmul.bf16 %v10072_v2, %v12411_v20  ;;  %v1895_v6 = vadd.bf16 %v1863_v34, %v12413_v44  ;;  %v12415_v38 = vmov %v12414_v19  ;;  %v12417_v16 = vld [vmem:[#allocation57_spill] sm:$0xff] }
 0x1dc   : >> { %v1897_v46 = vadd.bf16 %v1865_v63, %v12414_v19  ;;  %v1859_v62 = vmul.bf16 %v10072_v2, %v12416_v8  ;;  %v1931_v25 = vmax.bf16 %v12356_v23, %v1899_v18  ;;  %v1933_v15 = vmax.bf16 %v12356_v23, %v1901_v37 }
 0x1dd   : >> { %5600 = vmatpush1.bf16.msra.mxu0 %v1938_v52  ;;  %5641 = vmatpush1.bf16.msra.mxu1 %v1940_v0  ;;  %v12418_v24 = vmov %v12417_v16  ;;  %v1861_v50 = vmul.bf16 %v10072_v2, %v12417_v16  ;;  %v12419_v52 = vld [vmem:[#allocation36_spill] sm:$0xff]  ;;  %v1858_v34 = vmul.bf16 %v10072_v2, %v12386_v17  ;;  %v10229_v63 = vstv %s2159_s17  ;;  %v12420_v16 = vld [vmem:[#allocation58_spill] sm:$0xff]  ;;  %s10376_s17 = smul.f32 0.03125, %s2754_s1 }
 0x1de   : >> { %5601 = vmatprep.subr.bf16.mxu0 %v1935_v4  ;;  %5642 = vmatprep.subr.bf16.mxu1 %v1937_v55  ;;  %v1894_v0 = vadd.bf16 %v1862_v47, %v12419_v52  ;;  %v1930_v4 = vmax.bf16 %v12356_v23, %v1898_v61  ;;  %v1932_v55 = vmax.bf16 %v12356_v23, %v1900_v32 }
 0x1df   : >> { %v1896_v18 = vadd.bf16 %v1864_v27, %v12383_v54  ;;  %v1860_v37 = vmul.bf16 %v10072_v2, %v12388_v43  ;;  %v1927_v20 = vmax.bf16 %v12356_v23, %v1895_v6  ;;  %v1929_v47 = vmax.bf16 %v12356_v23, %v1897_v46  ;;  %v12423_v46 = vld [vmem:[#allocation46_spill] sm:$0xff]  ;;  %s2758_s19 = sshrl.u32 %s10376_s17, 16  ;;  %p2757_p1 = scmp.ne.f32.partialorder %s10376_s17, %s10376_s17 }
 0x1e0   : >> { %v1891_v19 = vadd.bf16 %v1859_v62, %v12384_v31  ;;  %v12421_v17 = vmov %v12420_v16  ;;  %v1893_v52 = vadd.bf16 %v1861_v50, %v12420_v16  ;;  %v2191_v32 = vmul.bf16 %v10229_v63, %v9826_v53  ;;  %s2759_s26 = sand.u32 1, %s2758_s19 }
 0x1e1   : >> { %5602 = vmatpush1.bf16.msra.mxu0 %v1934_v10  ;;  %5643 = vmatpush1.bf16.msra.mxu1 %v1936_v30  ;;  %v2193_v61 = vmul.bf16 %v10229_v63, %v12311_v13  ;;  %v1926_v2 = vmax.bf16 %v12356_v23, %v1894_v0  ;;  %v12422_v10 = vld [vmem:[#allocation53_spill] sm:$0xff]  ;;  %v1928_v27 = vmax.bf16 %v12356_v23, %v1896_v18  ;;  %s2760_s28 = sadd.s32 32767, %s2759_s26 }
 0x1e2   : >> { %5603 = vmatprep.subr.bf16.mxu0 %v1931_v25  ;;  %5644 = vmatprep.subr.bf16.mxu1 %v1933_v15  ;;  %v1890_v30 = vadd.bf16 %v1858_v34, %v12422_v10  ;;  %v1892_v6 = vadd.bf16 %v1860_v37, %v12391_v7  ;;  %v2190_v62 = vmul.bf16 %v10229_v63, %v12423_v46  ;;  %s10430_s29 = sadd.s32 %s2760_s28, %s10376_s17 }
 0x1e3   : >> { %v2192_v25 = vmul.bf16 %v10229_v63, %v12308_v35  ;;  %v1923_v15 = vmax.bf16 %v12356_v23, %v1891_v19  ;;  %v2187_v50 = vmul.bf16 %v10229_v63, %v9785_v60  ;;  %v2189_v0 = vmul.bf16 %v10229_v63, %v12330_v49  ;;  %s2762_s14 = sand.u32 4294901760, %s10430_s29 }
 0x1e4   : >> { %v1925_v34 = vmax.bf16 %v12356_v23, %v1893_v52  ;;  %v2223_v18 = vadd.bf16 %v2191_v32, %v12310_v1  ;;  %v2225_v37 = vadd.bf16 %v2193_v61, %v12309_v33  ;;  %v1924_v19 = vmax.bf16 %v12356_v23, %v1892_v6  ;;  %s12669_s14 = smov (%p2757_p1, %s2762_s14), 2143289344 }
 0x1e5   : >> { %5604 = vmatpush1.bf16.msra.mxu0 %v1930_v4  ;;  %5645 = vmatpush1.bf16.msra.mxu1 %v1932_v55  ;;  %v1922_v4 = vmax.bf16 %v12356_v23, %v1890_v30  ;;  %v2186_v55 = vmul.bf16 %v10229_v63, %v12312_v9  ;;  %v2222_v16 = vadd.bf16 %v2190_v62, %v12314_v26  ;;  %s2765_s16 = sshrl.u32 %s12669_s14, 16 }
 0x1e6   : >> { %5605 = vmatprep.subr.bf16.mxu0 %v1927_v20  ;;  %5646 = vmatprep.subr.bf16.mxu1 %v1929_v47  ;;  %v2224_v49 = vadd.bf16 %v2192_v25, %v12315_v59  ;;  %v2188_v20 = vmul.bf16 %v10229_v63, %v12313_v41  ;;  %v2219_v52 = vadd.bf16 %v2187_v50, %v12316_v42  ;;  %s2766_s0 = sshll.u32 %s2765_s16, 16 }
 0x1e7   : >> { %v2221_v47 = vadd.bf16 %v2189_v0, %v12317_v36  ;;  %v2183_v32 = vmul.bf16 %v10229_v63, %v12318_v3  ;;  %v2255_v61 = vmax.bf16 %v12356_v23, %v2223_v18  ;;  %v2257_v30 = vmax.bf16 %v12356_v23, %v2225_v37  ;;  %s2767_s1 = sor.u32 %s2766_s0, %s2765_s16 }
 0x1e8   : >> { %v2185_v6 = vmul.bf16 %v10229_v63, %v12319_v48  ;;  %v2254_v62 = vmax.bf16 %v12356_v23, %v2222_v16  ;;  %v2256_v25 = vmax.bf16 %v12356_v23, %v2224_v49  ;;  %v2184_v50 = vmul.bf16 %v10229_v63, %v12321_v22 }
 0x1e9   : >> { %5606 = vmatpush1.bf16.msra.mxu0 %v1926_v2  ;;  %5647 = vmatpush1.bf16.msra.mxu1 %v1928_v27  ;;  %v2218_v2 = vadd.bf16 %v2186_v55, %v12323_v40  ;;  %v2182_v27 = vmul.bf16 %v10229_v63, %v12322_v58  ;;  %v2251_v0 = vmax.bf16 %v12356_v23, %v2219_v52  ;;  %v12424_v52 = vld [vmem:[#allocation23_spill] sm:$0xff] }
 0x1ea   : >> { %5607 = vmatprep.subr.bf16.mxu0 %v1923_v15  ;;  %5648 = vmatprep.subr.bf16.mxu1 %v1925_v34  ;;  %v2220_v15 = vadd.bf16 %v2188_v20, %v12320_v11  ;;  %v2253_v34 = vmax.bf16 %v12356_v23, %v2221_v47  ;;  %v2215_v18 = vadd.bf16 %v2183_v32, %v12324_v57  ;;  %v12425_v32 = vld [vmem:[#allocation41_spill] sm:$0xff] }
 0x1eb   : >> { %v2217_v37 = vadd.bf16 %v2185_v6, %v12325_v14  ;;  %v2179_v49 = vmul.bf16 %v10229_v63, %v12326_v5  ;;  %v2250_v55 = vmax.bf16 %v12356_v23, %v2218_v2  ;;  %v2178_v16 = vmul.bf16 %v10229_v63, %v12328_v12  ;;  %v12426_v6 = vld [vmem:[#allocation74_spill] sm:$0xff]  ;;  %v12445_v5 = vld [vmem:[#allocation60_spill] sm:$0xff] }
 0x1ec   : >> { %v2252_v20 = vmax.bf16 %v12356_v23, %v2220_v15  ;;  %v2216_v47 = vadd.bf16 %v2184_v50, %v12424_v52  ;;  %v2175_v2 = vmul.bf16 %v10229_v63, %v12426_v6  ;;  %v12428_v50 = vld [vmem:[#allocation45_spill] sm:$0xff]  ;;  %v12431_v6 = vld [vmem:[#allocation44_spill] sm:$0xff] }
 0x1ed   : >> { %5608 = vmatpush1.bf16.msra.mxu0 %v1922_v4  ;;  %5649 = vmatpush1.bf16.msra.mxu1 %v1924_v19  ;;  %v2181_v4 = vmul.bf16 %v10229_v63, %v12327_v39  ;;  %v2214_v19 = vadd.bf16 %v2182_v27, %v12329_v29  ;;  %v12427_v27 = vld [vmem:[#allocation39_spill] sm:$0xff]  ;;  %v2249_v15 = vmax.bf16 %v12356_v23, %v2217_v37  ;;  %v12432_v39 = vld [vmem:[#allocation38_spill] sm:$0xff] }
 0x1ee   : >> { %5675 = vmatprep.subr.bf16.mxu0 %v2255_v61  ;;  %5716 = vmatprep.subr.bf16.mxu1 %v2257_v30  ;;  %v2180_v61 = vmul.bf16 %v10229_v63, %v12425_v32  ;;  %v2247_v30 = vmax.bf16 %v12356_v23, %v2215_v18  ;;  %v2177_v29 = vmul.bf16 %v10229_v63, %v12427_v27 }
 0x1ef   : >> { %v2211_v52 = vadd.bf16 %v2179_v49, %v12428_v50  ;;  %v2246_v18 = vmax.bf16 %v12356_v23, %v2214_v19  ;;  %v2248_v27 = vmax.bf16 %v12356_v23, %v2216_v47  ;;  %v12434_v49 = vld [vmem:[#allocation76_spill] sm:$0xff]  ;;  %v12435_v19 = vld [vmem:[#allocation78_spill] sm:$0xff] }
 0x1f0   : >> { %5626 = vmatmul.mubr.bf16.vlgmr.msra.gmra.mxu0 %v12393_v51  ;;  %5667 = vmatmul.mubr.bf16.vlgmr.msra.gmra.mxu1 %v12393_v51  ;;  %v12430_v51 = vld [vmem:[#allocation42_spill] sm:$0xff]  ;;  %v2212_v12 = vadd.bf16 %v2180_v61, %v12431_v6 }
 0x1f1   : >> { %5676 = vmatpush1.bf16.msra.mxu0 %v2254_v62  ;;  %5717 = vmatpush1.bf16.msra.mxu1 %v2256_v25  ;;  %v12429_v62 = vld [vmem:[#allocation19_spill] sm:$0xff]  ;;  %v2210_v32 = vadd.bf16 %v2178_v16, %v12430_v51  ;;  %v2209_v16 = vadd.bf16 %v2177_v29, %v12435_v19  ;;  %v12436_v51 = vld [vmem:[#allocation66_spill] sm:$0xff]  ;;  %v2243_v47 = vmax.bf16 %v12356_v23, %v2211_v52 }
 0x1f2   : >> { %5677 = vmatprep.subr.bf16.mxu0 %v2251_v0  ;;  %5718 = vmatprep.subr.bf16.mxu1 %v2253_v34  ;;  %v2213_v25 = vadd.bf16 %v2181_v4, %v12429_v62  ;;  %v2174_v0 = vmul.bf16 %v10229_v63, %v12432_v39  ;;  %v12433_v34 = vld [vmem:[#allocation73_spill] sm:$0xff]  ;;  %v2207_v4 = vadd.bf16 %v2175_v2, %v12434_v49  ;;  %v12437_v39 = vld [vmem:[#allocation71_spill] sm:$0xff] }
 0x1f3   : >> { %5707 = vmatprep.mubr.bf16.mxu0 %v12356_v23  ;;  %v2176_v37 = vmul.bf16 %v10229_v63, %v12433_v34  ;;  %5748 = vmatprep.mubr.bf16.mxu1 %v12356_v23  ;;  %v2171_v62 = vmul.bf16 %v10229_v63, %v12436_v51  ;;  %v2173_v34 = vmul.bf16 %v10229_v63, %v12437_v39  ;;  %v12439_v19 = vld [vmem:[#allocation75_spill] sm:$0xff]  ;;  %v12440_v51 = vld [vmem:[#allocation77_spill] sm:$0xff] }
 0x1f4   : >> { %v2245_v61 = vmax.bf16 %v12356_v23, %v2213_v25  ;;  %v2244_v29 = vmax.bf16 %v12356_v23, %v2212_v12  ;;  %v2206_v49 = vadd.bf16 %v2174_v0, %v12439_v19  ;;  %v2239_v25 = vmax.bf16 %v12356_v23, %v2207_v4 }
 0x1f5   : >> { %5678 = vmatpush1.bf16.msra.mxu0 %v2250_v55  ;;  %5719 = vmatpush1.bf16.msra.mxu1 %v2252_v20  ;;  %v2242_v55 = vmax.bf16 %v12356_v23, %v2210_v32  ;;  %v12438_v20 = vld [vmem:[#allocation65_spill] sm:$0xff]  ;;  %v2241_v32 = vmax.bf16 %v12356_v23, %v2209_v16  ;;  %v2203_v14 = vadd.bf16 %v2171_v62, %v12406_v21  ;;  %v12447_v16 = vld [vmem:[#allocation70_spill] sm:$0xff] }
 0x1f6   : >> { %5679 = vmatprep.subr.bf16.mxu0 %v2247_v30  ;;  %5720 = vmatprep.subr.bf16.mxu1 %v2249_v15  ;;  %v2170_v2 = vmul.bf16 %v10229_v63, %v12438_v20  ;;  %v2208_v30 = vadd.bf16 %v2176_v37, %v12440_v51  ;;  %v12441_v15 = vld [vmem:[#allocation67_spill] sm:$0xff]  ;;  %v12443_v20 = vld [vmem:[#allocation72_spill] sm:$0xff]  ;;  %v2167_v0 = vmul.bf16 %v10229_v63, %v12445_v5 }
 0x1f7   : >> { %v12442_v57 = vmov %v12441_v15  ;;  %v2172_v52 = vmul.bf16 %v10229_v63, %v12441_v15  ;;  %v12444_v39 = vmov %v12443_v20  ;;  %v2205_v12 = vadd.bf16 %v2173_v34, %v12443_v20  ;;  %v12446_v37 = vld [vmem:[#allocation64_spill] sm:$0xff] }
 0x1f8   : >> { %v2169_v19 = vmul.bf16 %v10229_v63, %v12446_v37  ;;  %v2238_v4 = vmax.bf16 %v12356_v23, %v2206_v49  ;;  %v2240_v62 = vmax.bf16 %v12356_v23, %v2208_v30  ;;  %v2168_v34 = vmul.bf16 %v10229_v63, %v12412_v45 }
 0x1f9   : >> { %5680 = vmatpush1.bf16.msra.mxu0 %v2246_v18  ;;  %5721 = vmatpush1.bf16.msra.mxu1 %v2248_v27  ;;  %v2202_v18 = vadd.bf16 %v2170_v2, %v12409_v28  ;;  %v2166_v27 = vmul.bf16 %v10229_v63, %v12375_v56  ;;  %v2235_v15 = vmax.bf16 %v12356_v23, %v2203_v14 }
 0x1fa   : >> { %5681 = vmatprep.subr.bf16.mxu0 %v2243_v47  ;;  %5722 = vmatprep.subr.bf16.mxu1 %v2245_v61  ;;  %v12448_v47 = vmov %v12447_v16  ;;  %v2204_v61 = vadd.bf16 %v2172_v52, %v12447_v16  ;;  %v2163_v2 = vmul.bf16 %v10229_v63, %v12416_v8  ;;  %v2165_v20 = vmul.bf16 %v10229_v63, %v12418_v24 }
 0x1fb   : >> { %v2237_v49 = vmax.bf16 %v12356_v23, %v2205_v12  ;;  %v2199_v30 = vadd.bf16 %v2167_v0, %v12413_v44  ;;  %v2201_v52 = vadd.bf16 %v2169_v19, %v12415_v38  ;;  %v10374_v16 = vstv %s2463_s9  ;;  %s3058_s9 = sadd.f32 5.5, %s9933_s15 }
 0x1fc   : >> { %v2234_v14 = vmax.bf16 %v12356_v23, %v2202_v18  ;;  %v2236_v8 = vmax.bf16 %v12356_v23, %v2204_v61  ;;  %v2164_v0 = vmul.bf16 %v10229_v63, %v12388_v43  ;;  %v2195_v19 = vadd.bf16 %v2163_v2, %v12384_v31 }
 0x1fd   : >> { %5682 = vmatpush1.bf16.msra.mxu0 %v2242_v55  ;;  %5723 = vmatpush1.bf16.msra.mxu1 %v2244_v29  ;;  %v12449_v55 = vld [vmem:[#allocation36_spill] sm:$0xff]  ;;  %v2197_v38 = vadd.bf16 %v2165_v20, %v12421_v17  ;;  %v2495_v18 = vmul.bf16 %v10374_v16, %v9826_v53  ;;  %v2233_v61 = vmax.bf16 %v12356_v23, %v2201_v52  ;;  %s10528_s19 = smul.f32 0.03125, %s3058_s9  ;;  %s3362_s9 = sadd.f32 6.5, %s9933_s15 }
 0x1fe   : >> { %5683 = vmatprep.subr.bf16.mxu0 %v2239_v25  ;;  %5724 = vmatprep.subr.bf16.mxu1 %v2241_v32  ;;  %v2198_v29 = vadd.bf16 %v2166_v27, %v12449_v55  ;;  %v2200_v25 = vadd.bf16 %v2168_v34, %v12383_v54  ;;  %v12450_v32 = vld [vmem:[#allocation52_spill] sm:$0xff]  ;;  %v2231_v27 = vmax.bf16 %v12356_v23, %v2199_v30 }
 0x1ff   : >> { %v12451_v24 = vmov %v12450_v32  ;;  %v2162_v12 = vmul.bf16 %v10229_v63, %v12450_v32  ;;  %v2497_v34 = vmul.bf16 %v10374_v16, %v12311_v13  ;;  %v2496_v20 = vmul.bf16 %v10374_v16, %v12308_v35  ;;  %v12452_v32 = vld [vmem:[#allocation48_spill] sm:$0xff]  ;;  %s3062_s26 = sshrl.u32 %s10528_s19, 16  ;;  %p3061_p2 = scmp.ne.f32.partialorder %s10528_s19, %s10528_s19 }
 0x200   : >> { %v2230_v63 = vmax.bf16 %v12356_v23, %v2198_v29  ;;  %v2229_v30 = vmax.bf16 %v12356_v23, %v2197_v38  ;;  %v2527_v52 = vadd.bf16 %v2495_v18, %v12310_v1  ;;  %v2492_v18 = vmul.bf16 %v10374_v16, %v12313_v41  ;;  %s3063_s28 = sand.u32 1, %s3062_s26 }
 0x201   : >> { %5684 = vmatpush1.bf16.msra.mxu0 %v2238_v4  ;;  %5725 = vmatpush1.bf16.msra.mxu1 %v2240_v62  ;;  %v2494_v4 = vmul.bf16 %v10374_v16, %v12423_v46  ;;  %v2232_v62 = vmax.bf16 %v12356_v23, %v2200_v25  ;;  %v2194_v2 = vadd.bf16 %v2162_v12, %v12422_v10  ;;  %s3064_s29 = sadd.s32 32767, %s3063_s28  ;;  %s10674_s28 = smul.f32 0.03125, %s3362_s9 }
 0x202   : >> { %5685 = vmatprep.subr.bf16.mxu0 %v2235_v15  ;;  %5726 = vmatprep.subr.bf16.mxu1 %v2237_v49  ;;  %v2196_v15 = vadd.bf16 %v2164_v0, %v12391_v7  ;;  %v2227_v49 = vmax.bf16 %v12356_v23, %v2195_v19  ;;  %v2529_v29 = vadd.bf16 %v2497_v34, %v12309_v33  ;;  %s10587_s14 = sadd.s32 %s3064_s29, %s10528_s19 }
 0x203   : >> { %v2491_v25 = vmul.bf16 %v10374_v16, %v9785_v60  ;;  %v2493_v12 = vmul.bf16 %v10374_v16, %v12452_v32  ;;  %v2226_v38 = vmax.bf16 %v12356_v23, %v2194_v2  ;;  %v2528_v19 = vadd.bf16 %v2496_v20, %v12315_v59  ;;  %s3066_s16 = sand.u32 4294901760, %s10587_s14  ;;  %s3366_s29 = sshrl.u32 %s10674_s28, 16 }
 0x204   : >> { %v2228_v0 = vmax.bf16 %v12356_v23, %v2196_v15  ;;  %v2489_v34 = vmul.bf16 %v10374_v16, %v12319_v48  ;;  %s12671_s16 = smov (%p3061_p2, %s3066_s16), 2143289344  ;;  %s3367_s14 = sand.u32 1, %s3366_s29 }
 0x205   : >> { %5686 = vmatpush1.bf16.msra.mxu0 %v2234_v14  ;;  %5727 = vmatpush1.bf16.msra.mxu1 %v2236_v8  ;;  %v2526_v14 = vadd.bf16 %v2494_v4, %v12314_v26  ;;  %v2490_v8 = vmul.bf16 %v10374_v16, %v12312_v9  ;;  %v2561_v4 = vmax.bf16 %v12356_v23, %v2529_v29  ;;  %v12453_v29 = vld [vmem:[#allocation80_spill] sm:$0xff]  ;;  %s3069_s0 = sshrl.u32 %s12671_s16, 16  ;;  %s3368_s16 = sadd.s32 32767, %s3367_s14 }
 0x206   : >> { %5687 = vmatprep.subr.bf16.mxu0 %v2231_v27  ;;  %5728 = vmatprep.subr.bf16.mxu1 %v2233_v61  ;;  %v2559_v27 = vmax.bf16 %v12356_v23, %v2527_v52  ;;  %v2487_v61 = vmul.bf16 %v10374_v16, %v12318_v3  ;;  %v2523_v2 = vadd.bf16 %v2491_v25, %v12316_v42  ;;  %p3365_p3 = scmp.ne.f32.partialorder %s10674_s28, %s10674_s28  ;;  %s3666_s29 = sadd.f32 7.5, %s9933_s15 }
 0x207   : >> { %v2525_v15 = vadd.bf16 %v2493_v12, %v12317_v36  ;;  %v2560_v20 = vmax.bf16 %v12356_v23, %v2528_v19  ;;  %v2524_v52 = vadd.bf16 %v2492_v18, %v12320_v11  ;;  %v12454_v12 = vld [vmem:[#allocation82_spill] sm:$0xff] }
 0x208   : >> { %v2519_v25 = vadd.bf16 %v2487_v61, %v12453_v29  ;;  %v2555_v19 = vmax.bf16 %v12356_v23, %v2523_v2  ;;  %v12457_v61 = vld [vmem:[#allocation40_spill] sm:$0xff]  ;;  %v12460_v2 = vld [vmem:[#allocation79_spill] sm:$0xff]  ;;  %s10821_s15 = smul.f32 0.03125, %s3666_s29 }
 0x209   : >> { %5688 = vmatpush1.bf16.msra.mxu0 %v2230_v63  ;;  %5729 = vmatpush1.bf16.msra.mxu1 %v2232_v62  ;;  %v2558_v63 = vmax.bf16 %v12356_v23, %v2526_v14  ;;  %v2522_v62 = vadd.bf16 %v2490_v8, %v12323_v40  ;;  %v2521_v14 = vadd.bf16 %v2489_v34, %v12454_v12  ;;  %v12455_v8 = vld [vmem:[#allocation43_spill] sm:$0xff]  ;;  %v12458_v12 = vld [vmem:[#allocation41_spill] sm:$0xff] }
 0x20a   : >> { %5689 = vmatprep.subr.bf16.mxu0 %v2227_v49  ;;  %5730 = vmatprep.subr.bf16.mxu1 %v2229_v30  ;;  %v2486_v49 = vmul.bf16 %v10374_v16, %v12322_v58  ;;  %v2488_v30 = vmul.bf16 %v10374_v16, %v12321_v22  ;;  %v2483_v40 = vmul.bf16 %v10374_v16, %v12455_v8  ;;  %v12456_v58 = vld [vmem:[#allocation18_spill] sm:$0xff]  ;;  %v12461_v8 = vld [vmem:[#allocation23_spill] sm:$0xff]  ;;  %p3669_p4 = scmp.ne.f32.partialorder %s10821_s15, %s10821_s15 }
 0x20b   : >> { %v2557_v18 = vmax.bf16 %v12356_v23, %v2525_v15  ;;  %v2482_v34 = vmul.bf16 %v10374_v16, %v12457_v61  ;;  %v2484_v29 = vmul.bf16 %v10374_v16, %v12458_v12  ;;  %v12462_v12 = vld [vmem:[#allocation19_spill] sm:$0xff] }
 0x20c   : >> { %v2518_v15 = vadd.bf16 %v2486_v49, %v12460_v2  ;;  %v2520_v22 = vadd.bf16 %v2488_v30, %v12461_v8  ;;  %v2515_v61 = vadd.bf16 %v2483_v40, %v12428_v50  ;;  %v12464_v30 = vld [vmem:[#allocation39_spill] sm:$0xff] }
 0x20d   : >> { %5690 = vmatpush1.bf16.msra.mxu0 %v2226_v38  ;;  %5731 = vmatpush1.bf16.msra.mxu1 %v2228_v0  ;;  %v2485_v38 = vmul.bf16 %v10374_v16, %v12456_v58  ;;  %v2554_v0 = vmax.bf16 %v12356_v23, %v2522_v62  ;;  %v2551_v62 = vmax.bf16 %v12356_v23, %v2519_v25 }
 0x20e   : >> { %5757 = vmatprep.subr.bf16.mxu0 %v2559_v27  ;;  %5798 = vmatprep.subr.bf16.mxu1 %v2561_v4  ;;  %v12459_v27 = vld [vmem:[#allocation16_spill] sm:$0xff]  ;;  %v2556_v4 = vmax.bf16 %v12356_v23, %v2524_v52  ;;  %v2553_v58 = vmax.bf16 %v12356_v23, %v2521_v14  ;;  %v12463_v52 = vld [vmem:[#allocation74_spill] sm:$0xff]  ;;  %v2516_v14 = vadd.bf16 %v2484_v29, %v12431_v6  ;;  %v12469_v6 = vld [vmem:[#allocation71_spill] sm:$0xff] }
 0x20f   : >> { %v2479_v49 = vmul.bf16 %v10374_v16, %v12463_v52  ;;  %v2550_v40 = vmax.bf16 %v12356_v23, %v2518_v15  ;;  %v2477_v15 = vmul.bf16 %v10374_v16, %v12469_v6  ;;  %v12474_v52 = vld [vmem:[#allocation65_spill] sm:$0xff] }
 0x210   : >> { %5708 = vmatmul.mubr.bf16.vlgmr.msra.gmra.mxu0 %v12459_v27  ;;  %5749 = vmatmul.mubr.bf16.vlgmr.msra.gmra.mxu1 %v12459_v27  ;;  %v2517_v27 = vadd.bf16 %v2485_v38, %v12462_v12  ;;  %v12467_v12 = vld [vmem:[#allocation73_spill] sm:$0xff]  ;;  %v2474_v6 = vmul.bf16 %v10374_v16, %v12474_v52 }
 0x211   : >> { %5758 = vmatpush1.bf16.msra.mxu0 %v2558_v63  ;;  %5799 = vmatpush1.bf16.msra.mxu1 %v2560_v20  ;;  %v2481_v63 = vmul.bf16 %v10374_v16, %v12464_v30  ;;  %v12465_v20 = vld [vmem:[#allocation42_spill] sm:$0xff]  ;;  %v2480_v50 = vmul.bf16 %v10374_v16, %v12467_v12 }
 0x212   : >> { %5759 = vmatprep.subr.bf16.mxu0 %v2555_v19  ;;  %5800 = vmatprep.subr.bf16.mxu1 %v2557_v18  ;;  %v2514_v25 = vadd.bf16 %v2482_v34, %v12465_v20  ;;  %v2552_v19 = vmax.bf16 %v12356_v23, %v2520_v22  ;;  %v12466_v18 = vld [vmem:[#allocation38_spill] sm:$0xff]  ;;  %v2547_v34 = vmax.bf16 %v12356_v23, %v2515_v61  ;;  %v12473_v61 = vld [vmem:[#allocation75_spill] sm:$0xff] }
 0x213   : >> { %5789 = vmatprep.mubr.bf16.mxu0 %v12356_v23  ;;  %v2478_v38 = vmul.bf16 %v10374_v16, %v12466_v18  ;;  %5830 = vmatprep.mubr.bf16.mxu1 %v12356_v23  ;;  %v12468_v20 = vld [vmem:[#allocation66_spill] sm:$0xff]  ;;  %v2549_v22 = vmax.bf16 %v12356_v23, %v2517_v27  ;;  %v12470_v18 = vld [vmem:[#allocation76_spill] sm:$0xff] }
 0x214   : >> { %v2475_v29 = vmul.bf16 %v10374_v16, %v12468_v20  ;;  %v12471_v8 = vmov %v12470_v18  ;;  %v2511_v30 = vadd.bf16 %v2479_v49, %v12470_v18  ;;  %v12472_v12 = vld [vmem:[#allocation78_spill] sm:$0xff]  ;;  %v2512_v20 = vadd.bf16 %v2480_v50, %v12440_v51 }
 0x215   : >> { %5760 = vmatpush1.bf16.msra.mxu0 %v2554_v0  ;;  %5801 = vmatpush1.bf16.msra.mxu1 %v2556_v4  ;;  %v2513_v2 = vadd.bf16 %v2481_v63, %v12472_v12  ;;  %v2546_v0 = vmax.bf16 %v12356_v23, %v2514_v25  ;;  %v2548_v4 = vmax.bf16 %v12356_v23, %v2516_v14 }
 0x216   : >> { %5761 = vmatprep.subr.bf16.mxu0 %v2551_v62  ;;  %5802 = vmatprep.subr.bf16.mxu1 %v2553_v58  ;;  %v2510_v11 = vadd.bf16 %v2478_v38, %v12473_v61  ;;  %v2476_v58 = vmul.bf16 %v10374_v16, %v12442_v57  ;;  %v2507_v27 = vadd.bf16 %v2475_v29, %v12406_v21 }
 0x217   : >> { %v2509_v62 = vadd.bf16 %v2477_v15, %v12444_v39  ;;  %v2471_v49 = vmul.bf16 %v10374_v16, %v12445_v5  ;;  %v2543_v50 = vmax.bf16 %v12356_v23, %v2511_v30  ;;  %v2545_v63 = vmax.bf16 %v12356_v23, %v2513_v2  ;;  %v12475_v15 = vld [vmem:[#allocation37_spill] sm:$0xff] }
 0x218   : >> { %v2473_v25 = vmul.bf16 %v10374_v16, %v12446_v37  ;;  %v2470_v14 = vmul.bf16 %v10374_v16, %v12375_v56  ;;  %v2544_v18 = vmax.bf16 %v12356_v23, %v2512_v20  ;;  %v2506_v38 = vadd.bf16 %v2474_v6, %v12409_v28  ;;  %v12477_v56 = vld [vmem:[#allocation54_spill] sm:$0xff]  ;;  %v12478_v20 = vld [vmem:[#allocation57_spill] sm:$0xff] }
 0x219   : >> { %5762 = vmatpush1.bf16.msra.mxu0 %v2550_v40  ;;  %5803 = vmatpush1.bf16.msra.mxu1 %v2552_v19  ;;  %v2472_v40 = vmul.bf16 %v10374_v16, %v12412_v45  ;;  %v2542_v19 = vmax.bf16 %v12356_v23, %v2510_v11  ;;  %v2508_v30 = vadd.bf16 %v2476_v58, %v12448_v47  ;;  %v10524_v28 = vstv %s2767_s1  ;;  %s3070_s1 = sshll.u32 %s3069_s0, 16 }
 0x21a   : >> { %5763 = vmatprep.subr.bf16.mxu0 %v2547_v34  ;;  %5804 = vmatprep.subr.bf16.mxu1 %v2549_v22  ;;  %v2539_v2 = vmax.bf16 %v12356_v23, %v2507_v27  ;;  %v2541_v34 = vmax.bf16 %v12356_v23, %v2509_v62  ;;  %v2503_v29 = vadd.bf16 %v2471_v49, %v12413_v44  ;;  %s3071_s26 = sor.u32 %s3070_s1, %s3069_s0  ;;  %s10731_s0 = sadd.s32 %s3368_s16, %s10674_s28 }
 0x21b   : >> { %v12476_v22 = vmov %v12475_v15  ;;  %v2505_v45 = vadd.bf16 %v2473_v25, %v12475_v15  ;;  %v2467_v11 = vmul.bf16 %v10374_v16, %v12477_v56  ;;  %v12479_v39 = vmov %v12478_v20  ;;  %s3370_s1 = sand.u32 4294901760, %s10731_s0  ;;  %s3670_s16 = sshrl.u32 %s10821_s15, 16 }
 0x21c   : >> { %v2469_v6 = vmul.bf16 %v10374_v16, %v12478_v20  ;;  %v2538_v58 = vmax.bf16 %v12356_v23, %v2506_v38  ;;  %v2540_v27 = vmax.bf16 %v12356_v23, %v2508_v30  ;;  %v2466_v62 = vmul.bf16 %v10374_v16, %v12451_v24  ;;  %s12673_s1 = smov (%p3365_p3, %s3370_s1), 2143289344  ;;  %s10853_s0 = sand.u32 1, %s3670_s16 }
 0x21d   : >> { %5764 = vmatpush1.bf16.msra.mxu0 %v2546_v0  ;;  %5805 = vmatpush1.bf16.msra.mxu1 %v2548_v4  ;;  %v2502_v0 = vadd.bf16 %v2470_v14, %v12449_v55  ;;  %v2504_v4 = vadd.bf16 %v2472_v40, %v12383_v54  ;;  %v2468_v49 = vmul.bf16 %v10374_v16, %v12388_v43  ;;  %s3373_s9 = sshrl.u32 %s12673_s1, 16  ;;  %s3672_s1 = sadd.s32 32767, %s10853_s0 }
 0x21e   : >> { %5765 = vmatprep.subr.bf16.mxu0 %v2543_v50  ;;  %5806 = vmatprep.subr.bf16.mxu1 %v2545_v63  ;;  %v2535_v50 = vmax.bf16 %v12356_v23, %v2503_v29  ;;  %v2799_v63 = vmul.bf16 %v10524_v28, %v9826_v53  ;;  %v2801_v25 = vmul.bf16 %v10524_v28, %v12311_v13 }
 0x21f   : >> { %v2537_v14 = vmax.bf16 %v12356_v23, %v2505_v45  ;;  %v2499_v40 = vadd.bf16 %v2467_v11, %v12384_v31  ;;  %v2501_v38 = vadd.bf16 %v2469_v6, %v12421_v17  ;;  %v2534_v16 = vmax.bf16 %v12356_v23, %v2502_v0 }
 0x220   : >> { %v2500_v30 = vadd.bf16 %v2468_v49, %v12391_v7  ;;  %v2798_v29 = vmul.bf16 %v10524_v28, %v12423_v46  ;;  %v2831_v45 = vadd.bf16 %v2799_v63, %v12310_v1  ;;  %v2795_v15 = vmul.bf16 %v10524_v28, %v9785_v60 }
 0x221   : >> { %5766 = vmatpush1.bf16.msra.mxu0 %v2542_v19  ;;  %5807 = vmatpush1.bf16.msra.mxu1 %v2544_v18  ;;  %v2536_v19 = vmax.bf16 %v12356_v23, %v2504_v4  ;;  %v2498_v18 = vadd.bf16 %v2466_v62, %v12422_v10  ;;  %v2531_v11 = vmax.bf16 %v12356_v23, %v2499_v40 }
 0x222   : >> { %5767 = vmatprep.subr.bf16.mxu0 %v2539_v2  ;;  %5808 = vmatprep.subr.bf16.mxu1 %v2541_v34  ;;  %v2800_v2 = vmul.bf16 %v10524_v28, %v12308_v35  ;;  %v2833_v34 = vadd.bf16 %v2801_v25, %v12309_v33  ;;  %v2533_v20 = vmax.bf16 %v12356_v23, %v2501_v38 }
 0x223   : >> { %v2797_v6 = vmul.bf16 %v10524_v28, %v12452_v32  ;;  %v2794_v0 = vmul.bf16 %v10524_v28, %v12312_v9  ;;  %v2796_v4 = vmul.bf16 %v10524_v28, %v12313_v41  ;;  %v2830_v62 = vadd.bf16 %v2798_v29, %v12314_v26 }
 0x224   : >> { %v2832_v49 = vadd.bf16 %v2800_v2, %v12315_v59  ;;  %v2865_v63 = vmax.bf16 %v12356_v23, %v2833_v34  ;;  %v2827_v25 = vadd.bf16 %v2795_v15, %v12316_v42  ;;  %v2791_v40 = vmul.bf16 %v10524_v28, %v12318_v3  ;;  %v12482_v2 = vld [vmem:[#allocation21_spill] sm:$0xff]  ;;  %v12483_v34 = vld [vmem:[#allocation20_spill] sm:$0xff] }
 0x225   : >> { %5768 = vmatpush1.bf16.msra.mxu0 %v2538_v58  ;;  %5809 = vmatpush1.bf16.msra.mxu1 %v2540_v27  ;;  %v2530_v58 = vmax.bf16 %v12356_v23, %v2498_v18  ;;  %v2532_v27 = vmax.bf16 %v12356_v23, %v2500_v30  ;;  %v2793_v38 = vmul.bf16 %v10524_v28, %v12319_v48  ;;  %v12481_v18 = vld [vmem:[#allocation47_spill] sm:$0xff]  ;;  %v12489_v48 = vld [vmem:[#allocation16_spill] sm:$0xff] }
 0x226   : >> { %5769 = vmatprep.subr.bf16.mxu0 %v2535_v50  ;;  %5810 = vmatprep.subr.bf16.mxu1 %v2537_v14  ;;  %v2863_v50 = vmax.bf16 %v12356_v23, %v2831_v45  ;;  %v2829_v14 = vadd.bf16 %v2797_v6, %v12317_v36  ;;  %v2828_v30 = vadd.bf16 %v2796_v4, %v12481_v18  ;;  %v12485_v4 = vld [vmem:[#allocation18_spill] sm:$0xff] }
 0x227   : >> { %v2862_v29 = vmax.bf16 %v12356_v23, %v2830_v62  ;;  %v2790_v45 = vmul.bf16 %v10524_v28, %v12482_v2  ;;  %v2792_v15 = vmul.bf16 %v10524_v28, %v12483_v34  ;;  %v2864_v6 = vmax.bf16 %v12356_v23, %v2832_v49  ;;  %v12486_v34 = vld [vmem:[#allocation80_spill] sm:$0xff] }
 0x228   : >> { %v2789_v62 = vmul.bf16 %v10524_v28, %v12485_v4  ;;  %v2861_v18 = vmax.bf16 %v12356_v23, %v2829_v14  ;;  %v2823_v2 = vadd.bf16 %v2791_v40, %v12486_v34  ;;  %v12488_v49 = vld [vmem:[#allocation40_spill] sm:$0xff]  ;;  %v12491_v14 = vld [vmem:[#allocation23_spill] sm:$0xff]  ;;  %v12495_v34 = vld [vmem:[#allocation74_spill] sm:$0xff] }
 0x229   : >> { %5770 = vmatpush1.bf16.msra.mxu0 %v2534_v16  ;;  %5811 = vmatpush1.bf16.msra.mxu1 %v2536_v19  ;;  %v12480_v16 = vld [vmem:[#allocation31_spill] sm:$0xff]  ;;  %v2824_v40 = vadd.bf16 %v2792_v15, %v12491_v14  ;;  %v2783_v3 = vmul.bf16 %v10524_v28, %v12495_v34 }
 0x22a   : >> { %5771 = vmatprep.subr.bf16.mxu0 %v2531_v11  ;;  %5812 = vmatprep.subr.bf16.mxu1 %v2533_v20  ;;  %v2826_v19 = vadd.bf16 %v2794_v0, %v12480_v16  ;;  %v12484_v11 = vld [vmem:[#allocation43_spill] sm:$0xff]  ;;  %v2859_v0 = vmax.bf16 %v12356_v23, %v2827_v25  ;;  %v12487_v16 = vld [vmem:[#allocation82_spill] sm:$0xff]  ;;  %v2786_v25 = vmul.bf16 %v10524_v28, %v12488_v49 }
 0x22b   : >> { %v2787_v20 = vmul.bf16 %v10524_v28, %v12484_v11  ;;  %v2825_v11 = vadd.bf16 %v2793_v38, %v12487_v16  ;;  %v12492_v38 = vld [vmem:[#allocation45_spill] sm:$0xff]  ;;  %v12502_v34 = vld [vmem:[#allocation71_spill] sm:$0xff] }
 0x22c   : >> { %v12494_v16 = vld [vmem:[#allocation41_spill] sm:$0xff]  ;;  %v12503_v14 = vmov %v12502_v34 }
 0x22d   : >> { %5772 = vmatpush1.bf16.msra.mxu0 %v2530_v58  ;;  %5813 = vmatpush1.bf16.msra.mxu1 %v2532_v27  ;;  %v2858_v58 = vmax.bf16 %v12356_v23, %v2826_v19  ;;  %v2860_v27 = vmax.bf16 %v12356_v23, %v2828_v30  ;;  %v2819_v4 = vadd.bf16 %v2787_v20, %v12492_v38  ;;  %v12493_v19 = vld [vmem:[#allocation19_spill] sm:$0xff] }
 0x22e   : >> { %5839 = vmatprep.subr.bf16.mxu0 %v2863_v50  ;;  %5880 = vmatprep.subr.bf16.mxu1 %v2865_v63  ;;  %v12490_v50 = vld [vmem:[#allocation79_spill] sm:$0xff]  ;;  %v2821_v30 = vadd.bf16 %v2789_v62, %v12493_v19  ;;  %v2788_v49 = vmul.bf16 %v10524_v28, %v12494_v16  ;;  %v2815_v38 = vadd.bf16 %v2783_v3, %v12471_v8 }
 0x22f   : >> { %v2822_v63 = vadd.bf16 %v2790_v45, %v12490_v50  ;;  %v2857_v45 = vmax.bf16 %v12356_v23, %v2825_v11  ;;  %v12496_v50 = vld [vmem:[#allocation39_spill] sm:$0xff]  ;;  %v2851_v11 = vmax.bf16 %v12356_v23, %v2819_v4  ;;  %v2781_v4 = vmul.bf16 %v10524_v28, %v12502_v34 }
 0x230   : >> { %5790 = vmatmul.mubr.bf16.vlgmr.msra.gmra.mxu0 %v12489_v48  ;;  %5831 = vmatmul.mubr.bf16.vlgmr.msra.gmra.mxu1 %v12489_v48  ;;  %v2855_v48 = vmax.bf16 %v12356_v23, %v2823_v2  ;;  %v2785_v15 = vmul.bf16 %v10524_v28, %v12496_v50  ;;  %v2856_v2 = vmax.bf16 %v12356_v23, %v2824_v40 }
 0x231   : >> { %5840 = vmatpush1.bf16.msra.mxu0 %v2862_v29  ;;  %5881 = vmatpush1.bf16.msra.mxu1 %v2864_v6  ;;  %v12497_v29 = vld [vmem:[#allocation42_spill] sm:$0xff]  ;;  %v2778_v3 = vmul.bf16 %v10524_v28, %v12474_v52 }
 0x232   : >> { %5841 = vmatprep.subr.bf16.mxu0 %v2859_v0  ;;  %5882 = vmatprep.subr.bf16.mxu1 %v2861_v18  ;;  %v2818_v20 = vadd.bf16 %v2786_v25, %v12497_v29  ;;  %v12498_v6 = vld [vmem:[#allocation38_spill] sm:$0xff]  ;;  %v2854_v18 = vmax.bf16 %v12356_v23, %v2822_v63  ;;  %v12499_v0 = vld [vmem:[#allocation73_spill] sm:$0xff]  ;;  %v2853_v25 = vmax.bf16 %v12356_v23, %v2821_v30  ;;  %v12500_v29 = vld [vmem:[#allocation44_spill] sm:$0xff] }
 0x233   : >> { %v2782_v62 = vmul.bf16 %v10524_v28, %v12498_v6  ;;  %5871 = vmatprep.mubr.bf16.mxu0 %v12356_v23  ;;  %5912 = vmatprep.mubr.bf16.mxu1 %v12356_v23  ;;  %v2784_v19 = vmul.bf16 %v10524_v28, %v12499_v0  ;;  %v2820_v6 = vadd.bf16 %v2788_v49, %v12500_v29  ;;  %v12501_v63 = vld [vmem:[#allocation66_spill] sm:$0xff] }
 0x234   : >> { %v2817_v50 = vadd.bf16 %v2785_v15, %v12472_v12  ;;  %v2779_v40 = vmul.bf16 %v10524_v28, %v12501_v63  ;;  %v2775_v30 = vmul.bf16 %v10524_v28, %v12445_v5  ;;  %v2777_v15 = vmul.bf16 %v10524_v28, %v12446_v37 }
 0x235   : >> { %5842 = vmatpush1.bf16.msra.mxu0 %v2858_v58  ;;  %5883 = vmatpush1.bf16.msra.mxu1 %v2860_v27  ;;  %v2850_v58 = vmax.bf16 %v12356_v23, %v2818_v20  ;;  %v2814_v27 = vadd.bf16 %v2782_v62, %v12473_v61  ;;  %v2816_v49 = vadd.bf16 %v2784_v19, %v12440_v51  ;;  %v12504_v62 = vld [vmem:[#allocation72_spill] sm:$0xff] }
 0x236   : >> { %5843 = vmatprep.subr.bf16.mxu0 %v2855_v48  ;;  %5884 = vmatprep.subr.bf16.mxu1 %v2857_v45  ;;  %v2780_v48 = vmul.bf16 %v10524_v28, %v12442_v57  ;;  %v2852_v34 = vmax.bf16 %v12356_v23, %v2820_v6  ;;  %v2847_v45 = vmax.bf16 %v12356_v23, %v2815_v38  ;;  %v12508_v61 = vld [vmem:[#allocation68_spill] sm:$0xff] }
 0x237   : >> { %v2849_v19 = vmax.bf16 %v12356_v23, %v2817_v50  ;;  %v2811_v20 = vadd.bf16 %v2779_v40, %v12406_v21  ;;  %v12505_v51 = vmov %v12504_v62  ;;  %v2813_v57 = vadd.bf16 %v2781_v4, %v12504_v62 }
 0x238   : >> { %v2848_v38 = vmax.bf16 %v12356_v23, %v2816_v49  ;;  %v2810_v52 = vadd.bf16 %v2778_v3, %v12508_v61  ;;  %v2812_v37 = vadd.bf16 %v2780_v48, %v12448_v47  ;;  %v2809_v50 = vadd.bf16 %v2777_v15, %v12476_v22 }
 0x239   : >> { %5844 = vmatpush1.bf16.msra.mxu0 %v2854_v18  ;;  %5885 = vmatpush1.bf16.msra.mxu1 %v2856_v2  ;;  %v2846_v18 = vmax.bf16 %v12356_v23, %v2814_v27  ;;  %v12506_v2 = vld [vmem:[#allocation59_spill] sm:$0xff]  ;;  %v2771_v4 = vmul.bf16 %v10524_v28, %v12477_v56  ;;  %v2843_v27 = vmax.bf16 %v12356_v23, %v2811_v20 }
 0x23a   : >> { %5845 = vmatprep.subr.bf16.mxu0 %v2851_v11  ;;  %5886 = vmatprep.subr.bf16.mxu1 %v2853_v25  ;;  %v12507_v5 = vmov %v12506_v2  ;;  %v2774_v6 = vmul.bf16 %v10524_v28, %v12506_v2  ;;  %v2807_v11 = vadd.bf16 %v2775_v30, %v12413_v44  ;;  %v12509_v25 = vld [vmem:[#allocation61_spill] sm:$0xff]  ;;  %v2845_v49 = vmax.bf16 %v12356_v23, %v2813_v57 }
 0x23b   : >> { %v2776_v40 = vmul.bf16 %v10524_v28, %v12509_v25  ;;  %v2773_v3 = vmul.bf16 %v10524_v28, %v12479_v39  ;;  %v2770_v48 = vmul.bf16 %v10524_v28, %v12451_v24  ;;  %v10679_v30 = vstv %s3071_s26  ;;  %s3374_s26 = sshll.u32 %s3373_s9, 16 }
 0x23c   : >> { %v2839_v15 = vmax.bf16 %v12356_v23, %v2807_v11  ;;  %v2772_v57 = vmul.bf16 %v10524_v28, %v12388_v43  ;;  %v2803_v62 = vadd.bf16 %v2771_v4, %v12384_v31  ;;  %v3104_v11 = vmul.bf16 %v10679_v30, %v12308_v35  ;;  %s3375_s14 = sor.u32 %s3374_s26, %s3373_s9  ;;  %s3673_s9 = sadd.s32 %s3672_s1, %s10821_s15 }
 0x23d   : >> { %5846 = vmatpush1.bf16.msra.mxu0 %v2850_v58  ;;  %5887 = vmatpush1.bf16.msra.mxu1 %v2852_v34  ;;  %v2806_v58 = vadd.bf16 %v2774_v6, %v12449_v55  ;;  %v2842_v34 = vmax.bf16 %v12356_v23, %v2810_v52  ;;  %v2808_v20 = vadd.bf16 %v2776_v40, %v12383_v54  ;;  %s3674_s26 = sand.u32 4294901760, %s3673_s9 }
 0x23e   : >> { %5847 = vmatprep.subr.bf16.mxu0 %v2847_v45  ;;  %5888 = vmatprep.subr.bf16.mxu1 %v2849_v19  ;;  %v2844_v45 = vmax.bf16 %v12356_v23, %v2812_v37  ;;  %v2841_v19 = vmax.bf16 %v12356_v23, %v2809_v50  ;;  %v2805_v2 = vadd.bf16 %v2773_v3, %v12421_v17  ;;  %s12675_s26 = smov (%p3669_p4, %s3674_s26), 2143289344 }
 0x23f   : >> { %v3103_v37 = vmul.bf16 %v10679_v30, %v9826_v53  ;;  %v3105_v52 = vmul.bf16 %v10679_v30, %v12311_v13  ;;  %v2838_v28 = vmax.bf16 %v12356_v23, %v2806_v58  ;;  %v2804_v6 = vadd.bf16 %v2772_v57, %v12391_v7  ;;  %s3677_s29 = sshrl.u32 %s12675_s26, 16 }
 0x240   : >> { %v3099_v50 = vmul.bf16 %v10679_v30, %v9785_v60  ;;  %v2840_v40 = vmax.bf16 %v12356_v23, %v2808_v20  ;;  %v2835_v4 = vmax.bf16 %v12356_v23, %v2803_v62  ;;  %v3136_v20 = vadd.bf16 %v3104_v11, %v12315_v59 }
 0x241   : >> { %5848 = vmatpush1.bf16.msra.mxu0 %v2846_v18  ;;  %5889 = vmatpush1.bf16.msra.mxu1 %v2848_v38  ;;  %v2802_v18 = vadd.bf16 %v2770_v48, %v12422_v10  ;;  %v3102_v38 = vmul.bf16 %v10679_v30, %v12423_v46  ;;  %v3135_v3 = vadd.bf16 %v3103_v37, %v12310_v1 }
 0x242   : >> { %5849 = vmatprep.subr.bf16.mxu0 %v2843_v27  ;;  %5890 = vmatprep.subr.bf16.mxu1 %v2845_v49  ;;  %v3101_v27 = vmul.bf16 %v10679_v30, %v12452_v32  ;;  %v2837_v49 = vmax.bf16 %v12356_v23, %v2805_v2  ;;  %v3137_v58 = vadd.bf16 %v3105_v52, %v12309_v33  ;;  %v12510_v2 = vld [vmem:[#allocation22_spill] sm:$0xff] }
 0x243   : >> { %v2834_v48 = vmax.bf16 %v12356_v23, %v2802_v18  ;;  %v3134_v57 = vadd.bf16 %v3102_v38, %v12314_v26  ;;  %v3100_v62 = vmul.bf16 %v10679_v30, %v12313_v41  ;;  %v3095_v37 = vmul.bf16 %v10679_v30, %v12510_v2  ;;  %v12519_v2 = vld [vmem:[#allocation18_spill] sm:$0xff] }
 0x244   : >> { %v3167_v52 = vmax.bf16 %v12356_v23, %v3135_v3  ;;  %v3169_v18 = vmax.bf16 %v12356_v23, %v3137_v58  ;;  %v12514_v3 = vld [vmem:[#allocation20_spill] sm:$0xff] }
 0x245   : >> { %5850 = vmatpush1.bf16.msra.mxu0 %v2842_v34  ;;  %5891 = vmatpush1.bf16.msra.mxu1 %v2844_v45  ;;  %v3098_v34 = vmul.bf16 %v10679_v30, %v12312_v9  ;;  %v2836_v45 = vmax.bf16 %v12356_v23, %v2804_v6  ;;  %v12511_v6 = vld [vmem:[#allocation81_spill] sm:$0xff]  ;;  %v3096_v58 = vmul.bf16 %v10679_v30, %v12514_v3 }
 0x246   : >> { %5851 = vmatprep.subr.bf16.mxu0 %v2839_v15  ;;  %5892 = vmatprep.subr.bf16.mxu1 %v2841_v19  ;;  %v3131_v15 = vadd.bf16 %v3099_v50, %v12316_v42  ;;  %v3133_v19 = vadd.bf16 %v3101_v27, %v12317_v36  ;;  %v3097_v38 = vmul.bf16 %v10679_v30, %v12511_v6  ;;  %v12513_v50 = vld [vmem:[#allocation21_spill] sm:$0xff]  ;;  %v12516_v42 = vld [vmem:[#allocation80_spill] sm:$0xff] }
 0x247   : >> { %v3166_v27 = vmax.bf16 %v12356_v23, %v3134_v57  ;;  %v12517_v57 = vld [vmem:[#allocation82_spill] sm:$0xff] }
 0x248   : >> { %v3165_v36 = vmax.bf16 %v12356_v23, %v3133_v19  ;;  %v3129_v6 = vadd.bf16 %v3097_v38, %v12517_v57  ;;  %v12520_v19 = vld [vmem:[#allocation79_spill] sm:$0xff]  ;;  %v12524_v57 = vld [vmem:[#allocation74_spill] sm:$0xff] }
 0x249   : >> { %5852 = vmatpush1.bf16.msra.mxu0 %v2838_v28  ;;  %5893 = vmatpush1.bf16.msra.mxu1 %v2840_v40  ;;  %v12512_v28 = vld [vmem:[#allocation31_spill] sm:$0xff]  ;;  %v3094_v40 = vmul.bf16 %v10679_v30, %v12513_v50  ;;  %v3127_v50 = vadd.bf16 %v3095_v37, %v12516_v42  ;;  %v12521_v37 = vld [vmem:[#allocation40_spill] sm:$0xff] }
 0x24a   : >> { %5853 = vmatprep.subr.bf16.mxu0 %v2835_v4  ;;  %5894 = vmatprep.subr.bf16.mxu1 %v2837_v49  ;;  %v3130_v11 = vadd.bf16 %v3098_v34, %v12512_v28  ;;  %v3168_v4 = vmax.bf16 %v12356_v23, %v3136_v20  ;;  %v3163_v49 = vmax.bf16 %v12356_v23, %v3131_v15  ;;  %v12515_v34 = vld [vmem:[#allocation47_spill] sm:$0xff] }
 0x24b   : >> { %v3132_v28 = vadd.bf16 %v3100_v62, %v12515_v34  ;;  %v12518_v20 = vld [vmem:[#allocation43_spill] sm:$0xff]  ;;  %v3126_v62 = vadd.bf16 %v3094_v40, %v12520_v19  ;;  %v3090_v3 = vmul.bf16 %v10679_v30, %v12521_v37  ;;  %v3159_v40 = vmax.bf16 %v12356_v23, %v3127_v50 }
 0x24c   : >> { %v3091_v15 = vmul.bf16 %v10679_v30, %v12518_v20  ;;  %v3092_v20 = vmul.bf16 %v10679_v30, %v12494_v16  ;;  %v12525_v19 = vld [vmem:[#allocation39_spill] sm:$0xff] }
 0x24d   : >> { %5854 = vmatpush1.bf16.msra.mxu0 %v2834_v48  ;;  %5895 = vmatpush1.bf16.msra.mxu1 %v2836_v45  ;;  %v3093_v48 = vmul.bf16 %v10679_v30, %v12519_v2  ;;  %v3162_v45 = vmax.bf16 %v12356_v23, %v3130_v11  ;;  %v3087_v2 = vmul.bf16 %v10679_v30, %v12524_v57  ;;  %v12527_v57 = vld [vmem:[#allocation19_spill] sm:$0xff] }
 0x24e   : >> { %5921 = vmatprep.subr.bf16.mxu0 %v3167_v52  ;;  %5962 = vmatprep.subr.bf16.mxu1 %v3169_v18  ;;  %v12522_v52 = vld [vmem:[#allocation16_spill] sm:$0xff]  ;;  %v12523_v18 = vld [vmem:[#allocation23_spill] sm:$0xff]  ;;  %v3164_v11 = vmax.bf16 %v12356_v23, %v3132_v28  ;;  %v3089_v37 = vmul.bf16 %v10679_v30, %v12525_v19  ;;  %v12528_v28 = vld [vmem:[#allocation42_spill] sm:$0xff] }
 0x24f   : >> { %v3128_v38 = vadd.bf16 %v3096_v58, %v12523_v18  ;;  %v3161_v58 = vmax.bf16 %v12356_v23, %v3129_v6  ;;  %v12526_v18 = vld [vmem:[#allocation45_spill] sm:$0xff]  ;;  %v3122_v16 = vadd.bf16 %v3090_v3, %v12528_v28  ;;  %v12529_v6 = vld [vmem:[#allocation38_spill] sm:$0xff]  ;;  %v3088_v3 = vmul.bf16 %v10679_v30, %v12499_v0 }
 0x250   : >> { %5872 = vmatmul.mubr.bf16.vlgmr.msra.gmra.mxu0 %v12522_v52  ;;  %5913 = vmatmul.mubr.bf16.vlgmr.msra.gmra.mxu1 %v12522_v52  ;;  %v3123_v52 = vadd.bf16 %v3091_v15, %v12526_v18  ;;  %v3086_v19 = vmul.bf16 %v10679_v30, %v12529_v6  ;;  %v3121_v15 = vadd.bf16 %v3089_v37, %v12472_v12  ;;  %v12530_v37 = vld [vmem:[#allocation65_spill] sm:$0xff] }
 0x251   : >> { %5922 = vmatpush1.bf16.msra.mxu0 %v3166_v27  ;;  %5963 = vmatpush1.bf16.msra.mxu1 %v3168_v4  ;;  %v3125_v27 = vadd.bf16 %v3093_v48, %v12527_v57  ;;  %v3158_v4 = vmax.bf16 %v12356_v23, %v3126_v62  ;;  %v3160_v50 = vmax.bf16 %v12356_v23, %v3128_v38 }
 0x252   : >> { %5923 = vmatprep.subr.bf16.mxu0 %v3163_v49  ;;  %5964 = vmatprep.subr.bf16.mxu1 %v3165_v36  ;;  %v3124_v49 = vadd.bf16 %v3092_v20, %v12500_v29  ;;  %v3119_v36 = vadd.bf16 %v3087_v2, %v12471_v8  ;;  %v3083_v48 = vmul.bf16 %v10679_v30, %v12501_v63  ;;  %v12531_v8 = vld [vmem:[#allocation75_spill] sm:$0xff] }
 0x253   : >> { %5953 = vmatprep.mubr.bf16.mxu0 %v12356_v23  ;;  %5994 = vmatprep.mubr.bf16.mxu1 %v12356_v23  ;;  %v3155_v20 = vmax.bf16 %v12356_v23, %v3123_v52  ;;  %v3157_v2 = vmax.bf16 %v12356_v23, %v3125_v27  ;;  %v3154_v62 = vmax.bf16 %v12356_v23, %v3122_v16  ;;  %v12533_v27 = vld [vmem:[#allocation77_spill] sm:$0xff] }
 0x254   : >> { %v3082_v38 = vmul.bf16 %v10679_v30, %v12530_v37  ;;  %v3151_v12 = vmax.bf16 %v12356_v23, %v3119_v36  ;;  %v3153_v52 = vmax.bf16 %v12356_v23, %v3121_v15  ;;  %v3115_v16 = vadd.bf16 %v3083_v48, %v12406_v21  ;;  %v12534_v36 = vld [vmem:[#allocation60_spill] sm:$0xff] }
 0x255   : >> { %5924 = vmatpush1.bf16.msra.mxu0 %v3162_v45  ;;  %5965 = vmatpush1.bf16.msra.mxu1 %v3164_v11  ;;  %v3085_v45 = vmul.bf16 %v10679_v30, %v12503_v14  ;;  %v3156_v11 = vmax.bf16 %v12356_v23, %v3124_v49  ;;  %v3120_v14 = vadd.bf16 %v3088_v3, %v12533_v27  ;;  %v12535_v37 = vld [vmem:[#allocation64_spill] sm:$0xff] }
 0x256   : >> { %5925 = vmatprep.subr.bf16.mxu0 %v3159_v40  ;;  %5966 = vmatprep.subr.bf16.mxu1 %v3161_v58  ;;  %v3118_v40 = vadd.bf16 %v3086_v19, %v12531_v8  ;;  %v12532_v58 = vld [vmem:[#allocation67_spill] sm:$0xff]  ;;  %v3079_v19 = vmul.bf16 %v10679_v30, %v12534_v36  ;;  %v3080_v48 = vmul.bf16 %v10679_v30, %v12509_v25 }
 0x257   : >> { %v3084_v63 = vmul.bf16 %v10679_v30, %v12532_v58  ;;  %v3117_v49 = vadd.bf16 %v3085_v45, %v12505_v51  ;;  %v3081_v58 = vmul.bf16 %v10679_v30, %v12535_v37  ;;  %v3147_v45 = vmax.bf16 %v12356_v23, %v3115_v16 }
 0x258   : >> { %v3150_v15 = vmax.bf16 %v12356_v23, %v3118_v40  ;;  %v3111_v40 = vadd.bf16 %v3079_v19, %v12413_v44 }
 0x259   : >> { %5926 = vmatpush1.bf16.msra.mxu0 %v3158_v4  ;;  %5967 = vmatpush1.bf16.msra.mxu1 %v3160_v50  ;;  %v3114_v4 = vadd.bf16 %v3082_v38, %v12508_v61  ;;  %v3078_v50 = vmul.bf16 %v10679_v30, %v12507_v5  ;;  %v3116_v3 = vadd.bf16 %v3084_v63, %v12448_v47 }
 0x25a   : >> { %5927 = vmatprep.subr.bf16.mxu0 %v3155_v20  ;;  %5968 = vmatprep.subr.bf16.mxu1 %v3157_v2  ;;  %v3075_v20 = vmul.bf16 %v10679_v30, %v12477_v56  ;;  %v3152_v2 = vmax.bf16 %v12356_v23, %v3120_v14  ;;  %v3077_v38 = vmul.bf16 %v10679_v30, %v12479_v39 }
 0x25b   : >> { %v3149_v63 = vmax.bf16 %v12356_v23, %v3117_v49  ;;  %v3113_v47 = vadd.bf16 %v3081_v58, %v12476_v22  ;;  %v3146_v14 = vmax.bf16 %v12356_v23, %v3114_v4  ;;  %v3148_v16 = vmax.bf16 %v12356_v23, %v3116_v3 }
 0x25c   : >> { %v3112_v39 = vadd.bf16 %v3080_v48, %v12383_v54  ;;  %v3109_v49 = vadd.bf16 %v3077_v38, %v12421_v17  ;;  %v3076_v58 = vmul.bf16 %v10679_v30, %v12388_v43  ;;  %v3143_v4 = vmax.bf16 %v12356_v23, %v3111_v40 }
 0x25d   : >> { %5928 = vmatpush1.bf16.msra.mxu0 %v3154_v62  ;;  %5969 = vmatpush1.bf16.msra.mxu1 %v3156_v11  ;;  %v10826_v62 = vstv %s3375_s14  ;;  %v3110_v11 = vadd.bf16 %v3078_v50, %v12449_v55  ;;  %v3145_v50 = vmax.bf16 %v12356_v23, %v3113_v47  ;;  %s3678_s14 = sshll.u32 %s3677_s29, 16 }
 0x25e   : >> { %5929 = vmatprep.subr.bf16.mxu0 %v3151_v12  ;;  %5970 = vmatprep.subr.bf16.mxu1 %v3153_v52  ;;  %v3107_v12 = vadd.bf16 %v3075_v20, %v12384_v31  ;;  %v3074_v52 = vmul.bf16 %v10679_v30, %v12451_v24  ;;  %v3407_v19 = vmul.bf16 %v10826_v62, %v9826_v53  ;;  %s3679_s16 = sor.u32 %s3678_s14, %s3677_s29 }
 0x25f   : >> { %v3409_v3 = vmul.bf16 %v10826_v62, %v12311_v13  ;;  %v3406_v48 = vmul.bf16 %v10826_v62, %v12423_v46  ;;  %v3144_v30 = vmax.bf16 %v12356_v23, %v3112_v39  ;;  %v3141_v47 = vmax.bf16 %v12356_v23, %v3109_v49 }
 0x260   : >> { %v3139_v20 = vmax.bf16 %v12356_v23, %v3107_v12  ;;  %v3108_v38 = vadd.bf16 %v3076_v58, %v12391_v7  ;;  %v3403_v40 = vmul.bf16 %v10826_v62, %v9785_v60  ;;  %v3404_v49 = vmul.bf16 %v10826_v62, %v12313_v41  ;;  %v12536_v58 = vld [vmem:[#allocation22_spill] sm:$0xff] }
 0x261   : >> { %5930 = vmatpush1.bf16.msra.mxu0 %v3150_v15  ;;  %5971 = vmatpush1.bf16.msra.mxu1 %v3152_v2  ;;  %v3142_v15 = vmax.bf16 %v12356_v23, %v3110_v11  ;;  %v3106_v2 = vadd.bf16 %v3074_v52, %v12422_v10  ;;  %v3441_v39 = vadd.bf16 %v3409_v3, %v12309_v33  ;;  %v12537_v3 = vld [vmem:[#allocation81_spill] sm:$0xff] }
 0x262   : >> { %5931 = vmatprep.subr.bf16.mxu0 %v3147_v45  ;;  %5972 = vmatprep.subr.bf16.mxu1 %v3149_v63  ;;  %v3408_v45 = vmul.bf16 %v10826_v62, %v12308_v35  ;;  %v3439_v63 = vadd.bf16 %v3407_v19, %v12310_v1  ;;  %v3405_v11 = vmul.bf16 %v10826_v62, %v12452_v32 }
 0x263   : >> { %v3438_v12 = vadd.bf16 %v3406_v48, %v12314_v26  ;;  %v3399_v19 = vmul.bf16 %v10826_v62, %v12536_v58  ;;  %v3401_v48 = vmul.bf16 %v10826_v62, %v12537_v3  ;;  %v12539_v26 = vld [vmem:[#allocation49_spill] sm:$0xff] }
 0x264   : >> { %v3440_v52 = vadd.bf16 %v3408_v45, %v12315_v59  ;;  %v12538_v45 = vld [vmem:[#allocation32_spill] sm:$0xff]  ;;  %v3437_v41 = vadd.bf16 %v3405_v11, %v12539_v26  ;;  %v12541_v3 = vld [vmem:[#allocation21_spill] sm:$0xff] }
 0x265   : >> { %5932 = vmatpush1.bf16.msra.mxu0 %v3146_v14  ;;  %5973 = vmatpush1.bf16.msra.mxu1 %v3148_v16  ;;  %v3402_v14 = vmul.bf16 %v10826_v62, %v12312_v9  ;;  %v3138_v16 = vmax.bf16 %v12356_v23, %v3106_v2  ;;  %v3473_v2 = vmax.bf16 %v12356_v23, %v3441_v39 }
 0x266   : >> { %5933 = vmatprep.subr.bf16.mxu0 %v3143_v4  ;;  %5974 = vmatprep.subr.bf16.mxu1 %v3145_v50  ;;  %v3140_v4 = vmax.bf16 %v12356_v23, %v3108_v38  ;;  %v3471_v50 = vmax.bf16 %v12356_v23, %v3439_v63  ;;  %v3435_v59 = vadd.bf16 %v3403_v40, %v12538_v45  ;;  %v12543_v40 = vld [vmem:[#allocation20_spill] sm:$0xff] }
 0x267   : >> { %v3472_v38 = vmax.bf16 %v12356_v23, %v3440_v52  ;;  %v3436_v63 = vadd.bf16 %v3404_v49, %v12515_v34  ;;  %v3431_v9 = vadd.bf16 %v3399_v19, %v12516_v42  ;;  %v3400_v11 = vmul.bf16 %v10826_v62, %v12543_v40  ;;  %v12545_v19 = vld [vmem:[#allocation18_spill] sm:$0xff]  ;;  %v12547_v42 = vld [vmem:[#allocation41_spill] sm:$0xff]  ;;  %v12548_v34 = vld [vmem:[#allocation16_spill] sm:$0xff] }
 0x268   : >> { %v3467_v52 = vmax.bf16 %v12356_v23, %v3435_v59  ;;  %v3469_v49 = vmax.bf16 %v12356_v23, %v3437_v41  ;;  %v3396_v40 = vmul.bf16 %v10826_v62, %v12547_v42  ;;  %v12549_v26 = vmov %v12548_v34  ;;  %v12550_v41 = vld [vmem:[#allocation79_spill] sm:$0xff] }
 0x269   : >> { %5934 = vmatpush1.bf16.msra.mxu0 %v3142_v15  ;;  %5975 = vmatpush1.bf16.msra.mxu1 %v3144_v30  ;;  %v3470_v15 = vmax.bf16 %v12356_v23, %v3438_v12  ;;  %v12540_v30 = vld [vmem:[#allocation31_spill] sm:$0xff]  ;;  %v3463_v59 = vmax.bf16 %v12356_v23, %v3431_v9 }
 0x26a   : >> { %5935 = vmatprep.subr.bf16.mxu0 %v3139_v20  ;;  %5976 = vmatprep.subr.bf16.mxu1 %v3141_v47  ;;  %v3434_v58 = vadd.bf16 %v3402_v14, %v12540_v30  ;;  %v3398_v20 = vmul.bf16 %v10826_v62, %v12541_v3  ;;  %v12542_v47 = vld [vmem:[#allocation82_spill] sm:$0xff]  ;;  %v12544_v12 = vld [vmem:[#allocation43_spill] sm:$0xff] }
 0x26b   : >> { %v3433_v39 = vadd.bf16 %v3401_v48, %v12542_v47  ;;  %v3395_v14 = vmul.bf16 %v10826_v62, %v12544_v12  ;;  %v12546_v48 = vld [vmem:[#allocation40_spill] sm:$0xff] }
 0x26c   : >> { %v3394_v47 = vmul.bf16 %v10826_v62, %v12546_v48  ;;  %v12551_v48 = vld [vmem:[#allocation23_spill] sm:$0xff] }
 0x26d   : >> { %5936 = vmatpush1.bf16.msra.mxu0 %v3138_v16  ;;  %5977 = vmatpush1.bf16.msra.mxu1 %v3140_v4  ;;  %v3397_v16 = vmul.bf16 %v10826_v62, %v12545_v19  ;;  %v3466_v4 = vmax.bf16 %v12356_v23, %v3434_v58  ;;  %v3465_v58 = vmax.bf16 %v12356_v23, %v3433_v39 }
 0x26e   : >> { %6003 = vmatprep.subr.bf16.mxu0 %v3471_v50  ;;  %6044 = vmatprep.subr.bf16.mxu1 %v3473_v2  ;;  %v3468_v50 = vmax.bf16 %v12356_v23, %v3436_v63  ;;  %v3430_v2 = vadd.bf16 %v3398_v20, %v12550_v41  ;;  %v3432_v42 = vadd.bf16 %v3400_v11, %v12551_v48  ;;  %v12553_v20 = vld [vmem:[#allocation39_spill] sm:$0xff] }
 0x26f   : >> { %v3429_v63 = vadd.bf16 %v3397_v16, %v12527_v57  ;;  %v3393_v19 = vmul.bf16 %v10826_v62, %v12553_v20  ;;  %v3390_v11 = vmul.bf16 %v10826_v62, %v12529_v6  ;;  %v12555_v16 = vld [vmem:[#allocation71_spill] sm:$0xff]  ;;  %v12556_v6 = vld [vmem:[#allocation76_spill] sm:$0xff] }
 0x270   : >> { %5954 = vmatmul.mubr.bf16.vlgmr.msra.gmra.mxu0 %v12548_v34  ;;  %5995 = vmatmul.mubr.bf16.vlgmr.msra.gmra.mxu1 %v12549_v26  ;;  %v3427_v34 = vadd.bf16 %v3395_v14, %v12526_v18  ;;  %v12552_v26 = vld [vmem:[#allocation74_spill] sm:$0xff]  ;;  %v3462_v39 = vmax.bf16 %v12356_v23, %v3430_v2  ;;  %v3392_v14 = vmul.bf16 %v10826_v62, %v12499_v0 }
 0x271   : >> { %6004 = vmatpush1.bf16.msra.mxu0 %v3470_v15  ;;  %6045 = vmatpush1.bf16.msra.mxu1 %v3472_v38  ;;  %v3391_v9 = vmul.bf16 %v10826_v62, %v12552_v26  ;;  %v3426_v15 = vadd.bf16 %v3394_v47, %v12528_v28  ;;  %v3428_v38 = vadd.bf16 %v3396_v40, %v12500_v29  ;;  %v12558_v0 = vld [vmem:[#allocation78_spill] sm:$0xff] }
 0x272   : >> { %6005 = vmatprep.subr.bf16.mxu0 %v3467_v52  ;;  %6046 = vmatprep.subr.bf16.mxu1 %v3469_v49  ;;  %v12554_v52 = vld [vmem:[#allocation66_spill] sm:$0xff]  ;;  %v3464_v47 = vmax.bf16 %v12356_v23, %v3432_v42  ;;  %v3459_v40 = vmax.bf16 %v12356_v23, %v3427_v34  ;;  %v3389_v20 = vmul.bf16 %v10826_v62, %v12555_v16  ;;  %v12559_v16 = vld [vmem:[#allocation65_spill] sm:$0xff] }
 0x273   : >> { %6035 = vmatprep.mubr.bf16.mxu0 %v12356_v23  ;;  %6076 = vmatprep.mubr.bf16.mxu1 %v12356_v23  ;;  %v3387_v49 = vmul.bf16 %v10826_v62, %v12554_v52  ;;  %v3461_v2 = vmax.bf16 %v12356_v23, %v3429_v63  ;;  %v12557_v26 = vmov %v12556_v6  ;;  %v3423_v28 = vadd.bf16 %v3391_v9, %v12556_v6 }
 0x274   : >> { %v3425_v57 = vadd.bf16 %v3393_v19, %v12558_v0  ;;  %v3458_v52 = vmax.bf16 %v12356_v23, %v3426_v15  ;;  %v3422_v42 = vadd.bf16 %v3390_v11, %v12531_v8  ;;  %v12560_v29 = vmov %v12559_v16 }
 0x275   : >> { %6006 = vmatpush1.bf16.msra.mxu0 %v3466_v4  ;;  %6047 = vmatpush1.bf16.msra.mxu1 %v3468_v50  ;;  %v3460_v4 = vmax.bf16 %v12356_v23, %v3428_v38  ;;  %v3424_v50 = vadd.bf16 %v3392_v14, %v12533_v27  ;;  %v3419_v34 = vadd.bf16 %v3387_v49, %v12406_v21 }
 0x276   : >> { %6007 = vmatprep.subr.bf16.mxu0 %v3463_v59  ;;  %6048 = vmatprep.subr.bf16.mxu1 %v3465_v58  ;;  %v3386_v59 = vmul.bf16 %v10826_v62, %v12559_v16  ;;  %v3421_v6 = vadd.bf16 %v3389_v20, %v12505_v51  ;;  %v12561_v58 = vld [vmem:[#allocation67_spill] sm:$0xff]  ;;  %v3383_v63 = vmul.bf16 %v10826_v62, %v12534_v36 }
 0x277   : >> { %v3388_v19 = vmul.bf16 %v10826_v62, %v12561_v58  ;;  %v3455_v9 = vmax.bf16 %v12356_v23, %v3423_v28  ;;  %v3457_v15 = vmax.bf16 %v12356_v23, %v3425_v57  ;;  %v3385_v38 = vmul.bf16 %v10826_v62, %v12535_v37 }
 0x278   : >> { %v3384_v20 = vmul.bf16 %v10826_v62, %v12509_v25  ;;  %v3379_v11 = vmul.bf16 %v10826_v62, %v12477_v56  ;;  %v3454_v14 = vmax.bf16 %v12356_v23, %v3422_v42  ;;  %v3456_v49 = vmax.bf16 %v12356_v23, %v3424_v50  ;;  %v12563_v56 = vld [vmem:[#allocation57_spill] sm:$0xff] }
 0x279   : >> { %6008 = vmatpush1.bf16.msra.mxu0 %v3462_v39  ;;  %6049 = vmatpush1.bf16.msra.mxu1 %v3464_v47  ;;  %v3382_v39 = vmul.bf16 %v10826_v62, %v12507_v5  ;;  %v3451_v28 = vmax.bf16 %v12356_v23, %v3419_v34  ;;  %v3418_v57 = vadd.bf16 %v3386_v59, %v12508_v61  ;;  %v10970_v25 = vstv %s3679_s16 }
 0x27a   : >> { %6009 = vmatprep.subr.bf16.mxu0 %v3459_v40  ;;  %6050 = vmatprep.subr.bf16.mxu1 %v3461_v2  ;;  %v3453_v47 = vmax.bf16 %v12356_v23, %v3421_v6  ;;  %v12562_v40 = vld [vmem:[#allocation70_spill] sm:$0xff]  ;;  %v3415_v16 = vadd.bf16 %v3383_v63, %v12413_v44  ;;  %v3417_v42 = vadd.bf16 %v3385_v38, %v12476_v22 }
 0x27b   : >> { %v3420_v2 = vadd.bf16 %v3388_v19, %v12562_v40  ;;  %v3381_v50 = vmul.bf16 %v10826_v62, %v12563_v56  ;;  %v3378_v34 = vmul.bf16 %v10826_v62, %v12451_v24  ;;  %v3411_v59 = vadd.bf16 %v3379_v11, %v12384_v31 }
 0x27c   : >> { %v3380_v6 = vmul.bf16 %v10826_v62, %v12388_v43  ;;  %v3711_v19 = vmul.bf16 %v10970_v25, %v9826_v53  ;;  %v3713_v63 = vmul.bf16 %v10970_v25, %v12311_v13  ;;  %v3447_v38 = vmax.bf16 %v12356_v23, %v3415_v16 }
 0x27d   : >> { %6010 = vmatpush1.bf16.msra.mxu0 %v3458_v52  ;;  %6051 = vmatpush1.bf16.msra.mxu1 %v3460_v4  ;;  %v3414_v52 = vadd.bf16 %v3382_v39, %v12449_v55  ;;  %v3416_v4 = vadd.bf16 %v3384_v20, %v12383_v54  ;;  %v3449_v39 = vmax.bf16 %v12356_v23, %v3417_v42 }
 0x27e   : >> { %6011 = vmatprep.subr.bf16.mxu0 %v3455_v9  ;;  %6052 = vmatprep.subr.bf16.mxu1 %v3457_v15  ;;  %v3450_v9 = vmax.bf16 %v12356_v23, %v3418_v57  ;;  %v3452_v15 = vmax.bf16 %v12356_v23, %v3420_v2  ;;  %v3413_v62 = vadd.bf16 %v3381_v50, %v12421_v17  ;;  %v12564_v50 = vld [vmem:[#allocation28_spill] sm:$0xff] }
 0x27f   : >> { %v3410_v20 = vadd.bf16 %v3378_v34, %v12422_v10  ;;  %v3446_v11 = vmax.bf16 %v12356_v23, %v3414_v52  ;;  %v3448_v13 = vmax.bf16 %v12356_v23, %v3416_v4  ;;  %v3743_v57 = vadd.bf16 %v3711_v19, %v12310_v1  ;;  %v12565_v4 = vld [vmem:[#allocation25_spill] sm:$0xff]  ;;  %v12566_v19 = vld [vmem:[#allocation22_spill] sm:$0xff] }
 0x280   : >> { %v3745_v2 = vadd.bf16 %v3713_v63, %v12309_v33  ;;  %v3707_v16 = vmul.bf16 %v10970_v25, %v9785_v60  ;;  %v3709_v42 = vmul.bf16 %v10970_v25, %v12452_v32  ;;  %v3706_v34 = vmul.bf16 %v10970_v25, %v12564_v50  ;;  %v12569_v50 = vld [vmem:[#allocation24_spill] sm:$0xff]  ;;  %v12646_v60 = vld [vmem:[#allocation26_spill] sm:$0xff] (%p11787_p7) }
 0x281   : >> { %6012 = vmatpush1.bf16.msra.mxu0 %v3454_v14  ;;  %6053 = vmatpush1.bf16.msra.mxu1 %v3456_v49  ;;  %v3443_v14 = vmax.bf16 %v12356_v23, %v3411_v59  ;;  %v3412_v49 = vadd.bf16 %v3380_v6, %v12391_v7  ;;  %v3445_v52 = vmax.bf16 %v12356_v23, %v3413_v62  ;;  %v12568_v62 = vld [vmem:[#allocation33_spill] sm:$0xff] }
 0x282   : >> { %6013 = vmatprep.subr.bf16.mxu0 %v3451_v28  ;;  %6054 = vmatprep.subr.bf16.mxu1 %v3453_v47  ;;  %v3710_v28 = vmul.bf16 %v10970_v25, %v12423_v46  ;;  %v3712_v47 = vmul.bf16 %v10970_v25, %v12308_v35  ;;  %v3442_v46 = vmax.bf16 %v12356_v23, %v3410_v20  ;;  %v12572_v35 = vld [vmem:[#allocation20_spill] sm:$0xff] }
 0x283   : >> { %v3708_v59 = vmul.bf16 %v10970_v25, %v12565_v4  ;;  %v3444_v6 = vmax.bf16 %v12356_v23, %v3412_v49  ;;  %v3703_v63 = vmul.bf16 %v10970_v25, %v12566_v19  ;;  %v3739_v49 = vadd.bf16 %v3707_v16, %v12538_v45  ;;  %v12570_v4 = vld [vmem:[#allocation49_spill] sm:$0xff] }
 0x284   : >> { %v3742_v20 = vadd.bf16 %v3710_v28, %v12568_v62  ;;  %v3744_v1 = vadd.bf16 %v3712_v47, %v12569_v50  ;;  %v3741_v19 = vadd.bf16 %v3709_v42, %v12570_v4  ;;  %v3738_v33 = vadd.bf16 %v3706_v34, %v12540_v30  ;;  %v12573_v28 = vld [vmem:[#allocation80_spill] sm:$0xff]  ;;  %v12577_v62 = vld [vmem:[#allocation41_spill] sm:$0xff] }
 0x285   : >> { %6014 = vmatpush1.bf16.msra.mxu0 %v3450_v9  ;;  %6055 = vmatpush1.bf16.msra.mxu1 %v3452_v15  ;;  %v12567_v9 = vld [vmem:[#allocation81_spill] sm:$0xff]  ;;  %v3702_v15 = vmul.bf16 %v10970_v25, %v12541_v3  ;;  %v3735_v47 = vadd.bf16 %v3703_v63, %v12573_v28  ;;  %v12576_v34 = vld [vmem:[#allocation40_spill] sm:$0xff]  ;;  %v11043_v63 = vpop.permute.xlu0 %4228 }
 0x286   : >> { %6015 = vmatprep.subr.bf16.mxu0 %v3447_v38  ;;  %6056 = vmatprep.subr.bf16.mxu1 %v3449_v39  ;;  %v3705_v32 = vmul.bf16 %v10970_v25, %v12567_v9  ;;  %v3775_v38 = vmax.bf16 %v12356_v23, %v3743_v57  ;;  %v3777_v39 = vmax.bf16 %v12356_v23, %v3745_v2  ;;  %v12571_v9 = vld [vmem:[#allocation47_spill] sm:$0xff] }
 0x287   : >> { %v3740_v3 = vadd.bf16 %v3708_v59, %v12571_v9  ;;  %v3704_v57 = vmul.bf16 %v10970_v25, %v12572_v35  ;;  %v3699_v2 = vmul.bf16 %v10970_v25, %v12544_v12  ;;  %v3734_v45 = vadd.bf16 %v3702_v15, %v12550_v41 }
 0x288   : >> { %v3774_v16 = vmax.bf16 %v12356_v23, %v3742_v20  ;;  %v3776_v30 = vmax.bf16 %v12356_v23, %v3744_v1  ;;  %v3771_v35 = vmax.bf16 %v12356_v23, %v3739_v49  ;;  %v3773_v12 = vmax.bf16 %v12356_v23, %v3741_v19  ;;  %v12578_v49 = vld [vmem:[#allocation16_spill] sm:$0xff] }
 0x289   : >> { %6016 = vmatpush1.bf16.msra.mxu0 %v3446_v11  ;;  %6057 = vmatpush1.bf16.msra.mxu1 %v3448_v13  ;;  %v12574_v11 = vld [vmem:[#allocation82_spill] sm:$0xff]  ;;  %v3770_v59 = vmax.bf16 %v12356_v23, %v3738_v33  ;;  %v3772_v1 = vmax.bf16 %v12356_v23, %v3740_v3  ;;  %v3736_v41 = vadd.bf16 %v3704_v57, %v12551_v48  ;;  %v12582_v57 = vld [vmem:[#allocation39_spill] sm:$0xff] }
 0x28a   : >> { %6017 = vmatprep.subr.bf16.mxu0 %v3443_v14  ;;  %6058 = vmatprep.subr.bf16.mxu1 %v3445_v52  ;;  %v3737_v13 = vadd.bf16 %v3705_v32, %v12574_v11  ;;  %v12575_v14 = vld [vmem:[#allocation18_spill] sm:$0xff]  ;;  %v3698_v52 = vmul.bf16 %v10970_v25, %v12576_v34  ;;  %v3731_v32 = vadd.bf16 %v3699_v2, %v12526_v18 }
 0x28b   : >> { %v3701_v42 = vmul.bf16 %v10970_v25, %v12575_v14  ;;  %v3767_v15 = vmax.bf16 %v12356_v23, %v3735_v47  ;;  %v3700_v20 = vmul.bf16 %v10970_v25, %v12577_v62  ;;  %v12580_v48 = vld [vmem:[#allocation42_spill] sm:$0xff]  ;;  %v3697_v2 = vmul.bf16 %v10970_v25, %v12582_v57  ;;  %v12587_v57 = vld [vmem:[#allocation71_spill] sm:$0xff] }
 0x28c   : >> { %v3730_v4 = vadd.bf16 %v3698_v52, %v12580_v48  ;;  %v12581_v18 = vld [vmem:[#allocation74_spill] sm:$0xff]  ;;  %v3768_v11 = vmax.bf16 %v12356_v23, %v3736_v41  ;;  %v12585_v52 = vld [vmem:[#allocation73_spill] sm:$0xff] }
 0x28d   : >> { %6018 = vmatpush1.bf16.msra.mxu0 %v3442_v46  ;;  %6059 = vmatpush1.bf16.msra.mxu1 %v3444_v6  ;;  %v3769_v46 = vmax.bf16 %v12356_v23, %v3737_v13  ;;  %v3766_v6 = vmax.bf16 %v12356_v23, %v3734_v45  ;;  %v3695_v19 = vmul.bf16 %v10970_v25, %v12581_v18  ;;  %v12583_v45 = vld [vmem:[#allocation38_spill] sm:$0xff] }
 0x28e   : >> { %6085 = vmatprep.subr.bf16.mxu0 %v3775_v38  ;;  %6126 = vmatprep.subr.bf16.mxu1 %v3777_v39  ;;  %v12579_v38 = vld [vmem:[#allocation19_spill] sm:$0xff]  ;;  %v3763_v13 = vmax.bf16 %v12356_v23, %v3731_v32  ;;  %v3694_v14 = vmul.bf16 %v10970_v25, %v12583_v45  ;;  %v3696_v62 = vmul.bf16 %v10970_v25, %v12585_v52 }
 0x28f   : >> { %v3733_v39 = vadd.bf16 %v3701_v42, %v12579_v38  ;;  %v3727_v18 = vadd.bf16 %v3695_v19, %v12557_v26  ;;  %v3692_v19 = vmul.bf16 %v10970_v25, %v12561_v58 }
 0x290   : >> { %v5545_v33 = vpop.f32.mrf.mxu0  ;;  %v5586_v50 = vpop.f32.mrf.mxu1  ;;  %6036 = vmatmul.mubr.bf16.vlgmr.msra.gmra.mxu0 %v12578_v49  ;;  %6077 = vmatmul.mubr.bf16.vlgmr.msra.gmra.mxu1 %v12578_v49 }
 0x291   : >> { %v11060_v9 = vadd.f32 %v5545_v33, %v11043_v63  ;;  %v11063_v3 = vadd.f32 %v5586_v50, %v11043_v63  ;;  %6086 = vmatpush1.bf16.msra.mxu0 %v3774_v16  ;;  %6127 = vmatpush1.bf16.msra.mxu1 %v3776_v30  ;;  %v12584_v16 = vld [vmem:[#allocation44_spill] sm:$0xff]  ;;  %v3765_v33 = vmax.bf16 %v12356_v23, %v3733_v39  ;;  %v12586_v50 = vld [vmem:[#allocation66_spill] sm:$0xff] }
 0x292   : >> { %v5547_v28 = vpop.f32.mrf.mxu0  ;;  %v5588_v47 = vpop.f32.mrf.mxu1  ;;  %6087 = vmatprep.subr.bf16.mxu0 %v3771_v35  ;;  %6128 = vmatprep.subr.bf16.mxu1 %v3773_v12  ;;  %v3732_v30 = vadd.bf16 %v3700_v20, %v12584_v16  ;;  %v3691_v20 = vmul.bf16 %v10970_v25, %v12586_v50  ;;  %v3729_v39 = vadd.bf16 %v3697_v2, %v12558_v0 }
 0x293   : >> { %v6167_v42 = vmin.f32 %v11060_v9, 15.0  ;;  %v6169_v34 = vmin.f32 %v11063_v3, 15.0  ;;  %6117 = vmatprep.mubr.bf16.mxu0 %v12356_v23  ;;  %6158 = vmatprep.mubr.bf16.mxu1 %v12356_v23  ;;  %v11079_v35 = vadd.f32 %v5547_v28, %v11043_v63  ;;  %v11082_v12 = vadd.f32 %v5588_v47, %v11043_v63 }
 0x294   : >> { %v5549_v41 = vpop.f32.mrf.mxu0  ;;  %v5590_v32 = vpop.f32.mrf.mxu1  ;;  %v3693_v28 = vmul.bf16 %v10970_v25, %v12587_v57  ;;  %v3762_v2 = vmax.bf16 %v12356_v23, %v3730_v4  ;;  %v3761_v50 = vmax.bf16 %v12356_v23, %v3729_v39  ;;  %v3724_v4 = vadd.bf16 %v3692_v19, %v12562_v40  ;;  %v12588_v57 = vld [vmem:[#allocation61_spill] sm:$0xff] }
 0x295   : >> { %v6171_v38 = vmul.f32 1.442695, %v6167_v42  ;;  %v6175_v48 = vmul.f32 1.442695, %v6169_v34  ;;  %6088 = vmatpush1.bf16.msra.mxu0 %v3770_v59  ;;  %6129 = vmatpush1.bf16.msra.mxu1 %v3772_v1  ;;  %v6168_v45 = vmin.f32 %v11079_v35, 15.0  ;;  %v6170_v47 = vmin.f32 %v11082_v12, 15.0 }
 0x296   : >> { %v5550_v16 = vpop.f32.mrf.mxu0  ;;  %v5591_v52 = vpop.f32.mrf.mxu1  ;;  %6089 = vmatprep.subr.bf16.mxu0 %v3767_v15  ;;  %6130 = vmatprep.subr.bf16.mxu1 %v3769_v46  ;;  %v3726_v42 = vadd.bf16 %v3694_v14, %v12531_v8  ;;  %v3728_v59 = vadd.bf16 %v3696_v62, %v12533_v27  ;;  %v3690_v1 = vmul.bf16 %v10970_v25, %v12560_v29  ;;  %v12602_v27 = vld [vmem:[#allocation98_spill] sm:$0xff] }
 0x297   : >> { %8368 = vpow2.f32 %v6171_v38  ;;  %v6173_v34 = vmul.f32 1.442695, %v6168_v45  ;;  %v3723_v41 = vadd.bf16 %v3691_v20, %v12406_v21  ;;  %v3687_v15 = vmul.bf16 %v10970_v25, %v12534_v36 }
 0x298   : >> { %8370 = vpow2.f32 %v6175_v48  ;;  %v6177_v46 = vmul.f32 1.442695, %v6170_v47  ;;  %v3764_v14 = vmax.bf16 %v12356_v23, %v3732_v30  ;;  %v3725_v62 = vadd.bf16 %v3693_v28, %v12505_v51  ;;  %v12589_v47 = vld [vmem:[#allocation54_spill] sm:$0xff] }
 0x299   : >> { %6090 = vmatpush1.bf16.msra.mxu0 %v3766_v6  ;;  %6131 = vmatpush1.bf16.msra.mxu1 %v3768_v11  ;;  %8372 = vpow2.f32 %v6173_v34  ;;  %v3759_v32 = vmax.bf16 %v12356_v23, %v3727_v18  ;;  %v3689_v20 = vmul.bf16 %v10970_v25, %v12535_v37  ;;  %v3758_v38 = vmax.bf16 %v12356_v23, %v3726_v42 }
 0x29a   : >> { %6091 = vmatprep.subr.bf16.mxu0 %v3763_v13  ;;  %6132 = vmatprep.subr.bf16.mxu1 %v3765_v33  ;;  %v3722_v6 = vadd.bf16 %v3690_v1, %v12508_v61  ;;  %v3760_v11 = vmax.bf16 %v12356_v23, %v3728_v59  ;;  %v3755_v30 = vmax.bf16 %v12356_v23, %v3723_v41  ;;  %v8122_v48 = vmul.f32 -1.442695, %v11060_v9 }
 0x29b   : >> { %v3719_v13 = vadd.bf16 %v3687_v15, %v12413_v44  ;;  %v3686_v33 = vmul.bf16 %v10970_v25, %v12507_v5  ;;  %8374 = vpow2.f32 %v6177_v46  ;;  %v3757_v18 = vmax.bf16 %v12356_v23, %v3725_v62  ;;  %v12591_v62 = vld [vmem:[#allocation14_spill] sm:$0xff] }
 0x29c   : >> { %v3688_v28 = vmul.bf16 %v10970_v25, %v12588_v57  ;;  %v3721_v45 = vadd.bf16 %v3689_v20, %v12476_v22  ;;  %v3683_v16 = vmul.bf16 %v10970_v25, %v12589_v47  ;;  %v3685_v52 = vmul.bf16 %v10970_v25, %v12563_v56 }
 0x29d   : >> { %6092 = vmatpush1.bf16.msra.mxu0 %v3762_v2  ;;  %6133 = vmatpush1.bf16.msra.mxu1 %v3764_v14  ;;  %v3754_v9 = vmax.bf16 %v12356_v23, %v3722_v6  ;;  %v3756_v39 = vmax.bf16 %v12356_v23, %v3724_v4  ;;  %v3751_v42 = vmax.bf16 %v12356_v23, %v3719_v13  ;;  %8376 = vpow2.f32 %v8122_v48  ;;  %v12590_v14 = vld [vmem:[#allocation6_spill] sm:$0xff]  ;;  %v12593_v13 = vld [vmem:[#allocation15_spill] sm:$0xff] }
 0x29e   : >> { %6093 = vmatprep.subr.bf16.mxu0 %v3759_v32  ;;  %6134 = vmatprep.subr.bf16.mxu1 %v3761_v50  ;;  %v3718_v59 = vadd.bf16 %v3686_v33, %v12449_v55  ;;  %v3720_v1 = vadd.bf16 %v3688_v28, %v12383_v54  ;;  %v3682_v19 = vmul.bf16 %v10970_v25, %v12451_v24  ;;  %v8124_v28 = vmul.f32 -1.442695, %v11063_v3  ;;  %v12647_v54 = vld [vmem:[#allocation29_spill] sm:$0xff] (%p11787_p7) }
 0x29f   : >> { %v3684_v34 = vmul.bf16 %v10970_v25, %v12388_v43  ;;  %v3753_v41 = vmax.bf16 %v12356_v23, %v3721_v45  ;;  %v3715_v15 = vadd.bf16 %v3683_v16, %v12384_v31  ;;  %v3717_v46 = vadd.bf16 %v3685_v52, %v12421_v17 }
 0x2a0   : >> { %v11140_v32 = vrot.slane %v12591_v62, %v12590_v14  ;;  %v3750_v50 = vmax.bf16 %v12356_v23, %v3718_v59  ;;  %v3752_v25 = vmax.bf16 %v12356_v23, %v3720_v1  ;;  %v3714_v4 = vadd.bf16 %v3682_v19, %v12422_v10 }
 0x2a1   : >> { %6094 = vmatpush1.bf16.msra.mxu0 %v3758_v38  ;;  %6135 = vmatpush1.bf16.msra.mxu1 %v3760_v11  ;;  %v12592_v38 = vmov %v12591_v62  ;;  %v3716_v11 = vadd.bf16 %v3684_v34, %v12391_v7  ;;  %v11148_v33 = vrot.slane %v12593_v13, %v12590_v14  ;;  %v3747_v48 = vmax.bf16 %v12356_v23, %v3715_v15 }
 0x2a2   : >> { %6095 = vmatprep.subr.bf16.mxu0 %v3755_v30  ;;  %6136 = vmatprep.subr.bf16.mxu1 %v3757_v18  ;;  %v3749_v18 = vmax.bf16 %v12356_v23, %v3717_v46  ;;  %v3746_v47 = vmax.bf16 %v12356_v23, %v3714_v4  ;;  %8378 = vpow2.f32 %v8124_v28  ;;  %v8123_v3 = vmul.f32 -1.442695, %v11079_v35 }
 0x2a3   : >> { %v3748_v16 = vmax.bf16 %v12356_v23, %v3716_v11  ;;  %v8125_v46 = vmul.f32 -1.442695, %v11082_v12 }
 0x2a4   : >> { %v8369_v2 = vpop.eup %8368  ;;  %8380 = vpow2.f32 %v8123_v3 }
 0x2a5   : >> { %v8371_v20 = vpop.eup %8370  ;;  %v6208_v6 = vsub.f32 0.0, %v8369_v2  ;;  %6096 = vmatpush1.bf16.msra.mxu0 %v3754_v9  ;;  %6137 = vmatpush1.bf16.msra.mxu1 %v3756_v39 }
 0x2a6   : >> { %v6210_v30 = vsub.f32 0.0, %v8371_v20  ;;  %6097 = vmatprep.subr.bf16.mxu0 %v3751_v42  ;;  %6138 = vmatprep.subr.bf16.mxu1 %v3753_v41  ;;  %v8373_v57 = vpop.eup %8372  ;;  %v12594_v42 = vld [vmem:[#allocation7_spill] sm:$0xff] }
 0x2a7   : >> { %v6234_v45 = vmul.f32 %v11140_v32, %v6208_v6  ;;  %v6209_v39 = vsub.f32 0.0, %v8373_v57  ;;  %v11159_v59 = vrot.slane %v12592_v38, %v12594_v42  ;;  %v11164_v34 = vrot.slane %v12593_v13, %v12594_v42 }
 0x2a8   : >> { %v8375_v52 = vpop.eup %8374  ;;  %v6236_v9 = vmul.f32 %v11148_v33, %v6210_v30 }
 0x2a9   : >> { %6098 = vmatpush1.bf16.msra.mxu0 %v3750_v50  ;;  %6139 = vmatpush1.bf16.msra.mxu1 %v3752_v25  ;;  %v6238_v1 = vmul.f32 1.442695, %v6234_v45  ;;  %v6211_v19 = vsub.f32 0.0, %v8375_v52  ;;  %v6235_v15 = vmul.f32 %v11159_v59, %v6209_v39 }
 0x2aa   : >> { %6099 = vmatprep.subr.bf16.mxu0 %v3747_v48  ;;  %6140 = vmatprep.subr.bf16.mxu1 %v3749_v18  ;;  %v8377_v23 = vpop.eup %8376  ;;  %v6242_v41 = vmul.f32 1.442695, %v6236_v9 }
 0x2ab   : >> { %8382 = vpow2.f32 %v6238_v1  ;;  %v6191_v35 = vadd.f32 1.0, %v8377_v23  ;;  %v6237_v50 = vmul.f32 %v11164_v34, %v6211_v19  ;;  %v6240_v25 = vmul.f32 1.442695, %v6235_v15 }
 0x2ac   : >> { %8384 = vpow2.f32 %v6242_v41  ;;  %v6203_v1 = vstv %s9938_s18 }
 0x2ad   : >> { %6100 = vmatpush1.bf16.msra.mxu0 %v3746_v47  ;;  %6141 = vmatpush1.bf16.msra.mxu1 %v3748_v16  ;;  %8386 = vpow2.f32 %v8125_v46  ;;  %v6244_v45 = vmul.f32 1.442695, %v6237_v50 }
 0x2ae   : >> { %8388 = vrcp.f32 %v6191_v35  ;;  %v12595_v35 = vld [vmem:[#allocation10_spill] sm:$0xff] }
 0x2af   : >> { %8390 = vpow2.f32 %v6240_v25  ;;  %v8379_v19 = vpop.eup %8378  ;;  %v6204_v50 = vmul.f32 %v6203_v1, %v12595_v35 }
 0x2b0   : >> { %v5627_v2 = vpop.f32.mrf.mxu0  ;;  %v5668_v62 = vpop.f32.mrf.mxu1  ;;  %6118 = vmatmul.mubr.bf16.vlgmr.msra.gmra.mxu0 %v12578_v49  ;;  %6159 = vmatmul.mubr.bf16.vlgmr.msra.gmra.mxu1 %v12578_v49 }
 0x2b1   : >> { %v5628_v20 = vadd.f32 %v5627_v2, %v11043_v63  ;;  %v5669_v6 = vadd.f32 %v5668_v62, %v11043_v63  ;;  %v6356_v2 = vstv %s9941_s12  ;;  %v8381_v25 = vpop.eup %8380  ;;  %s7412_s12 = sshll.u32 (%p11787_p7), %s9842_s13, 4  ;;  %s11904_s12 = int_to_ptr.vmem [resolvable:$true] %s7412_s12 }
 0x2b2   : >> { %v5629_v4 = vpop.f32.mrf.mxu0  ;;  %v5670_v11 = vpop.f32.mrf.mxu1 }
 0x2b3   : >> { %v6320_v12 = vmin.f32 %v5628_v20, 15.0  ;;  %v6322_v30 = vmin.f32 %v5669_v6, 15.0  ;;  %v5630_v48 = vadd.f32 %v5629_v4, %v11043_v63  ;;  %v5671_v18 = vadd.f32 %v5670_v11, %v11043_v63  ;;  %v12596_v11 = vld [vmem:[#allocation12_spill] sm:$0xff] }
 0x2b4   : >> { %v5631_v57 = vpop.f32.mrf.mxu0  ;;  %v5672_v28 = vpop.f32.mrf.mxu1  ;;  %v8126_v23 = vmul.f32 -1.442695, %v5628_v20  ;;  %v8128_v46 = vmul.f32 -1.442695, %v5669_v6  ;;  %v6193_v4 = vadd.f32 1.0, %v8379_v19  ;;  %v6357_v20 = vmul.f32 %v6356_v2, %v12595_v35 }
 0x2b5   : >> { %v6324_v47 = vmul.f32 1.442695, %v6320_v12  ;;  %v6328_v16 = vmul.f32 1.442695, %v6322_v30  ;;  %v6321_v52 = vmin.f32 %v5630_v48, 15.0  ;;  %v6323_v9 = vmin.f32 %v5671_v18, 15.0 }
 0x2b6   : >> { %v5632_v39 = vpop.f32.mrf.mxu0  ;;  %v5673_v3 = vpop.f32.mrf.mxu1  ;;  %v8127_v62 = vmul.f32 -1.442695, %v5630_v48  ;;  %v6205_v12 = vmul.f32 %v6203_v1, %v12596_v11  ;;  %v8129_v30 = vmul.f32 -1.442695, %v5671_v18  ;;  %v6358_v28 = vmul.f32 %v6356_v2, %v12596_v11  ;;  %v12599_v2 = vld [vmem:[#allocation99_spill] sm:$0xff] }
 0x2b7   : >> { %8392 = vpow2.f32 %v6324_v47  ;;  %v6326_v41 = vmul.f32 1.442695, %v6321_v52  ;;  %v6330_v15 = vmul.f32 1.442695, %v6323_v9  ;;  %v12598_v52 = vld [vmem:[#allocation9_spill] sm:$0xff]  ;;  %v6192_v19 = vadd.f32 1.0, %v8381_v25 }
 0x2b8   : >> { %8394 = vpow2.f32 %v6328_v16  ;;  %v8383_v57 = vpop.eup %8382  ;;  %v11185_v9 = vadd.f32 %v6205_v12, %v12598_v52  ;;  %v11191_v39 = vadd.f32 %v6358_v28, %v12598_v52 }
 0x2b9   : >> { %8396 = vpow2.f32 %v6244_v45  ;;  %v8385_v6 = vpop.eup %8384  ;;  %v12597_v45 = vld [vmem:[#allocation8_spill] sm:$0xff]  ;;  %v6246_v16 = vsub.f32 1.0, %v8383_v57 }
 0x2ba   : >> { %8398 = vpow2.f32 %v6326_v41  ;;  %v11182_v47 = vadd.f32 %v6204_v50, %v12597_v45  ;;  %v8387_v48 = vpop.eup %8386  ;;  %v11188_v18 = vadd.f32 %v6357_v20, %v12597_v45  ;;  %v6248_v1 = vsub.f32 1.0, %v8385_v6 }
 0x2bb   : >> { %8400 = vpow2.f32 %v6330_v15  ;;  %v8389_v3 = vpop.eup %8388  ;;  %v6194_v15 = vadd.f32 1.0, %v8387_v48  ;;  %v6271_v50 = vrot.slane %v11185_v9, %v12590_v14  ;;  %v12600_v48 = vld [vmem:[#allocation97_spill] sm:$0xff] }
 0x2bc   : >> { %8402 = vpow2.f32 %v8126_v23  ;;  %v8391_v23 = vpop.eup %8390  ;;  %v6263_v41 = vrot.slane %v11182_v47, %v12590_v14  ;;  %v6252_v0 = vmul.f32 %v12600_v48, %v6248_v1  ;;  %v11217_v28 = vsub.f32 1.0, %v6248_v1 }
 0x2bd   : >> { %8404 = vpow2.f32 %v8128_v46  ;;  %v6247_v7 = vsub.f32 1.0, %v8391_v23 }
 0x2be   : >> { %8406 = vpow2.f32 %v8127_v62  ;;  %v6250_v62 = vmul.f32 %v12599_v2, %v6246_v16  ;;  %v6299_v23 = vrot.slane %v6252_v0, %v12590_v14  ;;  %v6282_v26 = vmul.f32 %v6271_v50, %v6252_v0 }
 0x2bf   : >> { %8408 = vrcp.f32 %v6193_v4  ;;  %v6267_v4 = vrot.slane %v11182_v47, %v12594_v42 }
 0x2c0   : >> { %8410 = vpow2.f32 %v8129_v30  ;;  %v6291_v8 = vrot.slane %v6250_v62, %v12590_v14  ;;  %v6280_v12 = vmul.f32 %v6263_v41, %v6250_v62 }
 0x2c1   : >> { %8412 = vrcp.f32 %v6192_v19 }
 0x2c2   : >> { %8414 = vrcp.f32 %v6194_v15  ;;  %v6304_v29 = vmul.f32 %v8389_v3, %v6291_v8  ;;  %v12604_v15 = vld [vmem:[#allocation93_spill] sm:$0xff] }
 0x2c3   : >> { %v12607_v8 = vld [vmem:[#allocation89_spill] sm:$0xff] }
 0x2c4   : >> { %v8393_v46 = vpop.eup %8392  ;;  %v11238_v3 = vadd.f32 %v12607_v8, %v6282_v26 }
 0x2c5   : >> { %v8395_v30 = vpop.eup %8394  ;;  %v6361_v57 = vsub.f32 0.0, %v8393_v46  ;;  %v11213_v46 = vsub.f32 1.0, %v6246_v16 }
 0x2c6   : >> { %v11208_v6 = vpop.eup %8396  ;;  %v6363_v47 = vsub.f32 0.0, %v8395_v30  ;;  %v12601_v30 = vld [vmem:[#allocation95_spill] sm:$0xff] }
 0x2c7   : >> { %v8399_v5 = vpop.eup %8398  ;;  %v6365_v25 = vmul.f32 %v6361_v57, %v11140_v32  ;;  %v11221_v17 = vadd.f32 %v12601_v30, %v6250_v62  ;;  %v12605_v37 = vsub.f32 1.0, %v11208_v6 }
 0x2c8   : >> { %v8401_v20 = vpop.eup %8400  ;;  %v6367_v10 = vmul.f32 %v6363_v47, %v11148_v33  ;;  %v6362_v13 = vsub.f32 0.0, %v8399_v5  ;;  %v6251_v47 = vmul.f32 %v12602_v27, %v6247_v7 }
 0x2c9   : >> { %v8403_v19 = vpop.eup %8402  ;;  %v6369_v21 = vmul.f32 1.442695, %v6365_v25  ;;  %v6364_v16 = vsub.f32 0.0, %v8401_v20  ;;  %v12603_v20 = vld [vmem:[#allocation91_spill] sm:$0xff] }
 0x2ca   : >> { %v8405_v22 = vpop.eup %8404  ;;  %v6373_v57 = vmul.f32 1.442695, %v6367_v10  ;;  %v6366_v24 = vmul.f32 %v6362_v13, %v11159_v59  ;;  %v6344_v41 = vadd.f32 1.0, %v8403_v19  ;;  %v11229_v31 = vadd.f32 %v12603_v20, %v6280_v12 }
 0x2cb   : >> { %v8407_v1 = vpop.eup %8406  ;;  %8416 = vpow2.f32 %v6369_v21  ;;  %v6368_v5 = vmul.f32 %v6364_v16, %v11164_v34  ;;  %v11232_v10 = vadd.f32 %v12604_v15, %v6252_v0  ;;  %v6346_v13 = vadd.f32 1.0, %v8405_v22  ;;  %v12606_v21 = vld [vmem:[#allocation96_spill] sm:$0xff] }
 0x2cc   : >> { %v8409_v30 = vpop.eup %8408  ;;  %8418 = vpow2.f32 %v6373_v57  ;;  %v6371_v62 = vmul.f32 1.442695, %v6366_v24  ;;  %v6253_v38 = vmul.f32 %v12606_v21, %v12605_v37  ;;  %v6345_v16 = vadd.f32 1.0, %v8407_v1  ;;  %v12608_v24 = vld [vmem:[#allocation94_spill] sm:$0xff]  ;;  %v12609_v57 = vld [vmem:[#allocation87_spill] sm:$0xff] }
 0x2cd   : >> { %v8411_v25 = vpop.eup %8410  ;;  %v6375_v36 = vmul.f32 1.442695, %v6368_v5  ;;  %v6306_v50 = vmul.f32 %v8409_v30, %v6299_v23  ;;  %v11241_v19 = vadd.f32 %v12608_v24, %v6251_v47  ;;  %v6313_v12 = vsub.f32 1.0, %v6247_v7  ;;  %v12610_v30 = vld [vmem:[#allocation85_spill] sm:$0xff]  ;;  %v12611_v7 = vld [vmem:[#allocation92_spill] sm:$0xff] }
 0x2ce   : >> { %8420 = vpow2.f32 %v6371_v62  ;;  %v11244_v0 = vadd.f32 %v12609_v57, %v6304_v29  ;;  %v6281_v22 = vmul.f32 %v6267_v4, %v6251_v47  ;;  %v6347_v23 = vadd.f32 1.0, %v8411_v25  ;;  %v8413_v20 = vpop.eup %8412 }
 0x2cf   : >> { %8422 = vpow2.f32 %v6375_v36  ;;  %v6295_v37 = vrot.slane %v6251_v47, %v12590_v14  ;;  %v11250_v62 = vadd.f32 %v12610_v30, %v6306_v50  ;;  %v11253_v36 = vadd.f32 %v12611_v7, %v6253_v38  ;;  %v8415_v57 = vpop.eup %8414 }
 0x2d0   : >> { %8424 = vrcp.f32 %v6344_v41  ;;  %v5709_v15 = vpop.f32.mrf.mxu0  ;;  %v5750_v5 = vpop.f32.mrf.mxu1  ;;  %v12612_v29 = vrot.slane %v11185_v9, %v12594_v42 }
 0x2d1   : >> { %8426 = vrcp.f32 %v6346_v13  ;;  %v5710_v1 = vadd.f32 %v5709_v15, %v11043_v63  ;;  %v5751_v26 = vadd.f32 %v5750_v5, %v11043_v63  ;;  %v12613_v15 = vld [vmem:[#allocation90_spill] sm:$0xff] }
 0x2d2   : >> { %v6283_v4 = vmul.f32 %v12612_v29, %v6253_v38  ;;  %8428 = vrcp.f32 %v6345_v16  ;;  %v5711_v41 = vpop.f32.mrf.mxu0  ;;  %v5752_v25 = vpop.f32.mrf.mxu1  ;;  %v11259_v5 = vadd.f32 %v12613_v15, %v6281_v22  ;;  %v6303_v16 = vrot.slane %v6253_v38, %v12590_v14  ;;  %v12614_v15 = vld [vmem:[#allocation88_spill] sm:$0xff] }
 0x2d3   : >> { %v6451_v47 = vmin.f32 %v5710_v1, 15.0  ;;  %v8130_v13 = vmul.f32 -1.442695, %v5710_v1  ;;  %v6453_v8 = vmin.f32 %v5751_v26, 15.0  ;;  %v8132_v24 = vmul.f32 -1.442695, %v5751_v26 }
 0x2d4   : >> { %8430 = vrcp.f32 %v6347_v23  ;;  %v5712_v50 = vadd.f32 %v5711_v41, %v11043_v63  ;;  %v5753_v30 = vadd.f32 %v5752_v25, %v11043_v63  ;;  %v5713_v7 = vpop.f32.mrf.mxu0  ;;  %v5754_v9 = vpop.f32.mrf.mxu1  ;;  %v6305_v22 = vmul.f32 %v8413_v20, %v6295_v37 }
 0x2d5   : >> { %v6455_v29 = vmul.f32 1.442695, %v6451_v47  ;;  %8432 = vpow2.f32 %v8130_v13  ;;  %v6459_v40 = vmul.f32 1.442695, %v6453_v8  ;;  %v6287_v23 = vadd.f32 %v12614_v15, %v6283_v4 }
 0x2d6   : >> { %8434 = vpow2.f32 %v8132_v24  ;;  %v6452_v1 = vmin.f32 %v5712_v50, 15.0  ;;  %v8131_v43 = vmul.f32 -1.442695, %v5712_v50  ;;  %v6454_v26 = vmin.f32 %v5753_v30, 15.0  ;;  %v5714_v44 = vpop.f32.mrf.mxu0  ;;  %v5755_v49 = vpop.f32.mrf.mxu1 }
 0x2d7   : >> { %v12615_v41 = vsub.f32 1.0, %v11208_v6  ;;  %8436 = vpow2.f32 %v6455_v29  ;;  %v8133_v47 = vmul.f32 -1.442695, %v5753_v30  ;;  %v6307_v8 = vmul.f32 %v8415_v57, %v6303_v16 }
 0x2d8   : >> { %v8417_v25 = vpop.eup %8416  ;;  %8438 = vpow2.f32 %v6459_v40  ;;  %v6457_v7 = vmul.f32 1.442695, %v6452_v1  ;;  %v6461_v38 = vmul.f32 1.442695, %v6454_v26  ;;  %v6316_v24 = vmul.f32 %v12599_v2, %v11213_v46 }
 0x2d9   : >> { %v6315_v51 = vsub.f32 1.0, %v12615_v41  ;;  %v8419_v13 = vpop.eup %8418  ;;  %v6377_v50 = vsub.f32 1.0, %v8417_v25  ;;  %8440 = vpow2.f32 %v8131_v43  ;;  %v6318_v44 = vmul.f32 %v12600_v48, %v11217_v28 }
 0x2da   : >> { %v6379_v49 = vsub.f32 1.0, %v8419_v13  ;;  %v6317_v6 = vmul.f32 %v12602_v27, %v6313_v12  ;;  %8442 = vpow2.f32 %v6457_v7  ;;  %v12616_v28 = vrot.slane %v11188_v18, %v12590_v14 }
 0x2db   : >> { %v8421_v37 = vpop.eup %8420  ;;  %v6381_v4 = vmul.f32 %v6377_v50, %v6316_v24  ;;  %v6443_v40 = vsub.f32 1.0, %v6377_v50  ;;  %v6319_v20 = vmul.f32 %v12606_v21, %v6315_v51  ;;  %8444 = vpow2.f32 %v6461_v38 }
 0x2dc   : >> { %v8423_v30 = vpop.eup %8422  ;;  %v6383_v57 = vmul.f32 %v6379_v49, %v6318_v44  ;;  %v6445_v9 = vsub.f32 1.0, %v6379_v49  ;;  %v6378_v16 = vsub.f32 1.0, %v8421_v37  ;;  %8446 = vpow2.f32 %v8133_v47 }
 0x2dd   : >> { %v8425_v2 = vpop.eup %8424  ;;  %v11274_v43 = vadd.f32 %v6381_v4, %v11221_v17  ;;  %v6411_v27 = vmul.f32 %v12616_v28, %v6381_v4  ;;  %v6422_v48 = vrot.slane %v6381_v4, %v12590_v14  ;;  %v6380_v46 = vsub.f32 1.0, %v8423_v30  ;;  %v12620_v28 = vld [vmem:[#allocation86_spill] sm:$0xff] }
 0x2de   : >> { %v8427_v12 = vpop.eup %8426  ;;  %v11281_v51 = vadd.f32 %v6383_v57, %v11232_v10  ;;  %v12617_v21 = vrot.slane %v11191_v39, %v12590_v14  ;;  %v6430_v1 = vrot.slane %v6383_v57, %v12590_v14  ;;  %v6382_v26 = vmul.f32 %v6378_v16, %v6317_v6 }
 0x2df   : >> { %v8429_v17 = vpop.eup %8428  ;;  %v11288_v15 = vadd.f32 %v6411_v27, %v11229_v31  ;;  %v6435_v41 = vmul.f32 %v8425_v2, %v6422_v48  ;;  %v6444_v25 = vsub.f32 1.0, %v6378_v16  ;;  %v6384_v7 = vmul.f32 %v6380_v46, %v6319_v20 }
 0x2e0   : >> { %v6413_v29 = vmul.f32 %v12617_v21, %v6383_v57  ;;  %v6437_v47 = vmul.f32 %v8427_v12, %v6430_v1  ;;  %v11294_v10 = vadd.f32 %v6382_v26, %v11241_v19  ;;  %v12618_v13 = vrot.slane %v11188_v18, %v12594_v42  ;;  %v12621_v21 = vld [vmem:[#allocation84_spill] sm:$0xff] }
 0x2e1   : >> { %v8431_v49 = vpop.eup %8430  ;;  %v11300_v37 = vadd.f32 %v6435_v41, %v11244_v0  ;;  %v6426_v31 = vrot.slane %v6382_v26, %v12590_v14  ;;  %v11304_v4 = vadd.f32 %v6384_v7, %v11253_v36  ;;  %v6434_v16 = vrot.slane %v6384_v7, %v12590_v14 }
 0x2e2   : >> { %v11291_v38 = vadd.f32 %v6413_v29, %v11238_v3  ;;  %v6412_v50 = vmul.f32 %v12618_v13, %v6382_v26  ;;  %v12619_v3 = vrot.slane %v11191_v39, %v12594_v42  ;;  %v8433_v57 = vpop.eup %8432  ;;  %v11310_v19 = vadd.f32 %v6437_v47, %v11250_v62 }
 0x2e3   : >> { %v6446_v0 = vsub.f32 1.0, %v6380_v46  ;;  %v8435_v2 = vpop.eup %8434  ;;  %v6309_v27 = vadd.f32 %v12620_v28, %v6305_v22  ;;  %v6436_v48 = vmul.f32 %v8429_v17, %v6426_v31  ;;  %v11319_v12 = vmul.f32 %v6443_v40, %v6316_v24 }
 0x2e4   : >> { %v6414_v30 = vmul.f32 %v12619_v3, %v6384_v7  ;;  %v11313_v18 = vadd.f32 %v6412_v50, %v11259_v5  ;;  %v8437_v39 = vpop.eup %8436  ;;  %v6311_v29 = vadd.f32 %v12621_v21, %v6307_v8  ;;  %v6438_v1 = vmul.f32 %v8431_v49, %v6434_v16 }
 0x2e5   : >> { %v11322_v62 = vmul.f32 %v6445_v9, %v6318_v44  ;;  %v11324_v26 = vmul.f32 %v6444_v25, %v6317_v6  ;;  %v8439_v5 = vpop.eup %8438  ;;  %v11326_v41 = vadd.f32 %v6436_v48, %v6309_v27  ;;  %v6492_v46 = vsub.f32 0.0, %v8437_v39 }
 0x2e6   : >> { %v11317_v36 = vadd.f32 %v6414_v30, %v6287_v23  ;;  %v11328_v7 = vmul.f32 %v6446_v0, %v6319_v20  ;;  %v8441_v22 = vpop.eup %8440  ;;  %v11330_v17 = vadd.f32 %v6438_v1, %v6311_v29  ;;  %v6494_v23 = vsub.f32 0.0, %v8439_v5 }
 0x2e7   : >> { %v8443_v24 = vpop.eup %8442  ;;  %v6496_v40 = vmul.f32 %v6492_v46, %v11140_v32  ;;  %v6475_v49 = vadd.f32 1.0, %v8433_v57  ;;  %v6487_v3 = vstv %s10074_s20  ;;  %v6477_v30 = vadd.f32 1.0, %v8435_v2 }
 0x2e8   : >> { %v8445_v8 = vpop.eup %8444  ;;  %v6498_v44 = vmul.f32 %v6494_v23, %v11148_v33  ;;  %v6493_v9 = vsub.f32 0.0, %v8443_v24  ;;  %v6476_v0 = vadd.f32 1.0, %v8441_v22  ;;  %v6488_v28 = vmul.f32 %v6487_v3, %v12595_v35 }
 0x2e9   : >> { %v8447_v6 = vpop.eup %8446  ;;  %v6500_v25 = vmul.f32 1.442695, %v6496_v40  ;;  %v6495_v47 = vsub.f32 0.0, %v8445_v8  ;;  %v6489_v21 = vmul.f32 %v6487_v3, %v12596_v11 }
 0x2ea   : >> { %v6504_v13 = vmul.f32 1.442695, %v6498_v44  ;;  %v6497_v50 = vmul.f32 %v6493_v9, %v11159_v59  ;;  %v6478_v27 = vadd.f32 1.0, %v8447_v6  ;;  %v6490_v24 = vadd.f32 %v6488_v28, %v12597_v45 }
 0x2eb   : >> { %8448 = vpow2.f32 %v6500_v25  ;;  %v6499_v20 = vmul.f32 %v6495_v47, %v11164_v34  ;;  %v6491_v6 = vadd.f32 %v6489_v21, %v12598_v52 }
 0x2ec   : >> { %8450 = vpow2.f32 %v6504_v13  ;;  %v6502_v31 = vmul.f32 1.442695, %v6497_v50 }
 0x2ed   : >> { %v6506_v16 = vmul.f32 1.442695, %v6499_v20  ;;  %v6533_v21 = vrot.slane %v6491_v6, %v12590_v14 }
 0x2ee   : >> { %8452 = vpow2.f32 %v6502_v31 }
 0x2ef   : >> { %8454 = vpow2.f32 %v6506_v16 }
 0x2f0   : >> { %8456 = vrcp.f32 %v6475_v49  ;;  %v5791_v48 = vpop.f32.mrf.mxu0  ;;  %v5832_v39 = vpop.f32.mrf.mxu1 }
 0x2f1   : >> { %8458 = vrcp.f32 %v6477_v30  ;;  %v5792_v29 = vadd.f32 %v5791_v48, %v11043_v63  ;;  %v5833_v57 = vadd.f32 %v5832_v39, %v11043_v63  ;;  %v6525_v48 = vrot.slane %v6490_v24, %v12590_v14 }
 0x2f2   : >> { %8460 = vrcp.f32 %v6476_v0  ;;  %v5793_v1 = vpop.f32.mrf.mxu0  ;;  %v5834_v2 = vpop.f32.mrf.mxu1 }
 0x2f3   : >> { %v6582_v5 = vmin.f32 %v5792_v29, 15.0  ;;  %v8134_v46 = vmul.f32 -1.442695, %v5792_v29  ;;  %v6584_v22 = vmin.f32 %v5833_v57, 15.0  ;;  %v8136_v23 = vmul.f32 -1.442695, %v5833_v57 }
 0x2f4   : >> { %8462 = vrcp.f32 %v6478_v27  ;;  %v5794_v40 = vadd.f32 %v5793_v1, %v11043_v63  ;;  %v5835_v8 = vadd.f32 %v5834_v2, %v11043_v63  ;;  %v5795_v44 = vpop.f32.mrf.mxu0  ;;  %v5836_v9 = vpop.f32.mrf.mxu1  ;;  %v6529_v29 = vrot.slane %v6490_v24, %v12594_v42 }
 0x2f5   : >> { %v6586_v25 = vmul.f32 1.442695, %v6582_v5  ;;  %8464 = vpow2.f32 %v8134_v46  ;;  %v6590_v47 = vmul.f32 1.442695, %v6584_v22  ;;  %v6537_v5 = vrot.slane %v6491_v6, %v12594_v42 }
 0x2f6   : >> { %8466 = vpow2.f32 %v8136_v23  ;;  %v6583_v13 = vmin.f32 %v5794_v40, 15.0  ;;  %v8135_v50 = vmul.f32 -1.442695, %v5794_v40  ;;  %v6585_v20 = vmin.f32 %v5835_v8, 15.0  ;;  %v5796_v49 = vpop.f32.mrf.mxu0  ;;  %v5837_v31 = vpop.f32.mrf.mxu1 }
 0x2f7   : >> { %8468 = vpow2.f32 %v6586_v25  ;;  %v8137_v0 = vmul.f32 -1.442695, %v5835_v8 }
 0x2f8   : >> { %v8449_v3 = vpop.eup %8448  ;;  %8470 = vpow2.f32 %v6590_v47  ;;  %v6588_v30 = vmul.f32 1.442695, %v6583_v13  ;;  %v6592_v16 = vmul.f32 1.442695, %v6585_v20 }
 0x2f9   : >> { %v8451_v28 = vpop.eup %8450  ;;  %v6508_v27 = vsub.f32 1.0, %v8449_v3  ;;  %8472 = vpow2.f32 %v8135_v50 }
 0x2fa   : >> { %v6510_v39 = vsub.f32 1.0, %v8451_v28  ;;  %8474 = vpow2.f32 %v6588_v30 }
 0x2fb   : >> { %v8453_v57 = vpop.eup %8452  ;;  %v6512_v1 = vmul.f32 %v6508_v27, %v11319_v12  ;;  %v6574_v2 = vsub.f32 1.0, %v6508_v27  ;;  %8476 = vpow2.f32 %v6592_v16 }
 0x2fc   : >> { %v8455_v46 = vpop.eup %8454  ;;  %v6514_v22 = vmul.f32 %v6510_v39, %v11322_v62  ;;  %v6576_v23 = vsub.f32 1.0, %v6510_v39  ;;  %v6509_v40 = vsub.f32 1.0, %v8453_v57  ;;  %8478 = vpow2.f32 %v8137_v0 }
 0x2fd   : >> { %v8457_v8 = vpop.eup %8456  ;;  %v11352_v44 = vadd.f32 %v6512_v1, %v11274_v43  ;;  %v6542_v9 = vmul.f32 %v6525_v48, %v6512_v1  ;;  %v6553_v24 = vrot.slane %v6512_v1, %v12590_v14  ;;  %v6511_v25 = vsub.f32 1.0, %v8455_v46 }
 0x2fe   : >> { %v8459_v47 = vpop.eup %8458  ;;  %v11356_v13 = vadd.f32 %v6514_v22, %v11281_v51  ;;  %v6544_v6 = vmul.f32 %v6533_v21, %v6514_v22  ;;  %v6561_v50 = vrot.slane %v6514_v22, %v12590_v14  ;;  %v6513_v20 = vmul.f32 %v6509_v40, %v11324_v26 }
 0x2ff   : >> { %v8461_v49 = vpop.eup %8460  ;;  %v11361_v31 = vadd.f32 %v6542_v9, %v11288_v15  ;;  %v6566_v3 = vmul.f32 %v8457_v8, %v6553_v24  ;;  %v6575_v43 = vsub.f32 1.0, %v6509_v40  ;;  %v6515_v30 = vmul.f32 %v6511_v25, %v11328_v7 }
 0x300   : >> { %v11365_v16 = vadd.f32 %v6544_v6, %v11291_v38  ;;  %v6568_v0 = vmul.f32 %v8459_v47, %v6561_v50  ;;  %v11368_v51 = vadd.f32 %v6513_v20, %v11294_v10  ;;  %v6543_v28 = vmul.f32 %v6529_v29, %v6513_v20 }
 0x301   : >> { %v8463_v27 = vpop.eup %8462  ;;  %v11371_v48 = vadd.f32 %v6566_v3, %v11300_v37  ;;  %v6557_v39 = vrot.slane %v6513_v20, %v12590_v14  ;;  %v11375_v15 = vadd.f32 %v6515_v30, %v11304_v4  ;;  %v6545_v21 = vmul.f32 %v6537_v5, %v6515_v30 }
 0x302   : >> { %v8465_v57 = vpop.eup %8464  ;;  %v11378_v1 = vadd.f32 %v6568_v0, %v11310_v19  ;;  %v11381_v38 = vadd.f32 %v6543_v28, %v11313_v18  ;;  %v6565_v10 = vrot.slane %v6515_v30, %v12590_v14  ;;  %v6577_v29 = vsub.f32 1.0, %v6511_v25 }
 0x303   : >> { %v8467_v46 = vpop.eup %8466  ;;  %v6567_v22 = vmul.f32 %v8461_v49, %v6557_v39  ;;  %v11385_v37 = vadd.f32 %v6545_v21, %v11317_v36  ;;  %v11388_v40 = vmul.f32 %v6574_v2, %v11319_v12  ;;  %v11391_v8 = vmul.f32 %v6576_v23, %v11322_v62 }
 0x304   : >> { %v8469_v4 = vpop.eup %8468  ;;  %v6569_v5 = vmul.f32 %v8463_v27, %v6565_v10  ;;  %v11394_v19 = vmul.f32 %v6575_v43, %v11324_v26  ;;  %v11400_v25 = vmul.f32 %v6577_v29, %v11328_v7  ;;  %v6618_v30 = vstv %s10224_s10 }
 0x305   : >> { %v8471_v18 = vpop.eup %8470  ;;  %v11397_v9 = vadd.f32 %v6567_v22, %v11326_v41  ;;  %v6623_v24 = vsub.f32 0.0, %v8469_v4  ;;  %v6608_v0 = vadd.f32 1.0, %v8467_v46  ;;  %v6619_v39 = vmul.f32 %v6618_v30, %v12595_v35 }
 0x306   : >> { %v8473_v36 = vpop.eup %8472  ;;  %v11403_v12 = vadd.f32 %v6569_v5, %v11330_v17  ;;  %v6625_v2 = vsub.f32 0.0, %v8471_v18  ;;  %v6606_v17 = vadd.f32 1.0, %v8465_v57  ;;  %v6620_v22 = vmul.f32 %v6618_v30, %v12596_v11 }
 0x307   : >> { %v8475_v47 = vpop.eup %8474  ;;  %v6627_v62 = vmul.f32 %v6623_v24, %v11140_v32  ;;  %v6607_v27 = vadd.f32 1.0, %v8473_v36 }
 0x308   : >> { %v8477_v23 = vpop.eup %8476  ;;  %v6629_v26 = vmul.f32 %v6625_v2, %v11148_v33  ;;  %v6624_v6 = vsub.f32 0.0, %v8475_v47  ;;  %v6621_v47 = vadd.f32 %v6619_v39, %v12597_v45 }
 0x309   : >> { %v8479_v50 = vpop.eup %8478  ;;  %v6631_v41 = vmul.f32 1.442695, %v6627_v62  ;;  %v6626_v20 = vsub.f32 0.0, %v8477_v23 }
 0x30a   : >> { %v6635_v49 = vmul.f32 1.442695, %v6629_v26  ;;  %v6628_v7 = vmul.f32 %v6624_v6, %v11159_v59  ;;  %v6609_v21 = vadd.f32 1.0, %v8479_v50  ;;  %v6622_v50 = vadd.f32 %v6620_v22, %v12598_v52 }
 0x30b   : >> { %8480 = vpow2.f32 %v6631_v41  ;;  %v6630_v3 = vmul.f32 %v6626_v20, %v11164_v34 }
 0x30c   : >> { %8482 = vpow2.f32 %v6635_v49  ;;  %v6633_v43 = vmul.f32 1.442695, %v6628_v7  ;;  %v6664_v22 = vrot.slane %v6622_v50, %v12590_v14 }
 0x30d   : >> { %v6637_v28 = vmul.f32 1.442695, %v6630_v3 }
 0x30e   : >> { %8484 = vpow2.f32 %v6633_v43 }
 0x30f   : >> { %8486 = vpow2.f32 %v6637_v28 }
 0x310   : >> { %8488 = vrcp.f32 %v6606_v17  ;;  %v5873_v10 = vpop.f32.mrf.mxu0  ;;  %v5914_v29 = vpop.f32.mrf.mxu1 }
 0x311   : >> { %8490 = vrcp.f32 %v6608_v0  ;;  %v5874_v4 = vadd.f32 %v5873_v10, %v11043_v63  ;;  %v5915_v57 = vadd.f32 %v5914_v29, %v11043_v63  ;;  %v6656_v10 = vrot.slane %v6621_v47, %v12590_v14 }
 0x312   : >> { %8492 = vrcp.f32 %v6607_v27  ;;  %v5875_v5 = vpop.f32.mrf.mxu0  ;;  %v5916_v46 = vpop.f32.mrf.mxu1 }
 0x313   : >> { %v6713_v18 = vmin.f32 %v5874_v4, 15.0  ;;  %v8138_v24 = vmul.f32 -1.442695, %v5874_v4  ;;  %v6715_v36 = vmin.f32 %v5915_v57, 15.0  ;;  %v8140_v2 = vmul.f32 -1.442695, %v5915_v57 }
 0x314   : >> { %8494 = vrcp.f32 %v6609_v21  ;;  %v5876_v62 = vadd.f32 %v5875_v5, %v11043_v63  ;;  %v5917_v23 = vadd.f32 %v5916_v46, %v11043_v63  ;;  %v5877_v26 = vpop.f32.mrf.mxu0  ;;  %v5918_v6 = vpop.f32.mrf.mxu1  ;;  %v6660_v4 = vrot.slane %v6621_v47, %v12594_v42 }
 0x315   : >> { %v6717_v41 = vmul.f32 1.442695, %v6713_v18  ;;  %8496 = vpow2.f32 %v8138_v24  ;;  %v6721_v20 = vmul.f32 1.442695, %v6715_v36  ;;  %v6668_v18 = vrot.slane %v6622_v50, %v12594_v42 }
 0x316   : >> { %8498 = vpow2.f32 %v8140_v2  ;;  %v6714_v49 = vmin.f32 %v5876_v62, 15.0  ;;  %v8139_v7 = vmul.f32 -1.442695, %v5876_v62  ;;  %v6716_v3 = vmin.f32 %v5917_v23, 15.0  ;;  %v5878_v17 = vpop.f32.mrf.mxu0  ;;  %v5919_v43 = vpop.f32.mrf.mxu1 }
 0x317   : >> { %8500 = vpow2.f32 %v6717_v41  ;;  %v8141_v27 = vmul.f32 -1.442695, %v5917_v23 }
 0x318   : >> { %v8481_v30 = vpop.eup %8480  ;;  %8502 = vpow2.f32 %v6721_v20  ;;  %v6719_v0 = vmul.f32 1.442695, %v6714_v49  ;;  %v6723_v28 = vmul.f32 1.442695, %v6716_v3 }
 0x319   : >> { %v8483_v39 = vpop.eup %8482  ;;  %v6639_v21 = vsub.f32 1.0, %v8481_v30  ;;  %8504 = vpow2.f32 %v8139_v7 }
 0x31a   : >> { %v6641_v29 = vsub.f32 1.0, %v8483_v39  ;;  %8506 = vpow2.f32 %v6719_v0 }
 0x31b   : >> { %v8485_v57 = vpop.eup %8484  ;;  %v6643_v5 = vmul.f32 %v6639_v21, %v11388_v40  ;;  %v6705_v46 = vsub.f32 1.0, %v6639_v21  ;;  %8508 = vpow2.f32 %v6723_v28 }
 0x31c   : >> { %v8487_v24 = vpop.eup %8486  ;;  %v6645_v36 = vmul.f32 %v6641_v29, %v11391_v8  ;;  %v6707_v2 = vsub.f32 1.0, %v6641_v29  ;;  %v6640_v62 = vsub.f32 1.0, %v8485_v57  ;;  %8510 = vpow2.f32 %v8141_v27 }
 0x31d   : >> { %v8489_v23 = vpop.eup %8488  ;;  %v11425_v26 = vadd.f32 %v6643_v5, %v11352_v44  ;;  %v6673_v6 = vmul.f32 %v6656_v10, %v6643_v5  ;;  %v6684_v47 = vrot.slane %v6643_v5, %v12590_v14  ;;  %v6642_v41 = vsub.f32 1.0, %v8487_v24 }
 0x31e   : >> { %v8491_v20 = vpop.eup %8490  ;;  %v11429_v49 = vadd.f32 %v6645_v36, %v11356_v13  ;;  %v6675_v50 = vmul.f32 %v6664_v22, %v6645_v36  ;;  %v6692_v7 = vrot.slane %v6645_v36, %v12590_v14  ;;  %v6644_v3 = vmul.f32 %v6640_v62, %v11394_v19 }
 0x31f   : >> { %v8493_v17 = vpop.eup %8492  ;;  %v11434_v43 = vadd.f32 %v6673_v6, %v11361_v31  ;;  %v6697_v30 = vmul.f32 %v8489_v23, %v6684_v47  ;;  %v6706_v44 = vsub.f32 1.0, %v6640_v62  ;;  %v6646_v0 = vmul.f32 %v6642_v41, %v11400_v25 }
 0x320   : >> { %v11438_v28 = vadd.f32 %v6675_v50, %v11365_v16  ;;  %v6699_v27 = vmul.f32 %v8491_v20, %v6692_v7  ;;  %v11441_v13 = vadd.f32 %v6644_v3, %v11368_v51  ;;  %v6674_v39 = vmul.f32 %v6660_v4, %v6644_v3 }
 0x321   : >> { %v8495_v21 = vpop.eup %8494  ;;  %v11444_v10 = vadd.f32 %v6697_v30, %v11371_v48  ;;  %v6688_v29 = vrot.slane %v6644_v3, %v12590_v14  ;;  %v11448_v31 = vadd.f32 %v6646_v0, %v11375_v15  ;;  %v6676_v22 = vmul.f32 %v6668_v18, %v6646_v0 }
 0x322   : >> { %v8497_v57 = vpop.eup %8496  ;;  %v11451_v5 = vadd.f32 %v6699_v27, %v11378_v1  ;;  %v11454_v16 = vadd.f32 %v6674_v39, %v11381_v38  ;;  %v6696_v51 = vrot.slane %v6646_v0, %v12590_v14  ;;  %v6708_v4 = vsub.f32 1.0, %v6642_v41 }
 0x323   : >> { %v8499_v24 = vpop.eup %8498  ;;  %v6698_v36 = vmul.f32 %v8493_v17, %v6688_v29  ;;  %v11458_v48 = vadd.f32 %v6676_v22, %v11385_v37  ;;  %v11461_v62 = vmul.f32 %v6705_v46, %v11388_v40  ;;  %v11464_v23 = vmul.f32 %v6707_v2, %v11391_v8 }
 0x324   : >> { %v8501_v15 = vpop.eup %8500  ;;  %v6700_v18 = vmul.f32 %v8495_v21, %v6696_v51  ;;  %v11467_v1 = vmul.f32 %v6706_v44, %v11394_v19  ;;  %v11473_v41 = vmul.f32 %v6708_v4, %v11400_v25  ;;  %v6749_v0 = vstv %s10376_s17  ;;  %s12653_s17 = sand.u32 (%p11787_p7), 1, %s8748_s22  }
 0x325   : >> { %v8503_v38 = vpop.eup %8502  ;;  %v11470_v6 = vadd.f32 %v6698_v36, %v11397_v9  ;;  %v6754_v47 = vsub.f32 0.0, %v8501_v15  ;;  %v6739_v27 = vadd.f32 1.0, %v8499_v24  ;;  %v6750_v29 = vmul.f32 %v6749_v0, %v12595_v35 }
 0x326   : >> { %v8505_v37 = vpop.eup %8504  ;;  %v11476_v40 = vadd.f32 %v6700_v18, %v11403_v12  ;;  %v6756_v46 = vsub.f32 0.0, %v8503_v38  ;;  %v6737_v12 = vadd.f32 1.0, %v8497_v57  ;;  %v6751_v36 = vmul.f32 %v6749_v0, %v12596_v11 }
 0x327   : >> { %v8507_v20 = vpop.eup %8506  ;;  %v6758_v8 = vmul.f32 %v6754_v47, %v11140_v32  ;;  %v6738_v21 = vadd.f32 1.0, %v8505_v37 }
 0x328   : >> { %v8509_v2 = vpop.eup %8508  ;;  %v6760_v19 = vmul.f32 %v6756_v46, %v11148_v33  ;;  %v6755_v50 = vsub.f32 0.0, %v8507_v20  ;;  %v6752_v20 = vadd.f32 %v6750_v29, %v12597_v45 }
 0x329   : >> { %v8511_v7 = vpop.eup %8510  ;;  %v6762_v9 = vmul.f32 1.442695, %v6758_v8  ;;  %v6757_v3 = vsub.f32 0.0, %v8509_v2 }
 0x32a   : >> { %v6766_v17 = vmul.f32 1.442695, %v6760_v19  ;;  %v6759_v25 = vmul.f32 %v6755_v50, %v11159_v59  ;;  %v6740_v22 = vadd.f32 1.0, %v8511_v7  ;;  %v6753_v7 = vadd.f32 %v6751_v36, %v12598_v52 }
 0x32b   : >> { %8512 = vpow2.f32 %v6762_v9  ;;  %v6761_v30 = vmul.f32 %v6757_v3, %v11164_v34 }
 0x32c   : >> { %8514 = vpow2.f32 %v6766_v17  ;;  %v6764_v44 = vmul.f32 1.442695, %v6759_v25  ;;  %v6795_v36 = vrot.slane %v6753_v7, %v12590_v14 }
 0x32d   : >> { %v6768_v39 = vmul.f32 1.442695, %v6761_v30 }
 0x32e   : >> { %8516 = vpow2.f32 %v6764_v44 }
 0x32f   : >> { %8518 = vpow2.f32 %v6768_v39 }
 0x330   : >> { %8520 = vrcp.f32 %v6737_v12  ;;  %v5955_v51 = vpop.f32.mrf.mxu0  ;;  %v5996_v4 = vpop.f32.mrf.mxu1 }
 0x331   : >> { %8522 = vrcp.f32 %v6739_v27  ;;  %v5956_v15 = vadd.f32 %v5955_v51, %v11043_v63  ;;  %v5997_v57 = vadd.f32 %v5996_v4, %v11043_v63  ;;  %v6787_v51 = vrot.slane %v6752_v20, %v12590_v14 }
 0x332   : >> { %8524 = vrcp.f32 %v6738_v21  ;;  %v5957_v18 = vpop.f32.mrf.mxu0  ;;  %v5998_v24 = vpop.f32.mrf.mxu1 }
 0x333   : >> { %v6844_v38 = vmin.f32 %v5956_v15, 15.0  ;;  %v8142_v47 = vmul.f32 -1.442695, %v5956_v15  ;;  %v6846_v37 = vmin.f32 %v5997_v57, 15.0  ;;  %v8144_v46 = vmul.f32 -1.442695, %v5997_v57 }
 0x334   : >> { %8526 = vrcp.f32 %v6740_v22  ;;  %v5958_v8 = vadd.f32 %v5957_v18, %v11043_v63  ;;  %v5999_v2 = vadd.f32 %v5998_v24, %v11043_v63  ;;  %v5959_v19 = vpop.f32.mrf.mxu0  ;;  %v6000_v50 = vpop.f32.mrf.mxu1  ;;  %v6791_v15 = vrot.slane %v6752_v20, %v12594_v42 }
 0x335   : >> { %v6848_v9 = vmul.f32 1.442695, %v6844_v38  ;;  %8528 = vpow2.f32 %v8142_v47  ;;  %v6852_v3 = vmul.f32 1.442695, %v6846_v37  ;;  %v6799_v38 = vrot.slane %v6753_v7, %v12594_v42 }
 0x336   : >> { %8530 = vpow2.f32 %v8144_v46  ;;  %v6845_v17 = vmin.f32 %v5958_v8, 15.0  ;;  %v8143_v25 = vmul.f32 -1.442695, %v5958_v8  ;;  %v6847_v30 = vmin.f32 %v5999_v2, 15.0  ;;  %v5960_v12 = vpop.f32.mrf.mxu0  ;;  %v6001_v44 = vpop.f32.mrf.mxu1 }
 0x337   : >> { %8532 = vpow2.f32 %v6848_v9  ;;  %v8145_v21 = vmul.f32 -1.442695, %v5999_v2 }
 0x338   : >> { %v8513_v0 = vpop.eup %8512  ;;  %8534 = vpow2.f32 %v6852_v3  ;;  %v6850_v27 = vmul.f32 1.442695, %v6845_v17  ;;  %v6854_v39 = vmul.f32 1.442695, %v6847_v30 }
 0x339   : >> { %v8515_v29 = vpop.eup %8514  ;;  %v6770_v22 = vsub.f32 1.0, %v8513_v0  ;;  %8536 = vpow2.f32 %v8143_v25 }
 0x33a   : >> { %v6772_v4 = vsub.f32 1.0, %v8515_v29  ;;  %8538 = vpow2.f32 %v6850_v27 }
 0x33b   : >> { %v8517_v57 = vpop.eup %8516  ;;  %v6774_v18 = vmul.f32 %v6770_v22, %v11461_v62  ;;  %v6836_v24 = vsub.f32 1.0, %v6770_v22  ;;  %8540 = vpow2.f32 %v6854_v39 }
 0x33c   : >> { %v8519_v47 = vpop.eup %8518  ;;  %v6776_v37 = vmul.f32 %v6772_v4, %v11464_v23  ;;  %v6838_v46 = vsub.f32 1.0, %v6772_v4  ;;  %v6771_v8 = vsub.f32 1.0, %v8517_v57  ;;  %8542 = vpow2.f32 %v8145_v21 }
 0x33d   : >> { %v8521_v2 = vpop.eup %8520  ;;  %v11498_v19 = vadd.f32 %v6774_v18, %v11425_v26  ;;  %v6804_v50 = vmul.f32 %v6787_v51, %v6774_v18  ;;  %v6815_v20 = vrot.slane %v6774_v18, %v12590_v14  ;;  %v6773_v9 = vsub.f32 1.0, %v8519_v47 }
 0x33e   : >> { %v8523_v3 = vpop.eup %8522  ;;  %v11502_v17 = vadd.f32 %v6776_v37, %v11429_v49  ;;  %v6806_v7 = vmul.f32 %v6795_v36, %v6776_v37  ;;  %v6823_v25 = vrot.slane %v6776_v37, %v12590_v14  ;;  %v6775_v30 = vmul.f32 %v6771_v8, %v11467_v1 }
 0x33f   : >> { %v8525_v12 = vpop.eup %8524  ;;  %v11507_v44 = vadd.f32 %v6804_v50, %v11434_v43  ;;  %v6828_v0 = vmul.f32 %v8521_v2, %v6815_v20  ;;  %v6837_v26 = vsub.f32 1.0, %v6771_v8  ;;  %v6777_v27 = vmul.f32 %v6773_v9, %v11473_v41 }
 0x340   : >> { %v11511_v39 = vadd.f32 %v6806_v7, %v11438_v28  ;;  %v6830_v21 = vmul.f32 %v8523_v3, %v6823_v25  ;;  %v11514_v49 = vadd.f32 %v6775_v30, %v11441_v13  ;;  %v6805_v29 = vmul.f32 %v6791_v15, %v6775_v30 }
 0x341   : >> { %v8527_v22 = vpop.eup %8526  ;;  %v11517_v51 = vadd.f32 %v6828_v0, %v11444_v10  ;;  %v6819_v4 = vrot.slane %v6775_v30, %v12590_v14  ;;  %v11521_v43 = vadd.f32 %v6777_v27, %v11448_v31  ;;  %v6807_v36 = vmul.f32 %v6799_v38, %v6777_v27 }
 0x342   : >> { %v8529_v57 = vpop.eup %8528  ;;  %v11524_v18 = vadd.f32 %v6830_v21, %v11451_v5  ;;  %v11527_v28 = vadd.f32 %v6805_v29, %v11454_v16  ;;  %v6827_v13 = vrot.slane %v6777_v27, %v12590_v14  ;;  %v6839_v15 = vsub.f32 1.0, %v6773_v9 }
 0x343   : >> { %v8531_v47 = vpop.eup %8530  ;;  %v6829_v37 = vmul.f32 %v8525_v12, %v6819_v4  ;;  %v11531_v10 = vadd.f32 %v6807_v36, %v11458_v48  ;;  %v11534_v8 = vmul.f32 %v6836_v24, %v11461_v62  ;;  %v11537_v2 = vmul.f32 %v6838_v46, %v11464_v23 }
 0x344   : >> { %v8533_v31 = vpop.eup %8532  ;;  %v6831_v38 = vmul.f32 %v8527_v22, %v6827_v13  ;;  %v11540_v5 = vmul.f32 %v6837_v26, %v11467_v1  ;;  %v11546_v9 = vmul.f32 %v6839_v15, %v11473_v41  ;;  %v6868_v26 = vadd.f32 1.0, %v8529_v57 }
 0x345   : >> { %v8535_v16 = vpop.eup %8534  ;;  %v11543_v50 = vadd.f32 %v6829_v37, %v11470_v6  ;;  %v6885_v20 = vsub.f32 0.0, %v8533_v31  ;;  %v6880_v27 = vstv %s10528_s19  ;;  %v6870_v29 = vadd.f32 1.0, %v8531_v47  ;;  %s7398_s19 = scalar_lea.sflag (%p11787_p7), [#allocation4], %s12653_s17 }
 0x346   : >> { %v8537_v48 = vpop.eup %8536  ;;  %v11549_v62 = vadd.f32 %v6831_v38, %v11476_v40  ;;  %v6887_v24 = vsub.f32 0.0, %v8535_v16  ;;  %v6881_v22 = vmul.f32 %v6880_v27, %v12595_v35  ;;  %v6882_v38 = vmul.f32 %v6880_v27, %v12596_v11 }
 0x347   : >> { %v8539_v3 = vpop.eup %8538  ;;  %v6889_v23 = vmul.f32 %v6885_v20, %v11140_v32  ;;  %v6869_v4 = vadd.f32 1.0, %v8537_v48 }
 0x348   : >> { %v8541_v46 = vpop.eup %8540  ;;  %v6891_v1 = vmul.f32 %v6887_v24, %v11148_v33  ;;  %v6886_v7 = vsub.f32 0.0, %v8539_v3  ;;  %v6883_v3 = vadd.f32 %v6881_v22, %v12597_v45 }
 0x349   : >> { %v8543_v25 = vpop.eup %8542  ;;  %v6893_v6 = vmul.f32 1.442695, %v6889_v23  ;;  %v6888_v30 = vsub.f32 0.0, %v8541_v46 }
 0x34a   : >> { %v6897_v12 = vmul.f32 1.442695, %v6891_v1  ;;  %v6890_v41 = vmul.f32 %v6886_v7, %v11159_v59  ;;  %v6871_v15 = vadd.f32 1.0, %v8543_v25 }
 0x34b   : >> { %8544 = vpow2.f32 %v6893_v6  ;;  %v6892_v0 = vmul.f32 %v6888_v30, %v11164_v34  ;;  %v6884_v30 = vadd.f32 %v6882_v38, %v12598_v52 }
 0x34c   : >> { %8546 = vpow2.f32 %v6897_v12  ;;  %v6895_v40 = vmul.f32 1.442695, %v6890_v41 }
 0x34d   : >> { %v6899_v21 = vmul.f32 1.442695, %v6892_v0 }
 0x34e   : >> { %8548 = vpow2.f32 %v6895_v40 }
 0x34f   : >> { %8550 = vpow2.f32 %v6899_v21 }
 0x350   : >> { %v6037_v36 = vpop.f32.mrf.mxu0  ;;  %v6078_v13 = vpop.f32.mrf.mxu1  ;;  %8552 = vrcp.f32 %v6868_v26 }
 0x351   : >> { %v6038_v37 = vadd.f32 %v6037_v36, %v11043_v63  ;;  %v6079_v31 = vadd.f32 %v6078_v13, %v11043_v63  ;;  %8554 = vrcp.f32 %v6870_v29  ;;  %v6918_v36 = vrot.slane %v6883_v3, %v12590_v14 }
 0x352   : >> { %v6039_v57 = vpop.f32.mrf.mxu0  ;;  %v6080_v16 = vpop.f32.mrf.mxu1  ;;  %8556 = vrcp.f32 %v6869_v4 }
 0x353   : >> { %v6975_v20 = vmin.f32 %v6038_v37, 15.0  ;;  %v8146_v47 = vmul.f32 -1.442695, %v6038_v37  ;;  %v6977_v24 = vmin.f32 %v6079_v31, 15.0  ;;  %v6040_v48 = vadd.f32 %v6039_v57, %v11043_v63 }
 0x354   : >> { %v6081_v23 = vadd.f32 %v6080_v16, %v11043_v63  ;;  %v6041_v46 = vpop.f32.mrf.mxu0  ;;  %v6082_v1 = vpop.f32.mrf.mxu1  ;;  %8558 = vrcp.f32 %v6871_v15  ;;  %v8148_v6 = vmul.f32 -1.442695, %v6079_v31  ;;  %v6926_v15 = vrot.slane %v6884_v30, %v12590_v14 }
 0x355   : >> { %v6979_v7 = vmul.f32 1.442695, %v6975_v20  ;;  %v6983_v25 = vmul.f32 1.442695, %v6977_v24  ;;  %8560 = vpow2.f32 %v8146_v47  ;;  %v6976_v12 = vmin.f32 %v6040_v48, 15.0 }
 0x356   : >> { %v6978_v41 = vmin.f32 %v6081_v23, 15.0  ;;  %v6042_v0 = vpop.f32.mrf.mxu0  ;;  %v6083_v40 = vpop.f32.mrf.mxu1  ;;  %v8147_v21 = vmul.f32 -1.442695, %v6040_v48  ;;  %v6922_v37 = vrot.slane %v6883_v3, %v12594_v42  ;;  %v6930_v57 = vrot.slane %v6884_v30, %v12594_v42 }
 0x357   : >> { %8562 = vpow2.f32 %v6979_v7  ;;  %v6981_v27 = vmul.f32 1.442695, %v6976_v12  ;;  %v8149_v16 = vmul.f32 -1.442695, %v6081_v23 }
 0x358   : >> { %v8545_v26 = vpop.eup %8544  ;;  %8564 = vpow2.f32 %v6983_v25  ;;  %v6985_v29 = vmul.f32 1.442695, %v6978_v41 }
 0x359   : >> { %v8547_v22 = vpop.eup %8546  ;;  %v6901_v4 = vsub.f32 1.0, %v8545_v26  ;;  %8566 = vpow2.f32 %v8148_v6 }
 0x35a   : >> { %v6903_v13 = vsub.f32 1.0, %v8547_v22  ;;  %8568 = vpow2.f32 %v6981_v27 }
 0x35b   : >> { %v11567_v31 = vpop.eup %8548  ;;  %v6905_v38 = vmul.f32 %v6901_v4, %v11534_v8  ;;  %8570 = vpow2.f32 %v6985_v29  ;;  %v6967_v47 = vsub.f32 1.0, %v6901_v4 }
 0x35c   : >> { %v11571_v20 = vpop.eup %8550  ;;  %v6907_v24 = vmul.f32 %v6903_v13, %v11537_v2  ;;  %v6902_v48 = vsub.f32 1.0, %v11567_v31  ;;  %8572 = vpow2.f32 %v8147_v21  ;;  %v6969_v40 = vsub.f32 1.0, %v6903_v13 }
 0x35d   : >> { %v11576_v46 = vadd.f32 %v6905_v38, %v11498_v19  ;;  %v6935_v3 = vmul.f32 %v6918_v36, %v6905_v38  ;;  %v6946_v1 = vrot.slane %v6905_v38, %v12590_v14  ;;  %v6904_v7 = vsub.f32 1.0, %v11571_v20  ;;  %v8553_v25 = vpop.eup %8552 }
 0x35e   : >> { %v11581_v6 = vadd.f32 %v6907_v24, %v11502_v17  ;;  %v6937_v23 = vmul.f32 %v6926_v15, %v6907_v24  ;;  %v6954_v30 = vrot.slane %v6907_v24, %v12590_v14  ;;  %v6906_v12 = vmul.f32 %v6902_v48, %v11540_v5  ;;  %v8555_v41 = vpop.eup %8554 }
 0x35f   : >> { %v11588_v19 = vadd.f32 %v6935_v3, %v11507_v44  ;;  %v6959_v0 = vmul.f32 %v8553_v25, %v6946_v1  ;;  %v6908_v26 = vmul.f32 %v6904_v7, %v11546_v9  ;;  %v8557_v22 = vpop.eup %8556  ;;  %8574 = vpow2.f32 %v8149_v16 }
 0x360   : >> { %v11594_v17 = vadd.f32 %v6937_v23, %v11511_v39  ;;  %v6961_v27 = vmul.f32 %v8555_v41, %v6954_v30  ;;  %v11597_v21 = vadd.f32 %v6906_v12, %v11514_v49  ;;  %v6936_v29 = vmul.f32 %v6922_v37, %v6906_v12 }
 0x361   : >> { %v11600_v4 = vadd.f32 %v6959_v0, %v11517_v51  ;;  %v6950_v44 = vrot.slane %v6906_v12, %v12590_v14  ;;  %v11604_v36 = vadd.f32 %v6908_v26, %v11521_v43  ;;  %v6938_v13 = vmul.f32 %v6930_v57, %v6908_v26  ;;  %v8559_v15 = vpop.eup %8558 }
 0x362   : >> { %v11607_v38 = vadd.f32 %v6961_v27, %v11524_v18  ;;  %v11610_v39 = vadd.f32 %v6936_v29, %v11527_v28  ;;  %v6958_v49 = vrot.slane %v6908_v26, %v12590_v14  ;;  %v8561_v37 = vpop.eup %8560  ;;  %v11617_v3 = vmul.f32 %v6967_v47, %v11534_v8 }
 0x363   : >> { %v6960_v24 = vmul.f32 %v8557_v22, %v6950_v44  ;;  %v11614_v51 = vadd.f32 %v6938_v13, %v11531_v10  ;;  %v11620_v1 = vmul.f32 %v6969_v40, %v11537_v2  ;;  %v7011_v29 = vstv %s10674_s28  ;;  %s8628_s28 = scalar_lea.vmem (%p11787_p7), %s11904_s12, 512 }
 0x364   : >> { %v8563_v43 = vpop.eup %8562  ;;  %v6962_v57 = vmul.f32 %v8559_v15, %v6958_v49  ;;  %v6999_v22 = vadd.f32 1.0, %v8561_v37  ;;  %v7012_v49 = vmul.f32 %v7011_v29, %v12595_v35  ;;  %p8629_p8 = scmp.ne.s32.totalorder (%p11787_p7), %s11904_s12, %s8628_s28 }
 0x365   : >> { %v8565_v18 = vpop.eup %8564  ;;  %v11623_v28 = vadd.f32 %v6960_v24, %v11543_v50  ;;  %v7016_v25 = vsub.f32 0.0, %v8563_v43  ;;  %v7013_v24 = vmul.f32 %v7011_v29, %v12596_v11 }
 0x366   : >> { %v8567_v16 = vpop.eup %8566  ;;  %v11626_v23 = vadd.f32 %v6962_v57, %v11549_v62  ;;  %v7018_v10 = vsub.f32 0.0, %v8565_v18  ;;  %p8630_p9 = pnand (%p11787_p7), %p8629_p8, %p8904_p5 }
 0x367   : >> { %v8569_v30 = vpop.eup %8568  ;;  %v7020_v8 = vmul.f32 %v7016_v25, %v11140_v32  ;;  %v7001_v13 = vadd.f32 1.0, %v8567_v16  ;;  %v11638_v16 = vadd.f32 %v7012_v49, %v12597_v45  ;;  %v6970_v49 = vsub.f32 1.0, %v6904_v7 }
 0x368   : >> { %v8571_v47 = vpop.eup %8570  ;;  %v7022_v12 = vmul.f32 %v7018_v10, %v11148_v33  ;;  %v7017_v41 = vsub.f32 0.0, %v8569_v30  ;;  %p8631_p10 = pneg (%p11787_p7), %p8630_p9 }
 0x369   : >> { %v8573_v2 = vpop.eup %8572  ;;  %v7024_v0 = vmul.f32 1.442695, %v7020_v8  ;;  %v7019_v40 = vsub.f32 0.0, %v8571_v47  ;;  %v7053_v20 = vrot.slane %v11638_v16, %v12594_v42 }
 0x36a   : >> { %v7028_v26 = vmul.f32 1.442695, %v7022_v12  ;;  %v7021_v50 = vmul.f32 %v7017_v41, %v11159_v59  ;;  %v7000_v18 = vadd.f32 1.0, %v8573_v2  ;;  %v11641_v41 = vadd.f32 %v7013_v24, %v12598_v52 }
 0x36b   : >> { %8576 = vpow2.f32 %v7024_v0  ;;  %v7023_v27 = vmul.f32 %v7019_v40, %v11164_v34 }
 0x36c   : >> { %8578 = vpow2.f32 %v7028_v26  ;;  %v7026_v62 = vmul.f32 1.442695, %v7021_v50  ;;  %v8575_v15 = vpop.eup %8574 }
 0x36d   : >> { %v7030_v44 = vmul.f32 1.442695, %v7023_v27  ;;  %v7002_v30 = vadd.f32 1.0, %v8575_v15 }
 0x36e   : >> { %8580 = vpow2.f32 %v7026_v62  ;;  %v6968_v62 = vsub.f32 1.0, %v6902_v48 }
 0x36f   : >> { %8582 = vpow2.f32 %v7030_v44 }
 0x370   : >> { %v6119_v43 = vpop.f32.mrf.mxu0  ;;  %v6160_v57 = vpop.f32.mrf.mxu1  ;;  %8584 = vrcp.f32 %v6999_v22 }
 0x371   : >> { %v6120_v25 = vadd.f32 %v6119_v43, %v11043_v63  ;;  %v6161_v10 = vadd.f32 %v6160_v57, %v11043_v63  ;;  %8586 = vrcp.f32 %v7001_v13 }
 0x372   : >> { %v6121_v37 = vpop.f32.mrf.mxu0  ;;  %v6162_v8 = vpop.f32.mrf.mxu1  ;;  %8588 = vrcp.f32 %v7000_v18 }
 0x373   : >> { %v7106_v47 = vmin.f32 %v6120_v25, 15.0  ;;  %v7108_v12 = vmin.f32 %v6161_v10, 15.0  ;;  %v6122_v0 = vadd.f32 %v6121_v37, %v11043_v63  ;;  %v6163_v2 = vadd.f32 %v6162_v8, %v11043_v63 }
 0x374   : >> { %v6123_v40 = vpop.f32.mrf.mxu0  ;;  %v6164_v26 = vpop.f32.mrf.mxu1  ;;  %v8150_v27 = vmul.f32 -1.442695, %v6120_v25  ;;  %8590 = vrcp.f32 %v7002_v30  ;;  %v7049_v63 = vrot.slane %v11638_v16, %v12590_v14  ;;  %v8152_v43 = vmul.f32 -1.442695, %v6161_v10 }
 0x375   : >> { %v7110_v50 = vmul.f32 1.442695, %v7106_v47  ;;  %v7114_v29 = vmul.f32 1.442695, %v7108_v12  ;;  %v7107_v22 = vmin.f32 %v6122_v0, 15.0  ;;  %v7109_v44 = vmin.f32 %v6163_v2, 15.0 }
 0x376   : >> { %v6124_v13 = vpop.f32.mrf.mxu0  ;;  %v6165_v15 = vpop.f32.mrf.mxu1  ;;  %v7057_v25 = vrot.slane %v11641_v41, %v12590_v14  ;;  %v11662_v30 = vmul.f32 %v6968_v62, %v11540_v5  ;;  %v7061_v10 = vrot.slane %v11641_v41, %v12594_v42  ;;  %v11672_v47 = vmul.f32 %v6970_v49, %v11546_v9 }
 0x377   : >> { %8592 = vpow2.f32 %v7110_v50  ;;  %v7112_v57 = vmul.f32 1.442695, %v7107_v22  ;;  %v7116_v18 = vmul.f32 1.442695, %v7109_v44  ;;  %v8151_v16 = vmul.f32 -1.442695, %v6122_v0 }
 0x378   : >> { %v11651_v24 = vpop.eup %8576  ;;  %8594 = vpow2.f32 %v7114_v29  ;;  %v8153_v40 = vmul.f32 -1.442695, %v6163_v2 }
 0x379   : >> { %v11653_v31 = vpop.eup %8578  ;;  %v7032_v48 = vsub.f32 1.0, %v11651_v24  ;;  %8596 = vpow2.f32 %v8150_v27 }
 0x37a   : >> { %v7034_v7 = vsub.f32 1.0, %v11653_v31  ;;  %8598 = vpow2.f32 %v7112_v57 }
 0x37b   : >> { %v11666_v37 = vpop.eup %8580  ;;  %v7036_v8 = vmul.f32 %v7032_v48, %v11617_v3  ;;  %8600 = vpow2.f32 %v7116_v18 }
 0x37c   : >> { %v11674_v12 = vpop.eup %8582  ;;  %v7038_v5 = vmul.f32 %v7034_v7, %v11620_v1  ;;  %v7033_v41 = vsub.f32 1.0, %v11666_v37  ;;  %8602 = vpow2.f32 %v8152_v43 }
 0x37d   : >> { %v11681_v26 = vadd.f32 %v7036_v8, %v11576_v46  ;;  %v7066_v50 = vmul.f32 %v7049_v63, %v7036_v8  ;;  %v7077_v27 = vrot.slane %v7036_v8, %v12590_v14  ;;  %v7035_v9 = vsub.f32 1.0, %v11674_v12  ;;  %v8585_v0 = vpop.eup %8584 }
 0x37e   : >> { %v11686_v29 = vadd.f32 %v7038_v5, %v11581_v6  ;;  %v7068_v62 = vmul.f32 %v7057_v25, %v7038_v5  ;;  %v7085_v22 = vrot.slane %v7038_v5, %v12590_v14  ;;  %v7037_v44 = vmul.f32 %v7033_v41, %v11662_v30  ;;  %v8587_v2 = vpop.eup %8586 }
 0x37f   : >> { %v11693_v46 = vadd.f32 %v7066_v50, %v11588_v19  ;;  %v7090_v13 = vmul.f32 %v8585_v0, %v7077_v27  ;;  %v7039_v15 = vmul.f32 %v7035_v9, %v11672_v47  ;;  %8604 = vpow2.f32 %v8151_v16  ;;  %v8589_v8 = vpop.eup %8588 }
 0x380   : >> { %v11699_v6 = vadd.f32 %v7068_v62, %v11594_v17  ;;  %v7092_v49 = vmul.f32 %v8587_v2, %v7085_v22  ;;  %v11702_v63 = vadd.f32 %v7037_v44, %v11597_v21  ;;  %v7067_v43 = vmul.f32 %v7053_v20, %v7037_v44 }
 0x381   : >> { %v11705_v57 = vadd.f32 %v7090_v13, %v11600_v4  ;;  %v7081_v19 = vrot.slane %v7037_v44, %v12590_v14  ;;  %v11709_v18 = vadd.f32 %v7039_v15, %v11604_v36  ;;  %v7069_v25 = vmul.f32 %v7061_v10, %v7039_v15  ;;  %v8591_v5 = vpop.eup %8590 }
 0x382   : >> { %v11712_v16 = vadd.f32 %v7092_v49, %v11607_v38  ;;  %v11715_v17 = vadd.f32 %v7067_v43, %v11610_v39  ;;  %v7089_v21 = vrot.slane %v7039_v15, %v12590_v14  ;;  %8606 = vpow2.f32 %v8153_v40 }
 0x383   : >> { %v7091_v20 = vmul.f32 %v8589_v8, %v7081_v19  ;;  %v11719_v4 = vadd.f32 %v7069_v25, %v11614_v51 }
 0x384   : >> { %v8593_v50 = vpop.eup %8592  ;;  %v7093_v27 = vmul.f32 %v8591_v5, %v7089_v21 }
 0x385   : >> { %v8595_v36 = vpop.eup %8594  ;;  %v11722_v10 = vadd.f32 %v7091_v20, %v11623_v28  ;;  %v7147_v0 = vsub.f32 0.0, %v8593_v50 }
 0x386   : >> { %v8597_v38 = vpop.eup %8596  ;;  %v11725_v62 = vadd.f32 %v7093_v27, %v11626_v23  ;;  %v7149_v39 = vsub.f32 0.0, %v8595_v36 }
 0x387   : >> { %v8599_v22 = vpop.eup %8598  ;;  %v7151_v44 = vmul.f32 %v7147_v0, %v11140_v32  ;;  %v7130_v8 = vadd.f32 1.0, %v8597_v38  ;;  %v7142_v32 = vstv %s10821_s15  ;;  %v7100_v0 = vsub.f32 1.0, %v7034_v7  ;;  %s8830_s15 = smov (%p11787_p7), [#allocation3]  }
 0x388   : >> { %v8601_v2 = vpop.eup %8600  ;;  %v7153_v51 = vmul.f32 %v7149_v39, %v11148_v33  ;;  %v7148_v13 = vsub.f32 0.0, %v8599_v22  ;;  %v7143_v20 = vmul.f32 %v7142_v32, %v12595_v35  ;;  %v7099_v35 = vsub.f32 1.0, %v7033_v41  ;;  %s8632_s0 = sshll.u32 (%p11787_p7), %s8830_s15, 4  ;;  %s8633_s0 = int_to_ptr.vmem [resolvable:$false] %s8632_s0 }
 0x389   : >> { %v8603_v15 = vpop.eup %8602  ;;  %v7155_v40 = vmul.f32 1.442695, %v7151_v44  ;;  %v7150_v49 = vsub.f32 0.0, %v8601_v2  ;;  %s8634_s1 = scalar_lea.vmem (%p11787_p7), %s8633_s0, 1024  ;;  %p8635_p11 = scmp.lt.s32.totalorder (%p11787_p7), %s11904_s12, %s8633_s0 }
 0x38a   : >> { %v7159_v43 = vmul.f32 1.442695, %v7153_v51  ;;  %v7152_v28 = vmul.f32 %v7148_v13, %v11159_v59  ;;  %v7132_v5 = vadd.f32 1.0, %v8603_v15  ;;  %v7144_v59 = vmul.f32 %v7142_v32, %v12596_v11  ;;  %p8636_p12 = scmp.lt.s32.totalorder (%p11787_p7), %s8634_s1, %s8628_s28 }
 0x38b   : >> { %8608 = vpow2.f32 %v7155_v40  ;;  %v7154_v19 = vmul.f32 %v7150_v49, %v11164_v34  ;;  %v7098_v34 = vsub.f32 1.0, %v7032_v48  ;;  %v7145_v36 = vadd.f32 %v7143_v20, %v12597_v45  ;;  %v12648_v45 = vld [vmem:[#allocation27_spill] sm:$0xff] (%p11787_p7) }
 0x38c   : >> { %v8605_v23 = vpop.eup %8604  ;;  %8610 = vpow2.f32 %v7159_v43  ;;  %v7157_v25 = vmul.f32 1.442695, %v7152_v28  ;;  %v7146_v38 = vadd.f32 %v7144_v59, %v12598_v52  ;;  %v7104_v48 = vmul.f32 %v7100_v0, %v11620_v1  ;;  %p8637_p13 = por (%p11787_p7), %p8636_p12, %p8635_p11 }
 0x38d   : >> { %v7161_v21 = vmul.f32 1.442695, %v7154_v19  ;;  %v7131_v50 = vadd.f32 1.0, %v8605_v23  ;;  %v7102_v11 = vmul.f32 %v7098_v34, %v11617_v3  ;;  %v7180_v24 = vrot.slane %v7145_v36, %v12590_v14 }
 0x38e   : >> { %8612 = vpow2.f32 %v7157_v25  ;;  %v7188_v51 = vrot.slane %v7146_v38, %v12590_v14  ;;  %v7184_v31 = vrot.slane %v7145_v36, %v12594_v42  ;;  %v7101_v13 = vsub.f32 1.0, %v7035_v9  ;;  %p8638_p0 = pnand (%p11787_p7), %p8637_p13, %p8631_p10 }
 0x38f   : >> { %8614 = vpow2.f32 %v7161_v21  ;;  %v8607_v33 = vpop.eup %8606  ;;  %v7192_v15 = vrot.slane %v7146_v38, %v12594_v42  ;;  %v7103_v49 = vmul.f32 %v7099_v35, %v11662_v30 }
 0x390   : >> { %8616 = vrcp.f32 %v7130_v8  ;;  %v7133_v27 = vadd.f32 1.0, %v8607_v33 }
 0x391   : >> { %8618 = vrcp.f32 %v7132_v5 }
 0x392   : >> { %8620 = vrcp.f32 %v7131_v50 }
 0x393   : >> { %8622 = vrcp.f32 %v7133_v27  ;;  %v7105_v27 = vmul.f32 %v7101_v13, %v11672_v47 }
 0x398   : >> { %v8609_v39 = vpop.eup %8608 }
 0x399   : >> { %v8611_v22 = vpop.eup %8610  ;;  %v7163_v44 = vsub.f32 1.0, %v8609_v39 }
 0x39a   : >> { %v7165_v2 = vsub.f32 1.0, %v8611_v22 }
 0x39b   : >> { %v8613_v7 = vpop.eup %8612  ;;  %v7167_v37 = vmul.f32 %v7163_v44, %v7102_v11  ;;  %v7229_v41 = vsub.f32 1.0, %v7163_v44 }
 0x39c   : >> { %v7169_v40 = vmul.f32 %v7165_v2, %v7104_v48  ;;  %v7231_v3 = vsub.f32 1.0, %v7165_v2  ;;  %v7164_v43 = vsub.f32 1.0, %v8613_v7  ;;  %v8615_v28 = vpop.eup %8614 }
 0x39d   : >> { %v11752_v1 = vadd.f32 %v7167_v37, %v11681_v26   ;;  %v7197_v19 = vmul.f32 %v7180_v24, %v7167_v37  ;;  %v7208_v23 = vrot.slane %v7167_v37, %v12590_v14  ;;  %v7233_v25 = vmul.f32 %v7229_v41, %v7102_v11   ;;  %v8617_v8 = vpop.eup %8616  ;;  %v12645_v41 = vld [vmem:[#allocation6_spill] sm:$0xff] (%p11787_p7) }
 0x39e   : >> { %v11756_v12 = vadd.f32 %v7169_v40, %v11686_v29   ;;  %v7199_v9 = vmul.f32 %v7188_v51, %v7169_v40  ;;  %v7216_v42 = vrot.slane %v7169_v40, %v12590_v14  ;;  %v7235_v30 = vmul.f32 %v7231_v3, %v7104_v48   ;;  %v8619_v21 = vpop.eup %8618 }
 0x39f   : >> { %v11760_v2 = vadd.f32 %v7197_v19, %v11693_v46   ;;  %v7221_v32 = vmul.f32 %v8617_v8, %v7208_v23  ;;  %v7168_v33 = vmul.f32 %v7164_v43, %v7103_v49  ;;  %v7230_v26 = vsub.f32 1.0, %v7164_v43  ;;  %v8621_v46 = vpop.eup %8620  ;;  %v12650_v8 = vld [vmem:[#allocation11_spill] sm:$0xff] (%p11787_p7) }
 0x3a0   : >> { %v11763_v20 = vadd.f32 %v7199_v9, %v11699_v6   ;;  %v7223_v50 = vmul.f32 %v8619_v21, %v7216_v42  ;;  %v7166_v34 = vsub.f32 1.0, %v8615_v28  ;;  %v7239_v3 = vsub.f32 (%p11787_p7), 1.0, %v11756_v12  ;;  %v12651_v42 = vld [vmem:[#allocation7_spill] sm:$0xff] (%p11787_p7) }
 0x3a1   : >> { %v12622_v5 = vmov %v11760_v2  ;;  %v7225_v29 = vadd.f32 %v7221_v32, %v11705_v57   ;;  %v11768_v36 = vadd.f32 %v7168_v33, %v11702_v63   ;;  %v7198_v0 = vmul.f32 %v7184_v31, %v7168_v33  ;;  %v8623_v2 = vpop.eup %8622 }
 0x3a2   : >> { %v12623_v59 = vmov %v11763_v20  ;;  %v7212_v38 = vrot.slane %v7168_v33, %v12590_v14  ;;  %v11772_v63 = vadd.f32 %v7223_v50, %v11712_v16   ;;  %v7234_v35 = vmul.f32 %v7230_v26, %v7103_v49  }
 0x3a3   : >> { %v7170_v22 = vmul.f32 %v7166_v34, %v7105_v27  ;;  %v7232_v6 = vsub.f32 1.0, %v7166_v34  ;;  %v11775_v19 = vadd.f32 %v7198_v0, %v11715_v17   ;;  %v12631_v23 = vmov %v7225_v29  ;;  %v12644_v17 = vld [vmem:[#allocation12_spill] sm:$0xff] (%p11787_p7) }
 0x3a4   : >> { %v12624_v39 = vmov %v11772_v63  ;;  %v7222_v47 = vmul.f32 %v8621_v46, %v7212_v38  ;;  %v12637_v16 = vmov %v11756_v12  ;;  %v12639_v46 = vmov %v11752_v1 }
 0x3a5   : >> { %v12625_v11 = vmov %v11775_v19  ;;  %v11778_v44 = vadd.f32 %v7170_v22, %v11709_v18   ;;  %v7200_v57 = vmul.f32 %v7192_v15, %v7170_v22  ;;  %v7220_v24 = vrot.slane %v7170_v22, %v12590_v14  ;;  %v12643_v14 = vld [vmem:[#allocation10_spill] sm:$0xff] (%p11787_p7) }
 0x3a6   : >> { %v7236_v48 = vmul.f32 %v7232_v6, %v7105_v27   ;;  %v7226_v51 = vadd.f32 %v7222_v47, %v11722_v10   ;;  %v12634_v19 = vmov %v12625_v11  ;;  %v12638_v15 = vmov %v11768_v36 }
 0x3a7   : >> { %v11783_v32 = vadd.f32 %v7200_v57, %v11719_v4   ;;  %v7224_v63 = vmul.f32 %v8623_v2, %v7220_v24  ;;  %v12635_v2 = vmov %v12622_v5  ;;  %v12636_v6 = vmov %v11778_v44  ;;  %1518 = sbr.rel (!%p11787_p7) target bundleno = 409 (0x199), region = 89  ;;  %v12649_v15 = vld [vmem:[#allocation30_spill] sm:$0xff] (%p11787_p7) }
 0x3a8   : >> { %v12630_v20 = vmov %v7226_v51  ;;  %v12640_v4 = vmov %v7236_v48  ;;  %v12641_v34 = vmov %v7234_v35  ;;  %v12642_v18 = vmov %v7233_v25 }
 0x3a9   : >> { %v12626_v31 = vmov %v11783_v32  ;;  %v7228_v7 = vadd.f32 %v7224_v63, %v11725_v62   ;;  %v12629_v63 = vmov %v12624_v39  ;;  %v12633_v62 = vmov %v12623_v59 }
 0x3aa   : >> { %v12632_v32 = vmov %v12626_v31  ;;  %vm7261_vm10 = vcmp.gt.f32.partialorder (%p11787_p7), %v12643_v14, 1e-06  ;;  %vm7262_vm11 = vcmp.gt.f32.partialorder (%p11787_p7), %v12644_v17, 1e-06  ;;  %v7237_v10 = vsub.f32 (%p11787_p7), 1.0, %v11752_v1 }
 0x3ab   : >> { %v12628_v50 = vmov %v7228_v7  ;;  %v7263_v18 = vsel (%p11787_p7), %vm7261_vm10, %v12643_v14, 1.0  ;;  %v7264_v13 = vsel (%p11787_p7), %vm7262_vm11, %v12644_v17, 1.0  ;;  %v7238_v37 = vsub.f32 (%p11787_p7), 1.0, %v11768_v36 }
 0x3ac   : > { %8624 = vrcp.f32 %v7263_v18  ;;  %v7244_v40 = vrot.slane %v7237_v10, %v12645_v41  ;;  %v7240_v49 = vsub.f32 1.0, %v11778_v44  ;;  %v7265_v53 = vsub.f32 %v12622_v5, %v12646_v60 }
 0x3ad   : > { %8626 = vrcp.f32 %v7264_v13  ;;  %v7248_v56 = vrot.slane %v7238_v37, %v12645_v41  ;;  %v7266_v55 = vsub.f32 %v12625_v11, %v12647_v54  ;;  %v7252_v58 = vrot.slane %v7239_v3, %v12645_v41  ;;  %v12652_v37 = vld [vmem:[#allocation13_spill] sm:$0xff] }
 0x3ae   : > { %v7257_v61 = vadd.f32 %v7244_v40, %v7225_v29  ;;  %v7267_v52 = vsub.f32 %v12623_v59, %v12648_v45  ;;  %v7256_v30 = vrot.slane %v7240_v49, %v12645_v41  ;;  %v7269_v16 = vmax.f32 %v7265_v53, 0.0 }
 0x3af   : > { %v7258_v4 = vadd.f32 %v7248_v56, %v7226_v51  ;;  %v7270_v62 = vmax.f32 %v7266_v55, 0.0  ;;  %v7268_v43 = vsub.f32 %v12626_v31, %v12649_v15  ;;  %v7329_v19 = vrot.slane %v12622_v5, 4 }
 0x3b0   : > { %v7341_v23 = vrot.slane %v11752_v1, 3  ;;  %v7354_v9 = vrot.slane %v12650_v8, %v12645_v41  ;;  %v7305_v32 = vrot.slane %v7257_v61, 1  ;;  %v7259_v33 = vadd.f32 %v7252_v58, %v12624_v39 }
 0x3b1   : > { %v7271_v26 = vmax.f32 %v7267_v52, 0.0  ;;  %v7260_v20 = vadd.f32 %v7256_v30, %v7228_v7  ;;  %v7306_v34 = vrot.slane %v7258_v4, 1  ;;  %v7272_v29 = vmax.f32 %v7268_v43, 0.0 }
 0x3b2   : > { %v7330_v1 = vrot.slane %v12625_v11, 4  ;;  %v7342_v0 = vrot.slane %v11768_v36, 3  ;;  %v7358_v38 = vrot.slane %v12650_v8, %v12651_v42  ;;  %v7307_v6 = vrot.slane %v7259_v33, 1 }
 0x3b3   : > { %v7331_v47 = vrot.slane %v12623_v59, 4  ;;  %v7343_v57 = vrot.slane %v11756_v12, 3  ;;  %v7308_v24 = vrot.slane %v7260_v20, 1  ;;  %v7332_v7 = vrot.slane %v12626_v31, 4 }
 0x3b4   : > { %v7344_v59 = vrot.slane %v11778_v44, 3  ;;  %v7362_v40 = vrot.slane %v12652_v37, %v12645_v41  ;;  %v7366_v31 = vrot.slane %v12652_v37, %v12651_v42 }
 0x3b9   : > { %v8625_v28 = vpop.eup %8624 }
 0x3ba   : > { %v7280_v25 = vrot.slane %v8625_v28, %v12645_v41  ;;  %v7284_v21 = vrot.slane %v8625_v28, %v12651_v42  ;;  %v8627_v5 = vpop.eup %8626 }
 0x3bb   : > { %v7288_v22 = vrot.slane %v8627_v5, %v12645_v41  ;;  %v7292_v39 = vrot.slane %v8627_v5, %v12651_v42 }
 0x3bc   : > { %v7297_v50 = vmul.f32 %v7280_v25, %v7269_v16  ;;  %v7298_v27 = vmul.f32 %v7284_v21, %v7270_v62 }
 0x3bd   : > { %v7299_v36 = vmul.f32 %v7288_v22, %v7271_v26  ;;  %v7300_v2 = vmul.f32 %v7292_v39, %v7272_v29 }
 0x3be   : > { %v7317_v46 = vrot.slane %v7297_v50, 5  ;;  %v7318_v35 = vrot.slane %v7298_v27, 5 }
 0x3bf   : > { %v7319_v18 = vrot.slane %v7299_v36, 5  ;;  %v7320_v17 = vrot.slane %v7300_v2, 5 }
 0x3c0   : > { %v7371_v48 = vsel %vm446_vm0, %v7305_v32, %v7317_v46  ;;  %v7372_v11 = vsel %vm446_vm0, %v7306_v34, %v7318_v35 }
 0x3c1   : > { %v7375_v51 = vsel %vm621_vm2, %v7371_v48, %v7329_v19  ;;  %v7376_v63 = vsel %vm621_vm2, %v7372_v11, %v7330_v1  ;;  %v7373_v49 = vsel %vm446_vm0, %v7307_v6, %v7319_v18  ;;  %v7374_v60 = vsel %vm446_vm0, %v7308_v24, %v7320_v17 }
 0x3c2   : > { %v7380_v12 = vsel %vm7379_vm12, %v7375_v51, %v7341_v23  ;;  %v7381_v14 = vsel %vm7379_vm12, %v7376_v63, %v7342_v0  ;;  %v7377_v41 = vsel %vm621_vm2, %v7373_v49, %v7331_v47  ;;  %v7378_v53 = vsel %vm621_vm2, %v7374_v60, %v7332_v7 }
 0x3c3   : > { %v7384_v10 = vsel %vm451_vm1, %v7380_v12, %v7354_v9  ;;  %v7385_v13 = vsel %vm451_vm1, %v7381_v14, %v7358_v38  ;;  %v7382_v56 = vsel %vm7379_vm12, %v7377_v41, %v7343_v57  ;;  %v7383_v54 = vsel %vm7379_vm12, %v7378_v53, %v7344_v59 }
 0x3c4   : > { %v7389_v3 = vsel %vm7388_vm13, %v7384_v10, 0.0  ;;  %v7390_v44 = vsel %vm7388_vm13, %v7385_v13, 0.0  ;;  %v7386_v55 = vsel %vm451_vm1, %v7382_v56, %v7362_v40  ;;  %v7387_v61 = vsel %vm451_vm1, %v7383_v54, %v7366_v31 }
 0x3c5   : > { %7393 = vst [vmem:[%s9842_s13] sm:$0xff] %v7389_v3  ;;  %7394 = vst [vmem:[%s9842_s13 + $0x8] sm:$0xff] %v7390_v44  ;;  %v7391_v58 = vsel %vm7388_vm13, %v7386_v55, 0.0  ;;  %v7392_v45 = vsel %vm7388_vm13, %v7387_v61, 0.0 }
 0x3c6   : > { %7395 = vst [vmem:[%s9842_s13 + $0x10] sm:$0xff] %v7391_v58  ;;  %7396 = vst [vmem:[%s9842_s13 + $0x18] sm:$0xff] %v7392_v45 }
 0x3c7   : > { %8641 = shalt.err (!%p8638_p0)
}
 0x3c8   : > { %s8642_s13 = scalar_lea.hbm %s11902_s25, 512  ;;  %s8646_s29 = scalar_lea.hbm %s11955_s6, 2048 }
 0x3c9   : > { %p8643_p1 = scmp.ne.s32.totalorder %s11902_s25, %s8642_s13  ;;  %p8647_p4 = scmp.lt.s32.totalorder %s11902_s25, %s11955_s6 }
 0x3ca   : > { %p8648_p7 = scmp.lt.s32.totalorder %s8646_s29, %s8642_s13 }
 0x3cb   : > { %p8644_p2 = pnand %p8643_p1, %p8904_p5 }
 0x3cc   : > { %p8649_p8 = por %p8648_p7, %p8647_p4 }
 0x3cd   : > { %p8645_p3 = pneg %p8644_p2 }
 0x3cf   : > { %p8650_p9 = pnand %p8649_p8, %p8645_p3 }
 0x3d1   : > { %8653 = shalt.err (!%p8650_p9)
}
 0x3d2   : > { %8160 = dma.vmem_to_hbm [thread:$0]  (%p8904_p5), %s11904_s12, 512, %s11902_s25, %s7398_s19  }
 0x3d3 PF: > { %p8166_p10 = scmp.ge.s32.totalorder %s8756_s24, 2  ;;  %s7424_s18 = sand.u32 1, %s8744_s21  }
 0x3d4   : > { %s7425_s11 = scalar_lea.sflag [#allocation4], %s7424_s18 }
 0x3d5   : > { %p8163_p11 = pnand %p8166_p10, %p8908_p6 }
 0x3d7   : > { %p8164_p12 = pneg %p8163_p11 }
 0x3d9   : > { %8739 = dma.done.wait (%p8164_p12), %s7425_s11, 512  }
 0x3da   : > { %8741 = vsyncadd (%p8164_p12), %s7425_s11, 4294966784  ;;  %p16_p13 = scmp.ge.s32.totalorder %s8891_s27, 6   ;;  %s12654_s21 = smov %s8748_s22 }
 0x3db   : > { %s12655_s22 = smov %s8752_s23  ;;  %s12656_s23 = smov %s8902_s30 }
 0x3dc   : > { %s12657_s24 = smov %s8891_s27  ;;  %18 = sbr.rel (!%p16_p13) target bundleno = 6 (0x6), region = 100 }
 0x3e1   :  { %7430 = vsyncpa [#allocation4], 1 }
 0x3e2   :  { %7432 = vsyncpa [#allocation4 + $0x1], 1 }

</bundles_post_ra>
